<compile_context>
chip_gen: v6e
topology: v6e:2x2x1
jax: 0.10.0
libtpu: 0.0.40
codegen_flags: <defaults>
</compile_context>

<pallas_src>
import functools
import math

import jax
import jax.numpy as jnp
from jax.experimental import pallas as pl
from jax.experimental.pallas import tpu as pltpu

LANE = 128  # lane width; all padded feature dims are multiples of this


def _round_up(x, m):
    return ((x + m - 1) // m) * m


def _pick_tile(m, target=512):
    """Largest row tile in {128,256,512} dividing m, preferring >=2 grid steps."""
    best = 128
    for t in (256, 512):
        if t <= target and m % t == 0 and m // t >= 2:
            best = t
    return best


# ------------------------------ Pallas kernels ------------------------------

def _linear_kernel(x_ref, w_ref, b_ref, o_ref):
    y = jnp.dot(x_ref[...].astype(jnp.bfloat16), w_ref[...].astype(jnp.bfloat16),
                preferred_element_type=jnp.float32) + b_ref[...]
    o_ref[...] = y.astype(o_ref.dtype)


def linear(x, w, b, out_dtype=jnp.float32):
    """y = x @ w + b; rows tiled, weights resident, bf16 MXU / f32 accum."""
    M, K = x.shape
    _, N = w.shape
    tm = _pick_tile(M)
    assert M % tm == 0
    return pl.pallas_call(
        _linear_kernel,
        out_shape=jax.ShapeDtypeStruct((M, N), out_dtype),
        grid=(M // tm,),
        in_specs=[
            pl.BlockSpec((tm, K), lambda i: (i, 0)),
            pl.BlockSpec((K, N), lambda i: (0, 0)),
            pl.BlockSpec((1, N), lambda i: (0, 0)),
        ],
        out_specs=pl.BlockSpec((tm, N), lambda i: (i, 0)),
        compiler_params=pltpu.CompilerParams(dimension_semantics=("parallel",)),
    )(x, w, b.reshape(1, N))


def _edge_attn_kernel(qs_ref, kd_ref, vd_ref, ea_ref, we_ref, be_ref,
                      hsel_ref, hselT_ref, wo_ref, bo_ref, o_ref, *, scale):
    # elementwise math in f32 (v5e has no bf16 VPU); bf16 only on MXU operands
    q = qs_ref[...].astype(jnp.float32)
    k = kd_ref[...].astype(jnp.float32)
    v = vd_ref[...].astype(jnp.float32)
    # fused edge-feature projection (self.e)
    e = jnp.dot(ea_ref[...].astype(jnp.bfloat16), we_ref[...].astype(jnp.bfloat16),
                preferred_element_type=jnp.float32) + be_ref[...]        # [te, H*D]
    # per-head reduction mapped to the MXU via a 0/1 head-selector matrix
    s = jnp.dot((q * k + e * e).astype(jnp.bfloat16), hsel_ref[...],
                preferred_element_type=jnp.float32) * scale              # [te, H]
    # softmax over the head axis (torch: F.softmax(scores, dim=-1)); dropout=id.
    m = jnp.max(s, axis=-1, keepdims=True)
    p = jnp.exp(s - m)
    alpha = p * pl.reciprocal(jnp.sum(p, axis=-1, keepdims=True), approx=True)
    # broadcast alpha back over each head's D lanes via selector^T (MXU)
    alpha_full = jnp.dot(alpha.astype(jnp.bfloat16), hselT_ref[...],
                         preferred_element_type=jnp.float32)             # [te, H*D]
    weighted = (alpha_full * v).astype(jnp.bfloat16)
    # fused output projection (self.out); wo is zero-padded to a lane-dense width
    out = jnp.dot(weighted, wo_ref[...].astype(jnp.bfloat16),
                  preferred_element_type=jnp.float32) + bo_ref[...]
    o_ref[...] = out.astype(o_ref.dtype)


def edge_attention(Qs, Kd, Vd, edge_attr, we, be, wo, bo, num_heads, head_dim):
    """Per-edge attention with fused edge / output projections.

    Qs/Kd/Vd: [E, H*D] bf16 (lane-dense); edge_attr: [E, edge_dim] f32.
    Returns [E, Cpad] f32 (lanes >= real out_dim are exactly zero).
    """
    E, HD = Qs.shape
    H, D = num_heads, head_dim
    EA = edge_attr.shape[1]
    Cout = wo.shape[1]
    te = _pick_tile(E)
    assert E % te == 0
    # head selector: hsel[d, h] = 1 iff channel d belongs to head h (bf16, MXU)
    hsel = (jnp.arange(HD)[:, None] // D == jnp.arange(H)[None, :]).astype(jnp.bfloat16)
    hselT = jnp.transpose(hsel)
    return pl.pallas_call(
        functools.partial(_edge_attn_kernel, scale=1.0 / math.sqrt(D)),
        out_shape=jax.ShapeDtypeStruct((E, Cout), jnp.float32),
        grid=(E // te,),
        in_specs=[
            pl.BlockSpec((te, HD), lambda i: (i, 0)),        # Q[src]  (bf16)
            pl.BlockSpec((te, HD), lambda i: (i, 0)),        # K[dst]  (bf16)
            pl.BlockSpec((te, HD), lambda i: (i, 0)),        # V[dst]  (bf16)
            pl.BlockSpec((te, EA), lambda i: (i, 0)),        # edge_attr
            pl.BlockSpec((EA, HD), lambda i: (0, 0)),        # we  (resident)
            pl.BlockSpec((1, HD), lambda i: (0, 0)),         # be
            pl.BlockSpec((HD, H), lambda i: (0, 0)),         # head selector
            pl.BlockSpec((H, HD), lambda i: (0, 0)),         # head selector^T
            pl.BlockSpec((HD, Cout), lambda i: (0, 0)),      # wo  (resident, padded)
            pl.BlockSpec((1, Cout), lambda i: (0, 0)),       # bo
        ],
        out_specs=pl.BlockSpec((te, Cout), lambda i: (i, 0)),
        compiler_params=pltpu.CompilerParams(dimension_semantics=("parallel",)),
    )(Qs, Kd, Vd, edge_attr, we, be.reshape(1, HD), hsel, hselT,
      wo, bo.reshape(1, Cout))


def _ffn_block_kernel(*refs, c_real, fuse_qkv):
    """LN1 -> FFN -> LN2, optionally fused with the NEXT layer's QKV projection.

    All channel dims are zero-padded to lane-dense widths; LayerNorm statistics
    use the real channel count c_real (padded lanes are exactly zero).
    """
    if fuse_qkv:
        (h_ref, g1_ref, be1_ref, w1_ref, b1_ref, w2_ref, b2_ref, g2_ref, be2_ref,
         wq_ref, bq_ref, o_ref, qkv_ref) = refs
    else:
        (h_ref, g1_ref, be1_ref, w1_ref, b1_ref, w2_ref, b2_ref, g2_ref, be2_ref,
         o_ref) = refs
    eps = 1e-5
    inv_c = 1.0 / c_real
    h = h_ref[...]
    # LayerNorm 1 (bn1 = Identity); padded lanes of h are zero
    mu = jnp.sum(h, axis=-1, keepdims=True) * inv_c
    var = jnp.maximum(jnp.sum(h * h, axis=-1, keepdims=True) * inv_c - mu * mu, 0.0)
    h = (h - mu) * jax.lax.rsqrt(var + eps) * g1_ref[...] + be1_ref[...]
    # FFN: Linear -> ReLU -> (Dropout = identity in eval) -> Linear
    y = jnp.dot(h.astype(jnp.bfloat16), w1_ref[...].astype(jnp.bfloat16),
                preferred_element_type=jnp.float32) + b1_ref[...]
    y = jnp.maximum(y, 0.0)
    y = jnp.dot(y.astype(jnp.bfloat16), w2_ref[...].astype(jnp.bfloat16),
                preferred_element_type=jnp.float32) + b2_ref[...]
    # LayerNorm 2 (bn2 = Identity); padded lanes of y are zero
    mu = jnp.sum(y, axis=-1, keepdims=True) * inv_c
    var = jnp.maximum(jnp.sum(y * y, axis=-1, keepdims=True) * inv_c - mu * mu, 0.0)
    h_out = (y - mu) * jax.lax.rsqrt(var + eps) * g2_ref[...] + be2_ref[...]
    o_ref[...] = h_out.astype(o_ref.dtype)
    if fuse_qkv:
        # fused next-layer QKV projection (bf16 output, lane-dense 3*H*D wide)
        qkv = jnp.dot(h_out.astype(jnp.bfloat16), wq_ref[...].astype(jnp.bfloat16),
                      preferred_element_type=jnp.float32) + bq_ref[...]
        qkv_ref[...] = qkv.astype(qkv_ref.dtype)


def ffn_block(h, g1, be1, w1, b1, w2, b2, g2, be2, *, c_real, wqkv=None, bqkv=None):
    """Fused LayerNorm -> FFN -> LayerNorm (+ optional next-layer QKV), row tiled."""
    M, Cp = h.shape
    C2p = w1.shape[1]
    tm = _pick_tile(M)
    assert M % tm == 0
    fuse = wqkv is not None

    def const(shape):
        return pl.BlockSpec(shape, lambda i: (0, 0))

    in_specs = [
        pl.BlockSpec((tm, Cp), lambda i: (i, 0)),
        const((1, Cp)), const((1, Cp)),
        const((Cp, C2p)), const((1, C2p)),
        const((C2p, Cp)), const((1, Cp)),
        const((1, Cp)), const((1, Cp)),
    ]
    args = [h, g1.reshape(1, Cp), be1.reshape(1, Cp), w1, b1.reshape(1, C2p),
            w2, b2.reshape(1, Cp), g2.reshape(1, Cp), be2.reshape(1, Cp)]
    out_shapes = [jax.ShapeDtypeStruct((M, Cp), jnp.float32)]
    out_specs = [pl.BlockSpec((tm, Cp), lambda i: (i, 0))]
    if fuse:
        QN = wqkv.shape[1]
        in_specs += [const((Cp, QN)), const((1, QN))]
        args += [wqkv, bqkv.reshape(1, QN)]
        out_shapes.append(jax.ShapeDtypeStruct((M, QN), jnp.bfloat16))
        out_specs.append(pl.BlockSpec((tm, QN), lambda i: (i, 0)))

    res = pl.pallas_call(
        functools.partial(_ffn_block_kernel, c_real=c_real, fuse_qkv=fuse),
        out_shape=tuple(out_shapes) if fuse else out_shapes[0],
        grid=(M // tm,),
        in_specs=in_specs,
        out_specs=tuple(out_specs) if fuse else out_specs[0],
        compiler_params=pltpu.CompilerParams(dimension_semantics=("parallel",)),
    )(*args)
    if fuse:
        return res[0], res[1]
    return res


# ------------------------ parameter initialization -------------------------

def init_linear_params(key, fan_in, fan_out):
    kw, kb = jax.random.split(key)
    w = jax.random.normal(kw, (fan_in, fan_out), jnp.float32) / math.sqrt(fan_in)
    b = jax.random.normal(kb, (fan_out,), jnp.float32) * 0.01
    return w, b


def init_gt_layer(key, in_dim, out_dim, edge_dim, num_heads, pad_qkv_in=None):
    """Weights are zero-padded once at init to lane-dense widths (128 lanes)."""
    ks = jax.random.split(key, 7)
    hd = out_dim * num_heads
    cp = _round_up(out_dim, LANE)
    c2p = _round_up(out_dim * 2, LANE)
    p = {}
    wq, bq = init_linear_params(ks[0], in_dim, hd)
    wk, bk = init_linear_params(ks[1], in_dim, hd)
    wv, bv = init_linear_params(ks[2], in_dim, hd)
    wqkv = jnp.concatenate([wq, wk, wv], axis=1)   # fused QKV: one pass over x
    if pad_qkv_in is not None:                     # input comes lane-padded
        wqkv = jnp.pad(wqkv, ((0, pad_qkv_in - in_dim), (0, 0)))
    p["wqkv"] = wqkv
    p["bqkv"] = jnp.concatenate([bq, bk, bv])
    p["we"], p["be"] = init_linear_params(ks[3], edge_dim, hd)
    wo, bo = init_linear_params(ks[4], hd, out_dim)
    p["wo"] = jnp.pad(wo, ((0, 0), (0, cp - out_dim)))
    p["bo"] = jnp.pad(bo, (0, cp - out_dim))
    p["ln1_g"] = jnp.pad(jnp.ones((out_dim,), jnp.float32), (0, cp - out_dim))
    p["ln1_b"] = jnp.zeros((cp,), jnp.float32)
    w1, b1 = init_linear_params(ks[5], out_dim, out_dim * 2)
    p["w1"] = jnp.pad(w1, ((0, cp - out_dim), (0, c2p - out_dim * 2)))
    p["b1"] = jnp.pad(b1, (0, c2p - out_dim * 2))
    w2, b2 = init_linear_params(ks[6], out_dim * 2, out_dim)
    p["w2"] = jnp.pad(w2, ((0, c2p - out_dim * 2), (0, cp - out_dim)))
    p["b2"] = jnp.pad(b2, (0, cp - out_dim))
    p["ln2_g"] = jnp.pad(jnp.ones((out_dim,), jnp.float32), (0, cp - out_dim))
    p["ln2_b"] = jnp.zeros((cp,), jnp.float32)
    return p


def init_graph_transformer(key, in_ch, hidden, out_ch, num_layers, num_heads,
                           edge_dim, bert_dim, projection_dim):
    keys = jax.random.split(key, num_layers + 4)
    hp = _round_up(hidden, LANE)
    layers = [init_gt_layer(keys[0], in_ch, hidden, edge_dim, num_heads)]
    for i in range(num_layers - 2):
        layers.append(init_gt_layer(keys[1 + i], hidden, hidden, edge_dim,
                                    num_heads, pad_qkv_in=hp))
    layers.append(init_gt_layer(keys[num_layers - 1], hidden, out_ch, edge_dim,
                                num_heads, pad_qkv_in=hp))
    p = {"layers": layers}
    p["class1_w"], p["class1_b"] = init_linear_params(keys[num_layers], out_ch, bert_dim)
    p["class2_w"], p["class2_b"] = init_linear_params(keys[num_layers + 1], bert_dim * 2, 2)
    p["proj1_w"], p["proj1_b"] = init_linear_params(keys[num_layers + 2], bert_dim * 2, projection_dim)
    p["proj2_w"], p["proj2_b"] = init_linear_params(keys[num_layers + 3], projection_dim, projection_dim)
    return p


# ------------------------------ forward pass --------------------------------

def graph_transformer_forward(p, layer_meta, x, edge_index, edge_attr, batch,
                              bert, num_graphs):
    if bert.ndim == 3:
        bert = bert.squeeze(1)
    if edge_attr.ndim == 1:
        edge_attr = edge_attr[:, None]
    N = x.shape[0]
    E = edge_index.shape[1]
    Np = _round_up(N, LANE)
    Ep = _round_up(E, LANE)
    # Pad node/edge rows ONCE; stay padded (lane- and row-dense) through all
    # layers.  Padded edges get src/dst == Np (dropped by segment_sum); padded
    # nodes get batch id == num_graphs (dropped by the pooling sum).
    x = jnp.pad(x, ((0, Np - N), (0, 0)))
    edge_attr = jnp.pad(edge_attr, ((0, Ep - E), (0, 0)))
    src = jnp.pad(edge_index[0], (0, Ep - E), constant_values=Np)
    dst = jnp.pad(edge_index[1], (0, Ep - E), constant_values=Np)
    batch_p = jnp.pad(batch, (0, Np - N), constant_values=num_graphs)

    L = len(p["layers"])
    # First layer's fused QKV projection from the raw node features (bf16 out).
    qkv = linear(x, p["layers"][0]["wqkv"], p["layers"][0]["bqkv"],
                 out_dtype=jnp.bfloat16)

    h = None
    for li, lp in enumerate(p["layers"]):
        H, D = layer_meta[li]
        HD = H * D
        Q, K, V = qkv[:, :HD], qkv[:, HD:2 * HD], qkv[:, 2 * HD:3 * HD]
        # graph glue: data-dependent gathers stay in plain JAX (bf16 traffic)
        Qs, Kd, Vd = Q[src], K[dst], V[dst]                       # [Ep, H*D]
        out_e = edge_attention(Qs, Kd, Vd, edge_attr, lp["we"], lp["be"],
                               lp["wo"], lp["bo"], H, D)          # [Ep, Cpad]
        # scatter(out, edge_index[0], reduce='mean'); padded edges carry OOB src
        # and are dropped by segment_sum.
        seg = jax.ops.segment_sum(out_e, src, num_segments=Np)
        cnt = jax.ops.segment_sum(jnp.ones((Ep,), jnp.float32), src,
                                  num_segments=Np)[:, None]
        h_attn = jnp.where(cnt > 0, seg / jnp.maximum(cnt, 1.0), 0.0)
        if li + 1 < L:
            nxt = p["layers"][li + 1]
            h, qkv = ffn_block(h_attn, lp["ln1_g"], lp["ln1_b"], lp["w1"], lp["b1"],
                               lp["w2"], lp["b2"], lp["ln2_g"], lp["ln2_b"],
                               c_real=D, wqkv=nxt["wqkv"], bqkv=nxt["bqkv"])
        else:
            h = ffn_block(h_attn, lp["ln1_g"], lp["ln1_b"], lp["w1"], lp["b1"],
                          lp["w2"], lp["b2"], lp["ln2_g"], lp["ln2_b"], c_real=D)

    out_dim_last = layer_meta[-1][1]
    x_final = h[:, :out_dim_last]          # slice the real channels once
    # global_mean_pool (plain JAX glue)
    pooled = jax.ops.segment_sum(x_final, batch_p, num_segments=num_graphs)
    counts = jax.ops.segment_sum(jnp.ones((Np,), jnp.float32), batch_p,
                                 num_segments=num_graphs)[:, None]
    pooled = pooled / jnp.maximum(counts, 1.0)

    # Tiny post-pool heads (2 rows): plain XLA dots are cheaper than pallas_call.
    h1 = pooled @ p["class1_w"] + p["class1_b"]
    combo = jnp.concatenate([h1, bert], axis=1)
    logits = combo @ p["class2_w"] + p["class2_b"]
    z = jnp.maximum(combo @ p["proj1_w"] + p["proj1_b"], 0.0)
    z = z @ p["proj2_w"] + p["proj2_b"]
    return logits, h1, bert, z


# ---------------------------------- main ------------------------------------

if __name__ == "__main__":
    key = jax.random.PRNGKey(0)
    in_ch, hidden, out_ch = 16, 32, 32
    num_layers, num_heads = 3, 4
    edge_dim, bert_dim, proj_dim = 8, 32, 16
    N, B = 12, 2

    kp, kx, ke, kb, kr1, kr2 = jax.random.split(key, 6)
    params = init_graph_transformer(kp, in_ch, hidden, out_ch, num_layers,
                                    num_heads, edge_dim, bert_dim, proj_dim)
    # static per-layer (num_heads, out_dim) metadata; head_dim == layer out_dim
    layer_meta = [(num_heads, hidden)] * (num_layers - 1) + [(num_heads, out_ch)]

    x = jax.random.normal(kx, (N, in_ch), jnp.float32)
    # edges: self-loops on every node + random edges
    self_loops = jnp.stack([jnp.arange(N), jnp.arange(N)])
    rnd_src = jax.random.randint(kr1, (12,), 0, N)
    rnd_dst = jax.random.randint(kr2, (12,), 0, N)
    edge_index = jnp.concatenate([self_loops, jnp.stack([rnd_src, rnd_dst])],
                                 axis=1).astype(jnp.int32)
    E = edge_index.shape[1]
    edge_attr = jax.random.normal(ke, (E, edge_dim), jnp.float32)
    batch = jnp.concatenate([jnp.zeros(N // 2, jnp.int32),
                             jnp.ones(N - N // 2, jnp.int32)])
    bert = jax.random.normal(kb, (B, 1, bert_dim), jnp.float32)  # squeezed inside

    fwd = jax.jit(lambda prm, xx, ei, ea, bb, bt: graph_transformer_forward(
        prm, layer_meta, xx, ei, ea, bb, bt, num_graphs=B))
    logits, h1, bert_out, z = fwd(params, x, edge_index, edge_attr, batch, bert)
    jax.block_until_ready((logits, h1, bert_out, z))
    assert logits.shape == (B, 2)
    assert h1.shape == (B, bert_dim)
    assert bert_out.shape == (B, bert_dim)
    assert z.shape == (B, proj_dim)
    print("KERNEL_OK")
</pallas_src>

<mosaic_0001>
module attributes {stable_mosaic.version = 11 : i64} {
  func.func private @main(%arg0: i32) attributes {dimension_semantics = [#tpu.dimension_semantics<core_parallel>], iteration_bounds = array<i64: 2>, tpu.core_type = #tpu.core_type<sc_scalar_subcore>, window_params = []} {
    return
  }
}

module attributes {stable_mosaic.version = 11 : i64} {
  func.func private @main(%arg0: i32) attributes {dimension_semantics = [#tpu.dimension_semantics<core_parallel>], iteration_bounds = array<i64: 2>, tpu.core_type = #tpu.core_type<sc_scalar_subcore>, window_params = []} {
    return
  }
}

module attributes {stable_mosaic.version = 11 : i64} {
  func.func @_linear_kernel(%arg0: i32, %arg1: memref<128x16xf32, #tpu.memory_space<vmem>>, %arg2: memref<16x384xf32, #tpu.memory_space<vmem>>, %arg3: memref<1x384xf32, #tpu.memory_space<vmem>>, %arg4: memref<128x384xbf16, #tpu.memory_space<vmem>>) attributes {dimension_semantics = [#tpu.dimension_semantics<parallel>], iteration_bounds = array<i64: 1>, scalar_prefetch = 0 : i64, scratch_operands = 0 : i64, tpu.core_type = #tpu.core_type<tc>, window_params = [{transform_indices = @transform_0, window_bounds = array<i64: 128, 16>}, {pipeline_mode = #tpu.pipeline_mode<synchronous>, transform_indices = @transform_1, window_bounds = array<i64: 16, 384>}, {pipeline_mode = #tpu.pipeline_mode<synchronous>, transform_indices = @transform_2, window_bounds = array<i64: 1, 384>}, {transform_indices = @transform_3, window_bounds = array<i64: 128, 384>}]} {
    %c0 = arith.constant 0 : index
    %c0_0 = arith.constant 0 : index
    %0 = vector.load %arg1[%c0, %c0_0] : memref<128x16xf32, #tpu.memory_space<vmem>>, vector<128x16xf32>
    %1 = arith.truncf %0 : vector<128x16xf32> to vector<128x16xbf16>
    %c0_1 = arith.constant 0 : index
    %c0_2 = arith.constant 0 : index
    %2 = vector.load %arg2[%c0_1, %c0_2] : memref<16x384xf32, #tpu.memory_space<vmem>>, vector<16x384xf32>
    %3 = arith.truncf %2 : vector<16x384xf32> to vector<16x384xbf16>
    %cst = arith.constant dense<0.000000e+00> : vector<128x384xf32>
    %4 = tpu.matmul %1, %3, %cst {dimension_numbers = #tpu.dot_dimension_numbers<[1], [0], [0], [1], [0, 0, 1, 1], [], []>} : vector<128x16xbf16>, vector<16x384xbf16>, vector<128x384xf32> -> vector<128x384xf32>
    %c0_3 = arith.constant 0 : index
    %c0_4 = arith.constant 0 : index
    %5 = vector.load %arg3[%c0_3, %c0_4] : memref<1x384xf32, #tpu.memory_space<vmem>>, vector<1x384xf32>
    %6 = vector.broadcast %5 : vector<1x384xf32> to vector<128x384xf32>
    %7 = arith.addf %4, %6 : vector<128x384xf32>
    %8 = arith.truncf %7 : vector<128x384xf32> to vector<128x384xbf16>
    %c0_5 = arith.constant 0 : index
    %c0_6 = arith.constant 0 : index
    %9 = vector.load %arg4[%c0_5, %c0_6] : memref<128x384xbf16, #tpu.memory_space<vmem>>, vector<128x384xbf16>
    tpu.vector_store %arg4[%c0_5, %c0_6], %8 {strides = array<i32>} : memref<128x384xbf16, #tpu.memory_space<vmem>>, vector<128x384xbf16>,
    return
  }
  func.func @transform_0(%arg0: i32) -> (i32, i32) {
    %c0_i32 = arith.constant 0 : i32
    %c0_i32_0 = arith.constant 0 : i32
    return %arg0, %c0_i32 : i32, i32
  }
  func.func @transform_1(%arg0: i32) -> (i32, i32) {
    %c0_i32 = arith.constant 0 : i32
    %c0_i32_0 = arith.constant 0 : i32
    %c0_i32_1 = arith.constant 0 : i32
    return %c0_i32, %c0_i32_0 : i32, i32
  }
  func.func @transform_2(%arg0: i32) -> (i32, i32) {
    %c0_i32 = arith.constant 0 : i32
    %c0_i32_0 = arith.constant 0 : i32
    %c0_i32_1 = arith.constant 0 : i32
    return %c0_i32, %c0_i32_0 : i32, i32
  }
  func.func @transform_3(%arg0: i32) -> (i32, i32) {
    %c0_i32 = arith.constant 0 : i32
    %c0_i32_0 = arith.constant 0 : i32
    return %arg0, %c0_i32 : i32, i32
  }
}

module attributes {stable_mosaic.version = 11 : i64} {
  func.func @_edge_attn_kernel(%arg0: i32, %arg1: memref<128x128xbf16, #tpu.memory_space<vmem>>, %arg2: memref<128x128xbf16, #tpu.memory_space<vmem>>, %arg3: memref<128x128xbf16, #tpu.memory_space<vmem>>, %arg4: memref<128x8xf32, #tpu.memory_space<vmem>>, %arg5: memref<8x128xf32, #tpu.memory_space<vmem>>, %arg6: memref<1x128xf32, #tpu.memory_space<vmem>>, %arg7: memref<128x4xbf16, #tpu.memory_space<vmem>>, %arg8: memref<4x128xbf16, #tpu.memory_space<vmem>>, %arg9: memref<128x128xf32, #tpu.memory_space<vmem>>, %arg10: memref<1x128xf32, #tpu.memory_space<vmem>>, %arg11: memref<128x128xf32, #tpu.memory_space<vmem>>) attributes {dimension_semantics = [#tpu.dimension_semantics<parallel>], iteration_bounds = array<i64: 1>, scalar_prefetch = 0 : i64, scratch_operands = 0 : i64, tpu.core_type = #tpu.core_type<tc>, window_params = [{transform_indices = @transform_0, window_bounds = array<i64: 128, 128>}, {transform_indices = @transform_1, window_bounds = array<i64: 128, 128>}, {transform_indices = @transform_2, window_bounds = array<i64: 128, 128>}, {transform_indices = @transform_3, window_bounds = array<i64: 128, 8>}, {pipeline_mode = #tpu.pipeline_mode<synchronous>, transform_indices = @transform_4, window_bounds = array<i64: 8, 128>}, {pipeline_mode = #tpu.pipeline_mode<synchronous>, transform_indices = @transform_5, window_bounds = array<i64: 1, 128>}, {pipeline_mode = #tpu.pipeline_mode<synchronous>, transform_indices = @transform_6, window_bounds = array<i64: 128, 4>}, {pipeline_mode = #tpu.pipeline_mode<synchronous>, transform_indices = @transform_7, window_bounds = array<i64: 4, 128>}, {pipeline_mode = #tpu.pipeline_mode<synchronous>, transform_indices = @transform_8, window_bounds = array<i64: 128, 128>}, {pipeline_mode = #tpu.pipeline_mode<synchronous>, transform_indices = @transform_9, window_bounds = array<i64: 1, 128>}, {transform_indices = @transform_10, window_bounds = array<i64: 128, 128>}]} {
    %c0 = arith.constant 0 : index
    %c0_0 = arith.constant 0 : index
    %0 = vector.load %arg1[%c0, %c0_0] : memref<128x128xbf16, #tpu.memory_space<vmem>>, vector<128x128xbf16>
    %1 = arith.extf %0 : vector<128x128xbf16> to vector<128x128xf32>
    %c0_1 = arith.constant 0 : index
    %c0_2 = arith.constant 0 : index
    %2 = vector.load %arg2[%c0_1, %c0_2] : memref<128x128xbf16, #tpu.memory_space<vmem>>, vector<128x128xbf16>
    %3 = arith.extf %2 : vector<128x128xbf16> to vector<128x128xf32>
    %c0_3 = arith.constant 0 : index
    %c0_4 = arith.constant 0 : index
    %4 = vector.load %arg3[%c0_3, %c0_4] : memref<128x128xbf16, #tpu.memory_space<vmem>>, vector<128x128xbf16>
    %5 = arith.extf %4 : vector<128x128xbf16> to vector<128x128xf32>
    %c0_5 = arith.constant 0 : index
    %c0_6 = arith.constant 0 : index
    %6 = vector.load %arg4[%c0_5, %c0_6] : memref<128x8xf32, #tpu.memory_space<vmem>>, vector<128x8xf32>
    %7 = arith.truncf %6 : vector<128x8xf32> to vector<128x8xbf16>
    %c0_7 = arith.constant 0 : index
    %c0_8 = arith.constant 0 : index
    %8 = vector.load %arg5[%c0_7, %c0_8] : memref<8x128xf32, #tpu.memory_space<vmem>>, vector<8x128xf32>
    %9 = arith.truncf %8 : vector<8x128xf32> to vector<8x128xbf16>
    %cst = arith.constant dense<0.000000e+00> : vector<128x128xf32>
    %10 = tpu.matmul %7, %9, %cst {dimension_numbers = #tpu.dot_dimension_numbers<[1], [0], [0], [1], [0, 0, 1, 1], [], []>} : vector<128x8xbf16>, vector<8x128xbf16>, vector<128x128xf32> -> vector<128x128xf32>
    %c0_9 = arith.constant 0 : index
    %c0_10 = arith.constant 0 : index
    %11 = vector.load %arg6[%c0_9, %c0_10] : memref<1x128xf32, #tpu.memory_space<vmem>>, vector<1x128xf32>
    %12 = vector.broadcast %11 : vector<1x128xf32> to vector<128x128xf32>
    %13 = arith.addf %10, %12 : vector<128x128xf32>
    %14 = arith.mulf %1, %3 : vector<128x128xf32>
    %15 = arith.mulf %13, %13 : vector<128x128xf32>
    %16 = arith.addf %14, %15 : vector<128x128xf32>
    %17 = arith.truncf %16 : vector<128x128xf32> to vector<128x128xbf16>
    %c0_11 = arith.constant 0 : index
    %c0_12 = arith.constant 0 : index
    %18 = vector.load %arg7[%c0_11, %c0_12] : memref<128x4xbf16, #tpu.memory_space<vmem>>, vector<128x4xbf16>
    %cst_13 = arith.constant dense<0.000000e+00> : vector<128x4xf32>
    %19 = tpu.matmul %17, %18, %cst_13 {dimension_numbers = #tpu.dot_dimension_numbers<[1], [0], [0], [1], [0, 0, 1, 1], [], []>} : vector<128x128xbf16>, vector<128x4xbf16>, vector<128x4xf32> -> vector<128x4xf32>
    %cst_14 = arith.constant 0.176776692 : f32
    %20 = vector.broadcast %cst_14 : f32 to vector<128x4xf32>
    %21 = arith.mulf %19, %20 : vector<128x4xf32>
    %cst_15 = arith.constant dense<0xFF800000> : vector<128xf32>
    %22 = vector.multi_reduction <maximumf>, %21, %cst_15 [1] : vector<128x4xf32> to vector<128xf32>
    %23 = vector.shape_cast %22 : vector<128xf32> to vector<128x1xf32>
    %24 = vector.broadcast %23 : vector<128x1xf32> to vector<128x4xf32>
    %25 = arith.subf %21, %24 : vector<128x4xf32>
    %26 = math.exp %25 : vector<128x4xf32>
    %cst_16 = arith.constant dense<0.000000e+00> : vector<128xf32>
    %27 = vector.multi_reduction <add>, %26, %cst_16 [1] : vector<128x4xf32> to vector<128xf32>
    %28 = vector.shape_cast %27 : vector<128xf32> to vector<128x1xf32>
    %29 = tpu.reciprocal %28 {approx = true} : vector<128x1xf32> -> vector<128x1xf32>
    %30 = vector.broadcast %29 : vector<128x1xf32> to vector<128x4xf32>
    %31 = arith.mulf %26, %30 : vector<128x4xf32>
    %32 = arith.truncf %31 : vector<128x4xf32> to vector<128x4xbf16>
    %c0_17 = arith.constant 0 : index
    %c0_18 = arith.constant 0 : index
    %33 = vector.load %arg8[%c0_17, %c0_18] : memref<4x128xbf16, #tpu.memory_space<vmem>>, vector<4x128xbf16>
    %cst_19 = arith.constant dense<0.000000e+00> : vector<128x128xf32>
    %34 = tpu.matmul %32, %33, %cst_19 {dimension_numbers = #tpu.dot_dimension_numbers<[1], [0], [0], [1], [0, 0, 1, 1], [], []>} : vector<128x4xbf16>, vector<4x128xbf16>, vector<128x128xf32> -> vector<128x128xf32>
    %35 = arith.mulf %34, %5 : vector<128x128xf32>
    %36 = arith.truncf %35 : vector<128x128xf32> to vector<128x128xbf16>
    %c0_20 = arith.constant 0 : index
    %c0_21 = arith.constant 0 : index
    %37 = vector.load %arg9[%c0_20, %c0_21] : memref<128x128xf32, #tpu.memory_space<vmem>>, vector<128x128xf32>
    %38 = arith.truncf %37 : vector<128x128xf32> to vector<128x128xbf16>
    %cst_22 = arith.constant dense<0.000000e+00> : vector<128x128xf32>
    %39 = tpu.matmul %36, %38, %cst_22 {dimension_numbers = #tpu.dot_dimension_numbers<[1], [0], [0], [1], [0, 0, 1, 1], [], []>} : vector<128x128xbf16>, vector<128x128xbf16>, vector<128x128xf32> -> vector<128x128xf32>
    %c0_23 = arith.constant 0 : index
    %c0_24 = arith.constant 0 : index
    %40 = vector.load %arg10[%c0_23, %c0_24] : memref<1x128xf32, #tpu.memory_space<vmem>>, vector<1x128xf32>
    %41 = vector.broadcast %40 : vector<1x128xf32> to vector<128x128xf32>
    %42 = arith.addf %39, %41 : vector<128x128xf32>
    %c0_25 = arith.constant 0 : index
    %c0_26 = arith.constant 0 : index
    %43 = vector.load %arg11[%c0_25, %c0_26] : memref<128x128xf32, #tpu.memory_space<vmem>>, vector<128x128xf32>
    tpu.vector_store %arg11[%c0_25, %c0_26], %42 {strides = array<i32>} : memref<128x128xf32, #tpu.memory_space<vmem>>, vector<128x128xf32>,
    return
  }
  func.func @transform_0(%arg0: i32) -> (i32, i32) {
    %c0_i32 = arith.constant 0 : i32
    %c0_i32_0 = arith.constant 0 : i32
    return %arg0, %c0_i32 : i32, i32
  }
  func.func @transform_1(%arg0: i32) -> (i32, i32) {
    %c0_i32 = arith.constant 0 : i32
    %c0_i32_0 = arith.constant 0 : i32
    return %arg0, %c0_i32 : i32, i32
  }
  func.func @transform_2(%arg0: i32) -> (i32, i32) {
    %c0_i32 = arith.constant 0 : i32
    %c0_i32_0 = arith.constant 0 : i32
    return %arg0, %c0_i32 : i32, i32
  }
  func.func @transform_3(%arg0: i32) -> (i32, i32) {
    %c0_i32 = arith.constant 0 : i32
    %c0_i32_0 = arith.constant 0 : i32
    return %arg0, %c0_i32 : i32, i32
  }
  func.func @transform_4(%arg0: i32) -> (i32, i32) {
    %c0_i32 = arith.constant 0 : i32
    %c0_i32_0 = arith.constant 0 : i32
    %c0_i32_1 = arith.constant 0 : i32
    return %c0_i32, %c0_i32_0 : i32, i32
  }
  func.func @transform_5(%arg0: i32) -> (i32, i32) {
    %c0_i32 = arith.constant 0 : i32
    %c0_i32_0 = arith.constant 0 : i32
    %c0_i32_1 = arith.constant 0 : i32
    return %c0_i32, %c0_i32_0 : i32, i32
  }
  func.func @transform_6(%arg0: i32) -> (i32, i32) {
    %c0_i32 = arith.constant 0 : i32
    %c0_i32_0 = arith.constant 0 : i32
    %c0_i32_1 = arith.constant 0 : i32
    return %c0_i32, %c0_i32_0 : i32, i32
  }
  func.func @transform_7(%arg0: i32) -> (i32, i32) {
    %c0_i32 = arith.constant 0 : i32
    %c0_i32_0 = arith.constant 0 : i32
    %c0_i32_1 = arith.constant 0 : i32
    return %c0_i32, %c0_i32_0 : i32, i32
  }
  func.func @transform_8(%arg0: i32) -> (i32, i32) {
    %c0_i32 = arith.constant 0 : i32
    %c0_i32_0 = arith.constant 0 : i32
    %c0_i32_1 = arith.constant 0 : i32
    return %c0_i32, %c0_i32_0 : i32, i32
  }
  func.func @transform_9(%arg0: i32) -> (i32, i32) {
    %c0_i32 = arith.constant 0 : i32
    %c0_i32_0 = arith.constant 0 : i32
    %c0_i32_1 = arith.constant 0 : i32
    return %c0_i32, %c0_i32_0 : i32, i32
  }
  func.func @transform_10(%arg0: i32) -> (i32, i32) {
    %c0_i32 = arith.constant 0 : i32
    %c0_i32_0 = arith.constant 0 : i32
    return %arg0, %c0_i32 : i32, i32
  }
}

module attributes {stable_mosaic.version = 11 : i64} {
  func.func @_ffn_block_kernel(%arg0: i32, %arg1: memref<128x128xf32, #tpu.memory_space<vmem>>, %arg2: memref<1x128xf32, #tpu.memory_space<vmem>>, %arg3: memref<1x128xf32, #tpu.memory_space<vmem>>, %arg4: memref<128x128xf32, #tpu.memory_space<vmem>>, %arg5: memref<1x128xf32, #tpu.memory_space<vmem>>, %arg6: memref<128x128xf32, #tpu.memory_space<vmem>>, %arg7: memref<1x128xf32, #tpu.memory_space<vmem>>, %arg8: memref<1x128xf32, #tpu.memory_space<vmem>>, %arg9: memref<1x128xf32, #tpu.memory_space<vmem>>, %arg10: memref<128x128xf32, #tpu.memory_space<vmem>>) attributes {dimension_semantics = [#tpu.dimension_semantics<parallel>], iteration_bounds = array<i64: 1>, scalar_prefetch = 0 : i64, scratch_operands = 0 : i64, tpu.core_type = #tpu.core_type<tc>, window_params = [{transform_indices = @transform_0, window_bounds = array<i64: 128, 128>}, {pipeline_mode = #tpu.pipeline_mode<synchronous>, transform_indices = @transform_1, window_bounds = array<i64: 1, 128>}, {pipeline_mode = #tpu.pipeline_mode<synchronous>, transform_indices = @transform_2, window_bounds = array<i64: 1, 128>}, {pipeline_mode = #tpu.pipeline_mode<synchronous>, transform_indices = @transform_3, window_bounds = array<i64: 128, 128>}, {pipeline_mode = #tpu.pipeline_mode<synchronous>, transform_indices = @transform_4, window_bounds = array<i64: 1, 128>}, {pipeline_mode = #tpu.pipeline_mode<synchronous>, transform_indices = @transform_5, window_bounds = array<i64: 128, 128>}, {pipeline_mode = #tpu.pipeline_mode<synchronous>, transform_indices = @transform_6, window_bounds = array<i64: 1, 128>}, {pipeline_mode = #tpu.pipeline_mode<synchronous>, transform_indices = @transform_7, window_bounds = array<i64: 1, 128>}, {pipeline_mode = #tpu.pipeline_mode<synchronous>, transform_indices = @transform_8, window_bounds = array<i64: 1, 128>}, {transform_indices = @transform_9, window_bounds = array<i64: 128, 128>}]} {
    %c0 = arith.constant 0 : index
    %c0_0 = arith.constant 0 : index
    %0 = vector.load %arg1[%c0, %c0_0] : memref<128x128xf32, #tpu.memory_space<vmem>>, vector<128x128xf32>
    %cst = arith.constant dense<0.000000e+00> : vector<128xf32>
    %1 = vector.multi_reduction <add>, %0, %cst [1] : vector<128x128xf32> to vector<128xf32>
    %2 = vector.shape_cast %1 : vector<128xf32> to vector<128x1xf32>
    %cst_1 = arith.constant 3.125000e-02 : f32
    %3 = vector.broadcast %cst_1 : f32 to vector<128x1xf32>
    %4 = arith.mulf %2, %3 : vector<128x1xf32>
    %5 = arith.mulf %0, %0 : vector<128x128xf32>
    %cst_2 = arith.constant dense<0.000000e+00> : vector<128xf32>
    %6 = vector.multi_reduction <add>, %5, %cst_2 [1] : vector<128x128xf32> to vector<128xf32>
    %7 = vector.shape_cast %6 : vector<128xf32> to vector<128x1xf32>
    %cst_3 = arith.constant 3.125000e-02 : f32
    %8 = vector.broadcast %cst_3 : f32 to vector<128x1xf32>
    %9 = arith.mulf %7, %8 : vector<128x1xf32>
    %10 = arith.mulf %4, %4 : vector<128x1xf32>
    %11 = arith.subf %9, %10 : vector<128x1xf32>
    %cst_4 = arith.constant 0.000000e+00 : f32
    %12 = vector.broadcast %cst_4 : f32 to vector<128x1xf32>
    %13 = arith.maximumf %11, %12 : vector<128x1xf32>
    %14 = vector.broadcast %4 : vector<128x1xf32> to vector<128x128xf32>
    %15 = arith.subf %0, %14 : vector<128x128xf32>
    %cst_5 = arith.constant 9.99999974E-6 : f32
    %16 = vector.broadcast %cst_5 : f32 to vector<128x1xf32>
    %17 = arith.addf %13, %16 : vector<128x1xf32>
    %18 = math.rsqrt %17 : vector<128x1xf32>
    %19 = vector.broadcast %18 : vector<128x1xf32> to vector<128x128xf32>
    %20 = arith.mulf %15, %19 : vector<128x128xf32>
    %c0_6 = arith.constant 0 : index
    %c0_7 = arith.constant 0 : index
    %21 = vector.load %arg2[%c0_6, %c0_7] : memref<1x128xf32, #tpu.memory_space<vmem>>, vector<1x128xf32>
    %22 = vector.broadcast %21 : vector<1x128xf32> to vector<128x128xf32>
    %23 = arith.mulf %20, %22 : vector<128x128xf32>
    %c0_8 = arith.constant 0 : index
    %c0_9 = arith.constant 0 : index
    %24 = vector.load %arg3[%c0_8, %c0_9] : memref<1x128xf32, #tpu.memory_space<vmem>>, vector<1x128xf32>
    %25 = vector.broadcast %24 : vector<1x128xf32> to vector<128x128xf32>
    %26 = arith.addf %23, %25 : vector<128x128xf32>
    %27 = arith.truncf %26 : vector<128x128xf32> to vector<128x128xbf16>
    %c0_10 = arith.constant 0 : index
    %c0_11 = arith.constant 0 : index
    %28 = vector.load %arg4[%c0_10, %c0_11] : memref<128x128xf32, #tpu.memory_space<vmem>>, vector<128x128xf32>
    %29 = arith.truncf %28 : vector<128x128xf32> to vector<128x128xbf16>
    %cst_12 = arith.constant dense<0.000000e+00> : vector<128x128xf32>
    %30 = tpu.matmul %27, %29, %cst_12 {dimension_numbers = #tpu.dot_dimension_numbers<[1], [0], [0], [1], [0, 0, 1, 1], [], []>} : vector<128x128xbf16>, vector<128x128xbf16>, vector<128x128xf32> -> vector<128x128xf32>
    %c0_13 = arith.constant 0 : index
    %c0_14 = arith.constant 0 : index
    %31 = vector.load %arg5[%c0_13, %c0_14] : memref<1x128xf32, #tpu.memory_space<vmem>>, vector<1x128xf32>
    %32 = vector.broadcast %31 : vector<1x128xf32> to vector<128x128xf32>
    %33 = arith.addf %30, %32 : vector<128x128xf32>
    %cst_15 = arith.constant 0.000000e+00 : f32
    %34 = vector.broadcast %cst_15 : f32 to vector<128x128xf32>
    %35 = arith.maximumf %33, %34 : vector<128x128xf32>
    %36 = arith.truncf %35 : vector<128x128xf32> to vector<128x128xbf16>
    %c0_16 = arith.constant 0 : index
    %c0_17 = arith.constant 0 : index
    %37 = vector.load %arg6[%c0_16, %c0_17] : memref<128x128xf32, #tpu.memory_space<vmem>>, vector<128x128xf32>
    %38 = arith.truncf %37 : vector<128x128xf32> to vector<128x128xbf16>
    %cst_18 = arith.constant dense<0.000000e+00> : vector<128x128xf32>
    %39 = tpu.matmul %36, %38, %cst_18 {dimension_numbers = #tpu.dot_dimension_numbers<[1], [0], [0], [1], [0, 0, 1, 1], [], []>} : vector<128x128xbf16>, vector<128x128xbf16>, vector<128x128xf32> -> vector<128x128xf32>
    %c0_19 = arith.constant 0 : index
    %c0_20 = arith.constant 0 : index
    %40 = vector.load %arg7[%c0_19, %c0_20] : memref<1x128xf32, #tpu.memory_space<vmem>>, vector<1x128xf32>
    %41 = vector.broadcast %40 : vector<1x128xf32> to vector<128x128xf32>
    %42 = arith.addf %39, %41 : vector<128x128xf32>
    %cst_21 = arith.constant dense<0.000000e+00> : vector<128xf32>
    %43 = vector.multi_reduction <add>, %42, %cst_21 [1] : vector<128x128xf32> to vector<128xf32>
    %44 = vector.shape_cast %43 : vector<128xf32> to vector<128x1xf32>
    %cst_22 = arith.constant 3.125000e-02 : f32
    %45 = vector.broadcast %cst_22 : f32 to vector<128x1xf32>
    %46 = arith.mulf %44, %45 : vector<128x1xf32>
    %47 = arith.mulf %42, %42 : vector<128x128xf32>
    %cst_23 = arith.constant dense<0.000000e+00> : vector<128xf32>
    %48 = vector.multi_reduction <add>, %47, %cst_23 [1] : vector<128x128xf32> to vector<128xf32>
    %49 = vector.shape_cast %48 : vector<128xf32> to vector<128x1xf32>
    %cst_24 = arith.constant 3.125000e-02 : f32
    %50 = vector.broadcast %cst_24 : f32 to vector<128x1xf32>
    %51 = arith.mulf %49, %50 : vector<128x1xf32>
    %52 = arith.mulf %46, %46 : vector<128x1xf32>
    %53 = arith.subf %51, %52 : vector<128x1xf32>
    %cst_25 = arith.constant 0.000000e+00 : f32
    %54 = vector.broadcast %cst_25 : f32 to vector<128x1xf32>
    %55 = arith.maximumf %53, %54 : vector<128x1xf32>
    %56 = vector.broadcast %46 : vector<128x1xf32> to vector<128x128xf32>
    %57 = arith.subf %42, %56 : vector<128x128xf32>
    %cst_26 = arith.constant 9.99999974E-6 : f32
    %58 = vector.broadcast %cst_26 : f32 to vector<128x1xf32>
    %59 = arith.addf %55, %58 : vector<128x1xf32>
    %60 = math.rsqrt %59 : vector<128x1xf32>
    %61 = vector.broadcast %60 : vector<128x1xf32> to vector<128x128xf32>
    %62 = arith.mulf %57, %61 : vector<128x128xf32>
    %c0_27 = arith.constant 0 : index
    %c0_28 = arith.constant 0 : index
    %63 = vector.load %arg8[%c0_27, %c0_28] : memref<1x128xf32, #tpu.memory_space<vmem>>, vector<1x128xf32>
    %64 = vector.broadcast %63 : vector<1x128xf32> to vector<128x128xf32>
    %65 = arith.mulf %62, %64 : vector<128x128xf32>
    %c0_29 = arith.constant 0 : index
    %c0_30 = arith.constant 0 : index
    %66 = vector.load %arg9[%c0_29, %c0_30] : memref<1x128xf32, #tpu.memory_space<vmem>>, vector<1x128xf32>
    %67 = vector.broadcast %66 : vector<1x128xf32> to vector<128x128xf32>
    %68 = arith.addf %65, %67 : vector<128x128xf32>
    %c0_31 = arith.constant 0 : index
    %c0_32 = arith.constant 0 : index
    %69 = vector.load %arg10[%c0_31, %c0_32] : memref<128x128xf32, #tpu.memory_space<vmem>>, vector<128x128xf32>
    tpu.vector_store %arg10[%c0_31, %c0_32], %68 {strides = array<i32>} : memref<128x128xf32, #tpu.memory_space<vmem>>, vector<128x128xf32>,
    return
  }
  func.func @transform_0(%arg0: i32) -> (i32, i32) {
    %c0_i32 = arith.constant 0 : i32
    %c0_i32_0 = arith.constant 0 : i32
    return %arg0, %c0_i32 : i32, i32
  }
  func.func @transform_1(%arg0: i32) -> (i32, i32) {
    %c0_i32 = arith.constant 0 : i32
    %c0_i32_0 = arith.constant 0 : i32
    %c0_i32_1 = arith.constant 0 : i32
    return %c0_i32, %c0_i32_0 : i32, i32
  }
  func.func @transform_2(%arg0: i32) -> (i32, i32) {
    %c0_i32 = arith.constant 0 : i32
    %c0_i32_0 = arith.constant 0 : i32
    %c0_i32_1 = arith.constant 0 : i32
    return %c0_i32, %c0_i32_0 : i32, i32
  }
  func.func @transform_3(%arg0: i32) -> (i32, i32) {
    %c0_i32 = arith.constant 0 : i32
    %c0_i32_0 = arith.constant 0 : i32
    %c0_i32_1 = arith.constant 0 : i32
    return %c0_i32, %c0_i32_0 : i32, i32
  }
  func.func @transform_4(%arg0: i32) -> (i32, i32) {
    %c0_i32 = arith.constant 0 : i32
    %c0_i32_0 = arith.constant 0 : i32
    %c0_i32_1 = arith.constant 0 : i32
    return %c0_i32, %c0_i32_0 : i32, i32
  }
  func.func @transform_5(%arg0: i32) -> (i32, i32) {
    %c0_i32 = arith.constant 0 : i32
    %c0_i32_0 = arith.constant 0 : i32
    %c0_i32_1 = arith.constant 0 : i32
    return %c0_i32, %c0_i32_0 : i32, i32
  }
  func.func @transform_6(%arg0: i32) -> (i32, i32) {
    %c0_i32 = arith.constant 0 : i32
    %c0_i32_0 = arith.constant 0 : i32
    %c0_i32_1 = arith.constant 0 : i32
    return %c0_i32, %c0_i32_0 : i32, i32
  }
  func.func @transform_7(%arg0: i32) -> (i32, i32) {
    %c0_i32 = arith.constant 0 : i32
    %c0_i32_0 = arith.constant 0 : i32
    %c0_i32_1 = arith.constant 0 : i32
    return %c0_i32, %c0_i32_0 : i32, i32
  }
  func.func @transform_8(%arg0: i32) -> (i32, i32) {
    %c0_i32 = arith.constant 0 : i32
    %c0_i32_0 = arith.constant 0 : i32
    %c0_i32_1 = arith.constant 0 : i32
    return %c0_i32, %c0_i32_0 : i32, i32
  }
  func.func @transform_9(%arg0: i32) -> (i32, i32) {
    %c0_i32 = arith.constant 0 : i32
    %c0_i32_0 = arith.constant 0 : i32
    return %arg0, %c0_i32 : i32, i32
  }
}

module attributes {stable_mosaic.version = 11 : i64} {
  func.func @_ffn_block_kernel(%arg0: i32, %arg1: memref<128x128xf32, #tpu.memory_space<vmem>>, %arg2: memref<1x128xf32, #tpu.memory_space<vmem>>, %arg3: memref<1x128xf32, #tpu.memory_space<vmem>>, %arg4: memref<128x128xf32, #tpu.memory_space<vmem>>, %arg5: memref<1x128xf32, #tpu.memory_space<vmem>>, %arg6: memref<128x128xf32, #tpu.memory_space<vmem>>, %arg7: memref<1x128xf32, #tpu.memory_space<vmem>>, %arg8: memref<1x128xf32, #tpu.memory_space<vmem>>, %arg9: memref<1x128xf32, #tpu.memory_space<vmem>>, %arg10: memref<128x384xf32, #tpu.memory_space<vmem>>, %arg11: memref<1x384xf32, #tpu.memory_space<vmem>>, %arg12: memref<128x128xf32, #tpu.memory_space<vmem>>, %arg13: memref<128x384xbf16, #tpu.memory_space<vmem>>) attributes {dimension_semantics = [#tpu.dimension_semantics<parallel>], iteration_bounds = array<i64: 1>, scalar_prefetch = 0 : i64, scratch_operands = 0 : i64, tpu.core_type = #tpu.core_type<tc>, window_params = [{transform_indices = @transform_0, window_bounds = array<i64: 128, 128>}, {pipeline_mode = #tpu.pipeline_mode<synchronous>, transform_indices = @transform_1, window_bounds = array<i64: 1, 128>}, {pipeline_mode = #tpu.pipeline_mode<synchronous>, transform_indices = @transform_2, window_bounds = array<i64: 1, 128>}, {pipeline_mode = #tpu.pipeline_mode<synchronous>, transform_indices = @transform_3, window_bounds = array<i64: 128, 128>}, {pipeline_mode = #tpu.pipeline_mode<synchronous>, transform_indices = @transform_4, window_bounds = array<i64: 1, 128>}, {pipeline_mode = #tpu.pipeline_mode<synchronous>, transform_indices = @transform_5, window_bounds = array<i64: 128, 128>}, {pipeline_mode = #tpu.pipeline_mode<synchronous>, transform_indices = @transform_6, window_bounds = array<i64: 1, 128>}, {pipeline_mode = #tpu.pipeline_mode<synchronous>, transform_indices = @transform_7, window_bounds = array<i64: 1, 128>}, {pipeline_mode = #tpu.pipeline_mode<synchronous>, transform_indices = @transform_8, window_bounds = array<i64: 1, 128>}, {pipeline_mode = #tpu.pipeline_mode<synchronous>, transform_indices = @transform_9, window_bounds = array<i64: 128, 384>}, {pipeline_mode = #tpu.pipeline_mode<synchronous>, transform_indices = @transform_10, window_bounds = array<i64: 1, 384>}, {transform_indices = @transform_11, window_bounds = array<i64: 128, 128>}, {transform_indices = @transform_12, window_bounds = array<i64: 128, 384>}]} {
    %c0 = arith.constant 0 : index
    %c0_0 = arith.constant 0 : index
    %0 = vector.load %arg1[%c0, %c0_0] : memref<128x128xf32, #tpu.memory_space<vmem>>, vector<128x128xf32>
    %cst = arith.constant dense<0.000000e+00> : vector<128xf32>
    %1 = vector.multi_reduction <add>, %0, %cst [1] : vector<128x128xf32> to vector<128xf32>
    %2 = vector.shape_cast %1 : vector<128xf32> to vector<128x1xf32>
    %cst_1 = arith.constant 3.125000e-02 : f32
    %3 = vector.broadcast %cst_1 : f32 to vector<128x1xf32>
    %4 = arith.mulf %2, %3 : vector<128x1xf32>
    %5 = arith.mulf %0, %0 : vector<128x128xf32>
    %cst_2 = arith.constant dense<0.000000e+00> : vector<128xf32>
    %6 = vector.multi_reduction <add>, %5, %cst_2 [1] : vector<128x128xf32> to vector<128xf32>
    %7 = vector.shape_cast %6 : vector<128xf32> to vector<128x1xf32>
    %cst_3 = arith.constant 3.125000e-02 : f32
    %8 = vector.broadcast %cst_3 : f32 to vector<128x1xf32>
    %9 = arith.mulf %7, %8 : vector<128x1xf32>
    %10 = arith.mulf %4, %4 : vector<128x1xf32>
    %11 = arith.subf %9, %10 : vector<128x1xf32>
    %cst_4 = arith.constant 0.000000e+00 : f32
    %12 = vector.broadcast %cst_4 : f32 to vector<128x1xf32>
    %13 = arith.maximumf %11, %12 : vector<128x1xf32>
    %14 = vector.broadcast %4 : vector<128x1xf32> to vector<128x128xf32>
    %15 = arith.subf %0, %14 : vector<128x128xf32>
    %cst_5 = arith.constant 9.99999974E-6 : f32
    %16 = vector.broadcast %cst_5 : f32 to vector<128x1xf32>
    %17 = arith.addf %13, %16 : vector<128x1xf32>
    %18 = math.rsqrt %17 : vector<128x1xf32>
    %19 = vector.broadcast %18 : vector<128x1xf32> to vector<128x128xf32>
    %20 = arith.mulf %15, %19 : vector<128x128xf32>
    %c0_6 = arith.constant 0 : index
    %c0_7 = arith.constant 0 : index
    %21 = vector.load %arg2[%c0_6, %c0_7] : memref<1x128xf32, #tpu.memory_space<vmem>>, vector<1x128xf32>
    %22 = vector.broadcast %21 : vector<1x128xf32> to vector<128x128xf32>
    %23 = arith.mulf %20, %22 : vector<128x128xf32>
    %c0_8 = arith.constant 0 : index
    %c0_9 = arith.constant 0 : index
    %24 = vector.load %arg3[%c0_8, %c0_9] : memref<1x128xf32, #tpu.memory_space<vmem>>, vector<1x128xf32>
    %25 = vector.broadcast %24 : vector<1x128xf32> to vector<128x128xf32>
    %26 = arith.addf %23, %25 : vector<128x128xf32>
    %27 = arith.truncf %26 : vector<128x128xf32> to vector<128x128xbf16>
    %c0_10 = arith.constant 0 : index
    %c0_11 = arith.constant 0 : index
    %28 = vector.load %arg4[%c0_10, %c0_11] : memref<128x128xf32, #tpu.memory_space<vmem>>, vector<128x128xf32>
    %29 = arith.truncf %28 : vector<128x128xf32> to vector<128x128xbf16>
    %cst_12 = arith.constant dense<0.000000e+00> : vector<128x128xf32>
    %30 = tpu.matmul %27, %29, %cst_12 {dimension_numbers = #tpu.dot_dimension_numbers<[1], [0], [0], [1], [0, 0, 1, 1], [], []>} : vector<128x128xbf16>, vector<128x128xbf16>, vector<128x128xf32> -> vector<128x128xf32>
    %c0_13 = arith.constant 0 : index
    %c0_14 = arith.constant 0 : index
    %31 = vector.load %arg5[%c0_13, %c0_14] : memref<1x128xf32, #tpu.memory_space<vmem>>, vector<1x128xf32>
    %32 = vector.broadcast %31 : vector<1x128xf32> to vector<128x128xf32>
    %33 = arith.addf %30, %32 : vector<128x128xf32>
    %cst_15 = arith.constant 0.000000e+00 : f32
    %34 = vector.broadcast %cst_15 : f32 to vector<128x128xf32>
    %35 = arith.maximumf %33, %34 : vector<128x128xf32>
    %36 = arith.truncf %35 : vector<128x128xf32> to vector<128x128xbf16>
    %c0_16 = arith.constant 0 : index
    %c0_17 = arith.constant 0 : index
    %37 = vector.load %arg6[%c0_16, %c0_17] : memref<128x128xf32, #tpu.memory_space<vmem>>, vector<128x128xf32>
    %38 = arith.truncf %37 : vector<128x128xf32> to vector<128x128xbf16>
    %cst_18 = arith.constant dense<0.000000e+00> : vector<128x128xf32>
    %39 = tpu.matmul %36, %38, %cst_18 {dimension_numbers = #tpu.dot_dimension_numbers<[1], [0], [0], [1], [0, 0, 1, 1], [], []>} : vector<128x128xbf16>, vector<128x128xbf16>, vector<128x128xf32> -> vector<128x128xf32>
    %c0_19 = arith.constant 0 : index
    %c0_20 = arith.constant 0 : index
    %40 = vector.load %arg7[%c0_19, %c0_20] : memref<1x128xf32, #tpu.memory_space<vmem>>, vector<1x128xf32>
    %41 = vector.broadcast %40 : vector<1x128xf32> to vector<128x128xf32>
    %42 = arith.addf %39, %41 : vector<128x128xf32>
    %cst_21 = arith.constant dense<0.000000e+00> : vector<128xf32>
    %43 = vector.multi_reduction <add>, %42, %cst_21 [1] : vector<128x128xf32> to vector<128xf32>
    %44 = vector.shape_cast %43 : vector<128xf32> to vector<128x1xf32>
    %cst_22 = arith.constant 3.125000e-02 : f32
    %45 = vector.broadcast %cst_22 : f32 to vector<128x1xf32>
    %46 = arith.mulf %44, %45 : vector<128x1xf32>
    %47 = arith.mulf %42, %42 : vector<128x128xf32>
    %cst_23 = arith.constant dense<0.000000e+00> : vector<128xf32>
    %48 = vector.multi_reduction <add>, %47, %cst_23 [1] : vector<128x128xf32> to vector<128xf32>
    %49 = vector.shape_cast %48 : vector<128xf32> to vector<128x1xf32>
    %cst_24 = arith.constant 3.125000e-02 : f32
    %50 = vector.broadcast %cst_24 : f32 to vector<128x1xf32>
    %51 = arith.mulf %49, %50 : vector<128x1xf32>
    %52 = arith.mulf %46, %46 : vector<128x1xf32>
    %53 = arith.subf %51, %52 : vector<128x1xf32>
    %cst_25 = arith.constant 0.000000e+00 : f32
    %54 = vector.broadcast %cst_25 : f32 to vector<128x1xf32>
    %55 = arith.maximumf %53, %54 : vector<128x1xf32>
    %56 = vector.broadcast %46 : vector<128x1xf32> to vector<128x128xf32>
    %57 = arith.subf %42, %56 : vector<128x128xf32>
    %cst_26 = arith.constant 9.99999974E-6 : f32
    %58 = vector.broadcast %cst_26 : f32 to vector<128x1xf32>
    %59 = arith.addf %55, %58 : vector<128x1xf32>
    %60 = math.rsqrt %59 : vector<128x1xf32>
    %61 = vector.broadcast %60 : vector<128x1xf32> to vector<128x128xf32>
    %62 = arith.mulf %57, %61 : vector<128x128xf32>
    %c0_27 = arith.constant 0 : index
    %c0_28 = arith.constant 0 : index
    %63 = vector.load %arg8[%c0_27, %c0_28] : memref<1x128xf32, #tpu.memory_space<vmem>>, vector<1x128xf32>
    %64 = vector.broadcast %63 : vector<1x128xf32> to vector<128x128xf32>
    %65 = arith.mulf %62, %64 : vector<128x128xf32>
    %c0_29 = arith.constant 0 : index
    %c0_30 = arith.constant 0 : index
    %66 = vector.load %arg9[%c0_29, %c0_30] : memref<1x128xf32, #tpu.memory_space<vmem>>, vector<1x128xf32>
    %67 = vector.broadcast %66 : vector<1x128xf32> to vector<128x128xf32>
    %68 = arith.addf %65, %67 : vector<128x128xf32>
    %c0_31 = arith.constant 0 : index
    %c0_32 = arith.constant 0 : index
    %69 = vector.load %arg12[%c0_31, %c0_32] : memref<128x128xf32, #tpu.memory_space<vmem>>, vector<128x128xf32>
    tpu.vector_store %arg12[%c0_31, %c0_32], %68 {strides = array<i32>} : memref<128x128xf32, #tpu.memory_space<vmem>>, vector<128x128xf32>,
    %70 = arith.truncf %68 : vector<128x128xf32> to vector<128x128xbf16>
    %c0_33 = arith.constant 0 : index
    %c0_34 = arith.constant 0 : index
    %71 = vector.load %arg10[%c0_33, %c0_34] : memref<128x384xf32, #tpu.memory_space<vmem>>, vector<128x384xf32>
    %72 = arith.truncf %71 : vector<128x384xf32> to vector<128x384xbf16>
    %cst_35 = arith.constant dense<0.000000e+00> : vector<128x384xf32>
    %73 = tpu.matmul %70, %72, %cst_35 {dimension_numbers = #tpu.dot_dimension_numbers<[1], [0], [0], [1], [0, 0, 1, 1], [], []>} : vector<128x128xbf16>, vector<128x384xbf16>, vector<128x384xf32> -> vector<128x384xf32>
    %c0_36 = arith.constant 0 : index
    %c0_37 = arith.constant 0 : index
    %74 = vector.load %arg11[%c0_36, %c0_37] : memref<1x384xf32, #tpu.memory_space<vmem>>, vector<1x384xf32>
    %75 = vector.broadcast %74 : vector<1x384xf32> to vector<128x384xf32>
    %76 = arith.addf %73, %75 : vector<128x384xf32>
    %77 = arith.truncf %76 : vector<128x384xf32> to vector<128x384xbf16>
    %c0_38 = arith.constant 0 : index
    %c0_39 = arith.constant 0 : index
    %78 = vector.load %arg13[%c0_38, %c0_39] : memref<128x384xbf16, #tpu.memory_space<vmem>>, vector<128x384xbf16>
    tpu.vector_store %arg13[%c0_38, %c0_39], %77 {strides = array<i32>} : memref<128x384xbf16, #tpu.memory_space<vmem>>, vector<128x384xbf16>,
    return
  }
  func.func @transform_0(%arg0: i32) -> (i32, i32) {
    %c0_i32 = arith.constant 0 : i32
    %c0_i32_0 = arith.constant 0 : i32
    return %arg0, %c0_i32 : i32, i32
  }
  func.func @transform_1(%arg0: i32) -> (i32, i32) {
    %c0_i32 = arith.constant 0 : i32
    %c0_i32_0 = arith.constant 0 : i32
    %c0_i32_1 = arith.constant 0 : i32
    return %c0_i32, %c0_i32_0 : i32, i32
  }
  func.func @transform_2(%arg0: i32) -> (i32, i32) {
    %c0_i32 = arith.constant 0 : i32
    %c0_i32_0 = arith.constant 0 : i32
    %c0_i32_1 = arith.constant 0 : i32
    return %c0_i32, %c0_i32_0 : i32, i32
  }
  func.func @transform_3(%arg0: i32) -> (i32, i32) {
    %c0_i32 = arith.constant 0 : i32
    %c0_i32_0 = arith.constant 0 : i32
    %c0_i32_1 = arith.constant 0 : i32
    return %c0_i32, %c0_i32_0 : i32, i32
  }
  func.func @transform_4(%arg0: i32) -> (i32, i32) {
    %c0_i32 = arith.constant 0 : i32
    %c0_i32_0 = arith.constant 0 : i32
    %c0_i32_1 = arith.constant 0 : i32
    return %c0_i32, %c0_i32_0 : i32, i32
  }
  func.func @transform_5(%arg0: i32) -> (i32, i32) {
    %c0_i32 = arith.constant 0 : i32
    %c0_i32_0 = arith.constant 0 : i32
    %c0_i32_1 = arith.constant 0 : i32
    return %c0_i32, %c0_i32_0 : i32, i32
  }
  func.func @transform_6(%arg0: i32) -> (i32, i32) {
    %c0_i32 = arith.constant 0 : i32
    %c0_i32_0 = arith.constant 0 : i32
    %c0_i32_1 = arith.constant 0 : i32
    return %c0_i32, %c0_i32_0 : i32, i32
  }
  func.func @transform_7(%arg0: i32) -> (i32, i32) {
    %c0_i32 = arith.constant 0 : i32
    %c0_i32_0 = arith.constant 0 : i32
    %c0_i32_1 = arith.constant 0 : i32
    return %c0_i32, %c0_i32_0 : i32, i32
  }
  func.func @transform_8(%arg0: i32) -> (i32, i32) {
    %c0_i32 = arith.constant 0 : i32
    %c0_i32_0 = arith.constant 0 : i32
    %c0_i32_1 = arith.constant 0 : i32
    return %c0_i32, %c0_i32_0 : i32, i32
  }
  func.func @transform_9(%arg0: i32) -> (i32, i32) {
    %c0_i32 = arith.constant 0 : i32
    %c0_i32_0 = arith.constant 0 : i32
    %c0_i32_1 = arith.constant 0 : i32
    return %c0_i32, %c0_i32_0 : i32, i32
  }
  func.func @transform_10(%arg0: i32) -> (i32, i32) {
    %c0_i32 = arith.constant 0 : i32
    %c0_i32_0 = arith.constant 0 : i32
    %c0_i32_1 = arith.constant 0 : i32
    return %c0_i32, %c0_i32_0 : i32, i32
  }
  func.func @transform_11(%arg0: i32) -> (i32, i32) {
    %c0_i32 = arith.constant 0 : i32
    %c0_i32_0 = arith.constant 0 : i32
    return %arg0, %c0_i32 : i32, i32
  }
  func.func @transform_12(%arg0: i32) -> (i32, i32) {
    %c0_i32 = arith.constant 0 : i32
    %c0_i32_0 = arith.constant 0 : i32
    return %arg0, %c0_i32 : i32, i32
  }
}

</mosaic_0001>

<bundles_post_ra>
// kernel: _lambda_.7
= control target key start
LH: loop header
LB: loop body
LE: loop exit
PB: predicated region body
PF: predicated region fallthrough
CT: control target
= control target key end

     0   :  { %v606_v3 = vmov 0   ;;  %vm65_vm0 = vcmask 130048   ;;  %v50_v34 = vlaneseq  ;;  %s862_s1 = inlined_call_operand.vmem [shape: f32[16,384], index: 1, kind: input, shape index: {}]   ;;  %s863_s0 = inlined_call_operand.vmem [shape: f32[128,16], index: 0, kind: input, shape index: {}]   ;;  %s864_s2 = inlined_call_operand.vmem [shape: f32[1,384], index: 2, kind: input, shape index: {}]   ;;  %s865_s3 = inlined_call_operand.vmem [shape: bf16[128,384], index: 3, kind: output, shape index: {}]  }
   0x1   :  { %v40_v0 = vld [vmem:[%s862_s1 + $0x8] sm:$0xff]  ;;  %v43_v1 = vld [vmem:[%s862_s1 + $0x20] sm:$0xff]  ;;  %122 = vmatprep.mubr.bf16.mxu0 %v606_v3  ;;  %182 = vmatprep.mubr.bf16.mxu1 %v606_v3  ;;  %v42_v5 = vld [vmem:[%s862_s1 + $0x18] sm:$0xff] }
   0x2   :  { %v39_v2 = vld [vmem:[%s862_s1] sm:$0xff]  ;;  %v46_v4 = vpack.c.bf16 %v43_v1, %v40_v0  ;;  %v16_v7 = vld [vmem:[%s863_s0 + $0x8] sm:$0xff]  ;;  %v41_v11 = vld [vmem:[%s862_s1 + $0x10] sm:$0xff]  ;;  %v51_v35 = vshrl.u32 %v50_v34, 7 }
   0x3   :  { %v15_v6 = vld [vmem:[%s863_s0] sm:$0xff]  ;;  %v45_v8 = vpack.c.bf16 %v42_v5, %v39_v2  ;;  %v28_v10 = vld [vmem:[%s863_s0 + $0x68] sm:$0xff]  ;;  %v17_v16 = vld [vmem:[%s863_s0 + $0x10] sm:$0xff] }
   0x4   :  { %v27_v9 = vld [vmem:[%s863_s0 + $0x60] sm:$0xff]  ;;  %104 = vmatprep.subr.bf16.mxu0 %v46_v4  ;;  %603 = vmatprep.subr.bf16.mxu1 %v46_v4  ;;  %v31_v12 = vpack.c.bf16 %v16_v7, %v15_v6  ;;  %v44_v14 = vld [vmem:[%s862_s1 + $0x28] sm:$0xff]  ;;  %v18_v17 = vld [vmem:[%s863_s0 + $0x18] sm:$0xff]  ;;  %v52_v36 = vsub.s32 0, %v51_v35  ;;  %v56_v37 = vsub.s32 1, %v51_v35  ;;  %v60_v63 = vsub.s32 2, %v51_v35 }
   0x5   :  { %v37_v13 = vpack.c.bf16 %v28_v10, %v27_v9  ;;  %105 = vmatpush1.bf16.msra.mxu0 %v45_v8  ;;  %604 = vmatpush1.bf16.msra.mxu1 %v45_v8  ;;  %v47_v15 = vpack.c.bf16 %v44_v14, %v41_v11  ;;  %v29_v18 = vld [vmem:[%s863_s0 + $0x70] sm:$0xff]  ;;  %v30_v19 = vld [vmem:[%s863_s0 + $0x78] sm:$0xff]  ;;  %v32_v20 = vpack.c.bf16 %v18_v17, %v17_v16  ;;  %v19_v22 = vld [vmem:[%s863_s0 + $0x20] sm:$0xff] }
   0x6   :  { %v38_v21 = vpack.c.bf16 %v30_v19, %v29_v18  ;;  %v20_v23 = vld [vmem:[%s863_s0 + $0x28] sm:$0xff]  ;;  %v21_v25 = vld [vmem:[%s863_s0 + $0x30] sm:$0xff]  ;;  %v22_v26 = vld [vmem:[%s863_s0 + $0x38] sm:$0xff] }
   0x7   :  { %585 = vmatprep.subr.bf16.mxu1 %v47_v15  ;;  %v33_v24 = vpack.c.bf16 %v20_v23, %v19_v22  ;;  %v23_v27 = vld [vmem:[%s863_s0 + $0x40] sm:$0xff]  ;;  %v24_v28 = vld [vmem:[%s863_s0 + $0x48] sm:$0xff]  ;;  %v34_v29 = vpack.c.bf16 %v22_v26, %v21_v25  ;;  %v25_v31 = vld [vmem:[%s863_s0 + $0x50] sm:$0xff] }
   0x8   :  { %496 = vmatmul.mubr.msk.bf16.vlgmr.msra.gmra.mxu0 %vm65_vm0, %v31_v12  ;;  %502 = vmatmul.mubr.msk.bf16.vlgmr.msra.gmra.mxu1 %vm65_vm0, %v37_v13  ;;  %v35_v30 = vpack.c.bf16 %v24_v28, %v23_v27  ;;  %v26_v32 = vld [vmem:[%s863_s0 + $0x58] sm:$0xff]  ;;  %v48_v38 = vld [vmem:[%s864_s2] sm:$0x7] }
   0x9   :  { %586 = vmatpush3.bf16.msra.mxu1 %v47_v15  ;;  %132 = vmatprep.mubr.bf16.mxu0 %v606_v3  ;;  %v36_v33 = vpack.c.bf16 %v26_v32, %v25_v31  ;;  %v712_v39 = vrot.slane %v48_v38, %v52_v36  ;;  %v714_v40 = vrot.slane %v48_v38, %v56_v37 }
   0xa   :  { %192 = vmatprep.mubr.bf16.mxu1 %v606_v3  ;;  %v740_v10 = vrot.slane %v48_v38, %v60_v63 }
  0x10   :  { %497 = vmatmul.mubr.msk.bf16.gmra.mxu0 %vm65_vm0, %v32_v20  ;;  %503 = vmatmul.mubr.msk.bf16.gmra.mxu1 %vm65_vm0, %v38_v21 }
  0x11   :  { %142 = vmatprep.mubr.bf16.mxu0 %v606_v3  ;;  %587 = vmatprep.mubr.msk.bf16.mxu1 %vm65_vm0, %v31_v12 }
  0x18   :  { %498 = vmatmul.mubr.msk.bf16.gmra.mxu0 %vm65_vm0, %v33_v24  ;;  %588 = vmatmul.mubr.msk.bf16.vlgmr.msra.gmra.mxu1 %vm65_vm0, %v32_v20 }
  0x19   :  { %152 = vmatprep.mubr.bf16.mxu0 %v606_v3  ;;  %591 = vmatprep.mubr.msk.bf16.mxu1 %vm65_vm0, %v33_v24 }
  0x20   :  { %499 = vmatmul.mubr.msk.bf16.gmra.mxu0 %vm65_vm0, %v34_v29  ;;  %592 = vmatmul.mubr.msk.bf16.gmra.mxu1 %vm65_vm0, %v34_v29 }
  0x21   :  { %162 = vmatprep.mubr.bf16.mxu0 %v606_v3  ;;  %595 = vmatprep.mubr.msk.bf16.mxu1 %vm65_vm0, %v35_v30 }
  0x28   :  { %500 = vmatmul.mubr.msk.bf16.gmra.mxu0 %vm65_vm0, %v35_v30  ;;  %596 = vmatmul.mubr.msk.bf16.gmra.mxu1 %vm65_vm0, %v36_v33 }
  0x29   :  { %172 = vmatprep.mubr.bf16.mxu0 %v606_v3  ;;  %599 = vmatprep.mubr.msk.bf16.mxu1 %vm65_vm0, %v37_v13 }
  0x30   :  { %501 = vmatmul.mubr.msk.bf16.gmra.mxu0 %vm65_vm0, %v36_v33  ;;  %600 = vmatmul.mubr.msk.bf16.gmra.mxu1 %vm65_vm0, %v38_v21 }
  0xc8   :  { %v124_v41 = vpop.f32.mrf.mxu0  ;;  %v184_v42 = vpop.f32.mrf.mxu1 }
  0xc9   :  { %v125_v45 = vadd.f32 %v124_v41, %v712_v39  ;;  %v185_v46 = vadd.f32 %v184_v42, %v712_v39 }
  0xca   :  { %v126_v43 = vpop.f32.mrf.mxu0  ;;  %v186_v44 = vpop.f32.mrf.mxu1 }
  0xcb   :  { %v127_v47 = vadd.f32 %v126_v43, %v714_v40  ;;  %v187_v48 = vadd.f32 %v186_v44, %v714_v40 }
  0xcc   :  { %v128_v49 = vpop.f32.mrf.mxu0  ;;  %v188_v50 = vpop.f32.mrf.mxu1 }
  0xcd   :  { %v544_v51 = vpack.c.bf16 %v127_v47, %v125_v45  ;;  %v568_v52 = vpack.c.bf16 %v187_v48, %v185_v46  ;;  %v129_v55 = vadd.f32 %v128_v49, %v712_v39  ;;  %v189_v56 = vadd.f32 %v188_v50, %v712_v39 }
  0xce   :  { %v130_v53 = vpop.f32.mrf.mxu0  ;;  %v190_v54 = vpop.f32.mrf.mxu1 }
  0xcf   :  { %460 = vst [vmem:[%s865_s3] sm:$0xff] %v544_v51  ;;  %484 = vst [vmem:[%s865_s3 + $0x90] sm:$0xff] %v568_v52  ;;  %v131_v57 = vadd.f32 %v130_v53, %v714_v40  ;;  %v191_v58 = vadd.f32 %v190_v54, %v714_v40 }
  0xd0   :  { %v134_v59 = vpop.f32.mrf.mxu0  ;;  %v194_v60 = vpop.f32.mrf.mxu1 }
  0xd1   :  { %v546_v61 = vpack.c.bf16 %v131_v57, %v129_v55  ;;  %v570_v62 = vpack.c.bf16 %v191_v58, %v189_v56  ;;  %v135_v2 = vadd.f32 %v134_v59, %v712_v39  ;;  %v195_v3 = vadd.f32 %v194_v60, %v712_v39 }
  0xd2   :  { %v136_v0 = vpop.f32.mrf.mxu0  ;;  %v196_v1 = vpop.f32.mrf.mxu1 }
  0xd3   :  { %462 = vst [vmem:[%s865_s3 + $0xc] sm:$0xff] %v546_v61  ;;  %486 = vst [vmem:[%s865_s3 + $0x9c] sm:$0xff] %v570_v62  ;;  %v137_v4 = vadd.f32 %v136_v0, %v714_v40  ;;  %v197_v5 = vadd.f32 %v196_v1, %v714_v40 }
  0xd4   :  { %v138_v6 = vpop.f32.mrf.mxu0  ;;  %v198_v7 = vpop.f32.mrf.mxu1 }
  0xd5   :  { %v548_v8 = vpack.c.bf16 %v137_v4, %v135_v2  ;;  %v572_v9 = vpack.c.bf16 %v197_v5, %v195_v3  ;;  %v139_v13 = vadd.f32 %v138_v6, %v712_v39  ;;  %v199_v14 = vadd.f32 %v198_v7, %v712_v39 }
  0xd6   :  { %v140_v11 = vpop.f32.mrf.mxu0  ;;  %v200_v12 = vpop.f32.mrf.mxu1 }
  0xd7   :  { %464 = vst [vmem:[%s865_s3 + $0x18] sm:$0xff] %v548_v8  ;;  %488 = vst [vmem:[%s865_s3 + $0xa8] sm:$0xff] %v572_v9  ;;  %v141_v15 = vadd.f32 %v140_v11, %v714_v40  ;;  %v201_v16 = vadd.f32 %v200_v12, %v714_v40 }
  0xd8   :  { %v144_v17 = vpop.f32.mrf.mxu0  ;;  %v589_v18 = vpop.f32.mrf.mxu1 }
  0xd9   :  { %v550_v19 = vpack.c.bf16 %v141_v15, %v139_v13  ;;  %v574_v20 = vpack.c.bf16 %v201_v16, %v199_v14  ;;  %v246_v21 = vadd.f32 %v589_v18, %v740_v10  ;;  %v145_v24 = vadd.f32 %v144_v17, %v712_v39 }
  0xda   :  { %v146_v22 = vpop.f32.mrf.mxu0  ;;  %v237_v23 = vpop.f32.mrf.mxu1 }
  0xdb   :  { %466 = vst [vmem:[%s865_s3 + $0x24] sm:$0xff] %v550_v19  ;;  %490 = vst [vmem:[%s865_s3 + $0xb4] sm:$0xff] %v574_v20  ;;  %v549_v25 = vpack.c.bf16 %v246_v21, %v246_v21  ;;  %v147_v26 = vadd.f32 %v146_v22, %v714_v40  ;;  %v238_v27 = vadd.f32 %v237_v23, %v740_v10 }
  0xdc   :  { %v148_v28 = vpop.f32.mrf.mxu0  ;;  %v590_v29 = vpop.f32.mrf.mxu1 }
  0xdd   :  { %465 = vst [vmem:[%s865_s3 + $0x20] sm:$0xf] %v549_v25  ;;  %v552_v30 = vpack.c.bf16 %v147_v26, %v145_v24  ;;  %v545_v31 = vpack.c.bf16 %v238_v27, %v238_v27  ;;  %v249_v32 = vadd.f32 %v590_v29, %v740_v10  ;;  %v149_v35 = vadd.f32 %v148_v28, %v712_v39 }
  0xde   :  { %v150_v33 = vpop.f32.mrf.mxu0  ;;  %v240_v34 = vpop.f32.mrf.mxu1 }
  0xdf   :  { %468 = vst [vmem:[%s865_s3 + $0x30] sm:$0xff] %v552_v30  ;;  %461 = vst [vmem:[%s865_s3 + $0x8] sm:$0xf] %v545_v31  ;;  %v551_v36 = vpack.c.bf16 %v249_v32, %v249_v32  ;;  %v151_v37 = vadd.f32 %v150_v33, %v714_v40  ;;  %v241_v38 = vadd.f32 %v240_v34, %v740_v10 }
  0xe0   :  { %v154_v41 = vpop.f32.mrf.mxu0  ;;  %v593_v42 = vpop.f32.mrf.mxu1 }
  0xe1   :  { %467 = vst [vmem:[%s865_s3 + $0x2c] sm:$0xf] %v551_v36  ;;  %v554_v43 = vpack.c.bf16 %v151_v37, %v149_v35  ;;  %v547_v44 = vpack.c.bf16 %v241_v38, %v241_v38  ;;  %v262_v45 = vadd.f32 %v593_v42, %v740_v10  ;;  %v155_v48 = vadd.f32 %v154_v41, %v712_v39 }
  0xe2   :  { %v156_v46 = vpop.f32.mrf.mxu0  ;;  %v253_v47 = vpop.f32.mrf.mxu1 }
  0xe3   :  { %470 = vst [vmem:[%s865_s3 + $0x3c] sm:$0xff] %v554_v43  ;;  %463 = vst [vmem:[%s865_s3 + $0x14] sm:$0xf] %v547_v44  ;;  %v557_v49 = vpack.c.bf16 %v262_v45, %v262_v45  ;;  %v157_v50 = vadd.f32 %v156_v46, %v714_v40  ;;  %v254_v51 = vadd.f32 %v253_v47, %v740_v10 }
  0xe4   :  { %v158_v52 = vpop.f32.mrf.mxu0  ;;  %v594_v53 = vpop.f32.mrf.mxu1 }
  0xe5   :  { %473 = vst [vmem:[%s865_s3 + $0x50] sm:$0xf] %v557_v49  ;;  %v556_v54 = vpack.c.bf16 %v157_v50, %v155_v48  ;;  %v553_v55 = vpack.c.bf16 %v254_v51, %v254_v51  ;;  %v265_v56 = vadd.f32 %v594_v53, %v740_v10  ;;  %v159_v59 = vadd.f32 %v158_v52, %v712_v39 }
  0xe6   :  { %v160_v57 = vpop.f32.mrf.mxu0  ;;  %v256_v58 = vpop.f32.mrf.mxu1 }
  0xe7   :  { %472 = vst [vmem:[%s865_s3 + $0x48] sm:$0xff] %v556_v54  ;;  %469 = vst [vmem:[%s865_s3 + $0x38] sm:$0xf] %v553_v55  ;;  %v559_v60 = vpack.c.bf16 %v265_v56, %v265_v56  ;;  %v161_v61 = vadd.f32 %v160_v57, %v714_v40  ;;  %v257_v62 = vadd.f32 %v256_v58, %v740_v10 }
  0xe8   :  { %v164_v63 = vpop.f32.mrf.mxu0  ;;  %v597_v0 = vpop.f32.mrf.mxu1 }
  0xe9   :  { %475 = vst [vmem:[%s865_s3 + $0x5c] sm:$0xf] %v559_v60  ;;  %v558_v1 = vpack.c.bf16 %v161_v61, %v159_v59  ;;  %v555_v2 = vpack.c.bf16 %v257_v62, %v257_v62  ;;  %v278_v3 = vadd.f32 %v597_v0, %v740_v10  ;;  %v165_v6 = vadd.f32 %v164_v63, %v712_v39 }
  0xea   :  { %v166_v4 = vpop.f32.mrf.mxu0  ;;  %v269_v5 = vpop.f32.mrf.mxu1 }
  0xeb   :  { %474 = vst [vmem:[%s865_s3 + $0x54] sm:$0xff] %v558_v1  ;;  %471 = vst [vmem:[%s865_s3 + $0x44] sm:$0xf] %v555_v2  ;;  %v565_v7 = vpack.c.bf16 %v278_v3, %v278_v3  ;;  %v167_v8 = vadd.f32 %v166_v4, %v714_v40  ;;  %v270_v9 = vadd.f32 %v269_v5, %v740_v10 }
  0xec   :  { %v168_v11 = vpop.f32.mrf.mxu0  ;;  %v598_v12 = vpop.f32.mrf.mxu1 }
  0xed   :  { %481 = vst [vmem:[%s865_s3 + $0x80] sm:$0xf] %v565_v7  ;;  %v560_v13 = vpack.c.bf16 %v167_v8, %v165_v6  ;;  %v561_v14 = vpack.c.bf16 %v270_v9, %v270_v9  ;;  %v281_v15 = vadd.f32 %v598_v12, %v740_v10  ;;  %v169_v18 = vadd.f32 %v168_v11, %v712_v39 }
  0xee   :  { %v170_v16 = vpop.f32.mrf.mxu0  ;;  %v272_v17 = vpop.f32.mrf.mxu1 }
  0xef   :  { %476 = vst [vmem:[%s865_s3 + $0x60] sm:$0xff] %v560_v13  ;;  %477 = vst [vmem:[%s865_s3 + $0x68] sm:$0xf] %v561_v14  ;;  %v567_v19 = vpack.c.bf16 %v281_v15, %v281_v15  ;;  %v171_v20 = vadd.f32 %v170_v16, %v714_v40  ;;  %v273_v21 = vadd.f32 %v272_v17, %v740_v10 }
  0xf0   :  { %v174_v22 = vpop.f32.mrf.mxu0  ;;  %v601_v23 = vpop.f32.mrf.mxu1 }
  0xf1   :  { %483 = vst [vmem:[%s865_s3 + $0x8c] sm:$0xf] %v567_v19  ;;  %v562_v24 = vpack.c.bf16 %v171_v20, %v169_v18  ;;  %v563_v25 = vpack.c.bf16 %v273_v21, %v273_v21  ;;  %v294_v26 = vadd.f32 %v601_v23, %v740_v10  ;;  %v175_v29 = vadd.f32 %v174_v22, %v712_v39 }
  0xf2   :  { %v176_v27 = vpop.f32.mrf.mxu0  ;;  %v285_v28 = vpop.f32.mrf.mxu1 }
  0xf3   :  { %478 = vst [vmem:[%s865_s3 + $0x6c] sm:$0xff] %v562_v24  ;;  %479 = vst [vmem:[%s865_s3 + $0x74] sm:$0xf] %v563_v25  ;;  %v573_v30 = vpack.c.bf16 %v294_v26, %v294_v26  ;;  %v177_v31 = vadd.f32 %v176_v27, %v714_v40  ;;  %v286_v32 = vadd.f32 %v285_v28, %v740_v10 }
  0xf4   :  { %v178_v33 = vpop.f32.mrf.mxu0  ;;  %v602_v34 = vpop.f32.mrf.mxu1 }
  0xf5   :  { %489 = vst [vmem:[%s865_s3 + $0xb0] sm:$0xf] %v573_v30  ;;  %v564_v35 = vpack.c.bf16 %v177_v31, %v175_v29  ;;  %v569_v36 = vpack.c.bf16 %v286_v32, %v286_v32  ;;  %v297_v37 = vadd.f32 %v602_v34, %v740_v10  ;;  %v179_v42 = vadd.f32 %v178_v33, %v712_v39 }
  0xf6   :  { %v180_v38 = vpop.f32.mrf.mxu0  ;;  %v288_v41 = vpop.f32.mrf.mxu1 }
  0xf7   :  { %480 = vst [vmem:[%s865_s3 + $0x78] sm:$0xff] %v564_v35  ;;  %485 = vst [vmem:[%s865_s3 + $0x98] sm:$0xf] %v569_v36  ;;  %v575_v43 = vpack.c.bf16 %v297_v37, %v297_v37  ;;  %v181_v44 = vadd.f32 %v180_v38, %v714_v40  ;;  %v289_v45 = vadd.f32 %v288_v41, %v740_v10 }
  0xf9   :  { %491 = vst [vmem:[%s865_s3 + $0xbc] sm:$0xf] %v575_v43  ;;  %v566_v46 = vpack.c.bf16 %v181_v44, %v179_v42  ;;  %v571_v47 = vpack.c.bf16 %v289_v45, %v289_v45 }
  0xfb   :  { %482 = vst [vmem:[%s865_s3 + $0x84] sm:$0xff] %v566_v46  ;;  %487 = vst [vmem:[%s865_s3 + $0xa4] sm:$0xf] %v571_v47 }

// kernel: _lambda_.8
= control target key start
LH: loop header
LB: loop body
LE: loop exit
PB: predicated region body
PF: predicated region fallthrough
CT: control target
= control target key end

     0   :  { %vm190_vm0 = vcmask 1043456   ;;  %vm165_vm1 = vcmask 64512   ;;  %vm524_vm2 = vcmask 31744   ;;  %vm734_vm3 = vcmask 1041408   ;;  %s1921_s4 = inlined_call_operand.vmem [shape: f32[8,128], index: 4, kind: input, shape index: {}]   ;;  %s1922_s3 = inlined_call_operand.vmem [shape: f32[128,8], index: 3, kind: input, shape index: {}]   ;;  %s1923_s6 = inlined_call_operand.vmem [shape: bf16[128,4], index: 6, kind: input, shape index: {}]   ;;  %s1924_s0 = inlined_call_operand.vmem [shape: bf16[128,128], index: 0, kind: input, shape index: {}]   ;;  %s1925_s1 = inlined_call_operand.vmem [shape: bf16[128,128], index: 1, kind: input, shape index: {}]   ;;  %s1926_s5 = inlined_call_operand.vmem [shape: f32[1,128], index: 5, kind: input, shape index: {}]   ;;  %s1927_s7 = inlined_call_operand.vmem [shape: bf16[4,128], index: 7, kind: input, shape index: {}]   ;;  %s1928_s8 = inlined_call_operand.vmem [shape: f32[128,128], index: 8, kind: input, shape index: {}]   ;;  %s1929_s2 = inlined_call_operand.vmem [shape: bf16[128,128], index: 2, kind: input, shape index: {}]   ;;  %s1930_s9 = inlined_call_operand.vmem [shape: f32[1,128], index: 9, kind: input, shape index: {}]   ;;  %s1931_s10 = inlined_call_operand.vmem [shape: f32[128,128], index: 10, kind: output, shape index: {}]  }
   0x1   :  { %v156_v0 = vld [vmem:[%s1921_s4] sm:$0xff]  ;;  %v133_v2 = vld [vmem:[%s1922_s3 + $0x8] sm:$0xff]  ;;  %v134_v5 = vld [vmem:[%s1922_s3 + $0x10] sm:$0xff] }
   0x2   :  { %v132_v1 = vld [vmem:[%s1922_s3] sm:$0xff]  ;;  %v157_v3 = vpack.c.bf16 %v156_v0, %v156_v0  ;;  %v135_v6 = vld [vmem:[%s1922_s3 + $0x18] sm:$0xff]  ;;  %v137_v8 = vld [vmem:[%s1922_s3 + $0x28] sm:$0xff] }
   0x3   :  { %v148_v4 = vpack.c.bf16 %v133_v2, %v132_v1  ;;  %v136_v7 = vld [vmem:[%s1922_s3 + $0x20] sm:$0xff]  ;;  %v149_v10 = vpack.c.bf16 %v135_v6, %v134_v5  ;;  %v138_v12 = vld [vmem:[%s1922_s3 + $0x30] sm:$0xff]  ;;  %v1318_v13 = vld [vmem:[%s1923_s6 + $0x38] sm:$0xff]  }
   0x4   :  { %1316 = vmatprep.subr.msk.bf16.mxu0 %vm190_vm0, %v157_v3  ;;  %v192_v9 = vsel %vm190_vm0, %v157_v3, 0  ;;  %v150_v11 = vpack.c.bf16 %v137_v8, %v136_v7  ;;  %v1319_v14 = vld [vmem:[%s1923_s6 + $0x30] sm:$0xff]   ;;  %v139_v15 = vld [vmem:[%s1922_s3 + $0x38] sm:$0xff]  ;;  %1218 = vmatprep.subr.bf16.mxu1 %v1318_v13  ;;  %v140_v16 = vld [vmem:[%s1922_s3 + $0x40] sm:$0xff] }
   0x5   :  { %1202 = vmatprep.mubr.msk.bf16.mxu0 %vm165_vm1, %v148_v4  ;;  %1201 = vmatpush3.bf16.msra.mxu0 %v192_v9  ;;  %v141_v17 = vld [vmem:[%s1922_s3 + $0x48] sm:$0xff]  ;;  %v151_v19 = vpack.c.bf16 %v139_v15, %v138_v12  ;;  %v1321_v21 = vld [vmem:[%s1923_s6 + $0x20] sm:$0xff]   ;;  %v142_v22 = vld [vmem:[%s1922_s3 + $0x50] sm:$0xff] }
   0x6   :  { %1219 = vmatpush3.bf16.msra.mxu1 %v1318_v13  ;;  %v1320_v18 = vld [vmem:[%s1923_s6 + $0x28] sm:$0xff]   ;;  %v152_v20 = vpack.c.bf16 %v141_v17, %v140_v16  ;;  %v143_v23 = vld [vmem:[%s1922_s3 + $0x58] sm:$0xff]  ;;  %v144_v24 = vld [vmem:[%s1922_s3 + $0x60] sm:$0xff] }
   0x7   :  { %1220 = vmatprep.subr.bf16.mxu1 %v1319_v14  ;;  %v145_v25 = vld [vmem:[%s1922_s3 + $0x68] sm:$0xff]  ;;  %v153_v26 = vpack.c.bf16 %v143_v23, %v142_v22  ;;  %v146_v28 = vld [vmem:[%s1922_s3 + $0x70] sm:$0xff]  ;;  %v147_v29 = vld [vmem:[%s1922_s3 + $0x78] sm:$0xff] }
   0x8   :  { %1203 = vmatmul.mubr.msk.bf16.vlgmr.msra.gmra.mxu0 %vm165_vm1, %v149_v10  ;;  %v154_v27 = vpack.c.bf16 %v145_v25, %v144_v24  ;;  %v155_v30 = vpack.c.bf16 %v147_v29, %v146_v28  ;;  %v1322_v31 = vld [vmem:[%s1923_s6 + $0x18] sm:$0xff]   ;;  %v1323_v32 = vld [vmem:[%s1923_s6 + $0x10] sm:$0xff]   ;;  %v1324_v33 = vld [vmem:[%s1923_s6 + $0x8] sm:$0xff]  }
   0x9   :  { %1206 = vmatprep.mubr.msk.bf16.mxu0 %vm165_vm1, %v150_v11  ;;  %v1325_v34 = vld [vmem:[%s1923_s6] sm:$0xff]   ;;  %v1129_v38 = vld [vmem:[%s1924_s0 + $0x8] sm:$0xff]   ;;  %v1130_v56 = vld [vmem:[%s1924_s0 + $0x10] sm:$0xff]  }
   0xa   :  { %1221 = vmatpush3.bf16.msra.mxu1 %v1319_v14  ;;  %v1034_v35 = vld [vmem:[%s1924_s0] sm:$0xff]   ;;  %v1136_v39 = vld [vmem:[%s1925_s1 + $0x8] sm:$0xff]   ;;  %v1040_v42 = vunpack.c.h.bf16 %v1129_v38  ;;  %v1039_v49 = vunpack.c.l.bf16 %v1129_v38  ;;  %v1137_v57 = vld [vmem:[%s1925_s1 + $0x10] sm:$0xff]   ;;  %v1043_v5 = vunpack.c.l.bf16 %v1130_v56  ;;  %v1044_v11 = vunpack.c.h.bf16 %v1130_v56 }
   0xb   :  { %1222 = vmatprep.subr.bf16.mxu1 %v1320_v18  ;;  %v1066_v36 = vld [vmem:[%s1925_s1] sm:$0xff]   ;;  %v1072_v43 = vunpack.c.h.bf16 %v1136_v39  ;;  %v1035_v44 = vunpack.c.l.bf16 %v1034_v35  ;;  %v1036_v47 = vunpack.c.h.bf16 %v1034_v35  ;;  %v1071_v50 = vunpack.c.l.bf16 %v1136_v39  ;;  %v1131_v3 = vld [vmem:[%s1924_s0 + $0x18] sm:$0xff]   ;;  %v1140_v38 = vld [vmem:[%s1925_s1 + $0x28] sm:$0xff]  }
   0xc   :  { %v1543_v40 = vld [vmem:[%s1926_s5] ss:$0 sm:$0xff]  ;;  %v1067_v45 = vunpack.c.l.bf16 %v1066_v36  ;;  %v1068_v48 = vunpack.c.h.bf16 %v1066_v36  ;;  %v1138_v4 = vld [vmem:[%s1925_s1 + $0x18] sm:$0xff]   ;;  %v1075_v6 = vunpack.c.l.bf16 %v1137_v57  ;;  %v1048_v9 = vunpack.c.h.bf16 %v1131_v3 }
   0xd   :  { %v294_v54 = vmul.f32 %v1072_v43, %v1040_v42  ;;  %v293_v63 = vmul.f32 %v1071_v50, %v1039_v49  ;;  %v1080_v10 = vunpack.c.h.bf16 %v1138_v4  ;;  %v1076_v13 = vunpack.c.h.bf16 %v1137_v57  ;;  %v1139_v28 = vld [vmem:[%s1925_s1 + $0x20] sm:$0xff]  }
   0xe   :  { %1223 = vmatpush3.bf16.msra.mxu1 %v1320_v18  ;;  %v291_v58 = vmul.f32 %v1067_v45, %v1035_v44  ;;  %v292_v62 = vmul.f32 %v1068_v48, %v1036_v47  ;;  %v1047_v17 = vunpack.c.l.bf16 %v1131_v3  ;;  %v1079_v18 = vunpack.c.l.bf16 %v1138_v4 }
   0xf   :  { %1224 = vmatprep.subr.bf16.mxu1 %v1321_v21  ;;  %v295_v23 = vmul.f32 %v1075_v6, %v1043_v5  ;;  %v298_v24 = vmul.f32 %v1080_v10, %v1048_v9  ;;  %v1088_v45 = vunpack.c.h.bf16 %v1140_v38  ;;  %v1084_v50 = vunpack.c.h.bf16 %v1139_v28  ;;  %v1142_v9 = vld [vmem:[%s1925_s1 + $0x38] sm:$0xff]  }
  0x10   :  { %1207 = vmatmul.mubr.msk.bf16.gmra.mxu0 %vm165_vm1, %v151_v19 }
  0x11   :  { %1210 = vmatprep.mubr.msk.bf16.mxu0 %vm165_vm1, %v152_v20 }
  0x12   :  { %1225 = vmatpush3.bf16.msra.mxu1 %v1321_v21 }
  0x13   :  { %1226 = vmatprep.subr.bf16.mxu1 %v1322_v31 }
  0x16   :  { %1227 = vmatpush3.bf16.msra.mxu1 %v1322_v31 }
  0x17   :  { %1228 = vmatprep.subr.bf16.mxu1 %v1323_v32 }
  0x18   :  { %1211 = vmatmul.mubr.msk.bf16.gmra.mxu0 %vm165_vm1, %v153_v26 }
  0x19   :  { %1214 = vmatprep.mubr.msk.bf16.mxu0 %vm165_vm1, %v154_v27  ;;  %v1132_v27 = vld [vmem:[%s1924_s0 + $0x20] sm:$0xff]  }
  0x1a   :  { %1229 = vmatpush3.bf16.msra.mxu1 %v1323_v32  ;;  %v296_v32 = vmul.f32 %v1076_v13, %v1044_v11  ;;  %v1051_v39 = vunpack.c.l.bf16 %v1132_v27 }
  0x1b   :  { %1230 = vmatprep.subr.bf16.mxu1 %v1324_v33 }
  0x1e   :  { %1231 = vmatpush3.bf16.msra.mxu1 %v1324_v33  ;;  %v297_v33 = vmul.f32 %v1079_v18, %v1047_v17 }
  0x1f   :  { %1232 = vmatprep.subr.bf16.mxu1 %v1325_v34 }
  0x20   :  { %1215 = vmatmul.mubr.msk.bf16.gmra.mxu0 %vm165_vm1, %v155_v30 }
  0x22   :  { %1233 = vmatpush3.bf16.msra.mxu1 %v1325_v34 }
  0xc8   :  { %v1204_v37 = vpop.f32.mrf.mxu0 }
  0xc9   :  { %v237_v51 = vadd.f32 %v1204_v37, %v1543_v40  ;;  %v1133_v37 = vld [vmem:[%s1924_s0 + $0x28] sm:$0xff]  }
  0xca   :  { %v228_v41 = vpop.f32.mrf.mxu0  ;;  %v1056_v44 = vunpack.c.h.bf16 %v1133_v37 }
  0xcb   :  { %v229_v46 = vadd.f32 %v1543_v40, %v228_v41  ;;  %v309_v0 = vmul.f32 %v237_v51, %v237_v51  ;;  %v1083_v41 = vunpack.c.l.bf16 %v1139_v28 }
  0xcc   :  { %v1205_v52 = vpop.f32.mrf.mxu0 }
  0xcd   :  { %v240_v53 = vadd.f32 %v1205_v52, %v1543_v40  ;;  %v307_v59 = vmul.f32 %v229_v46, %v229_v46  ;;  %v325_v16 = vadd.f32 %v309_v0, %v293_v63  ;;  %v1052_v46 = vunpack.c.h.bf16 %v1132_v27  ;;  %v1141_v63 = vld [vmem:[%s1925_s1 + $0x30] sm:$0xff]  }
  0xce   :  { %v231_v55 = vpop.f32.mrf.mxu0  ;;  %v1055_v52 = vunpack.c.l.bf16 %v1133_v37  ;;  %v1091_v11 = vunpack.c.l.bf16 %v1141_v63 }
  0xcf   :  { %v310_v60 = vmul.f32 %v240_v53, %v240_v53  ;;  %v232_v61 = vadd.f32 %v1543_v40, %v231_v55  ;;  %v323_v14 = vadd.f32 %v307_v59, %v291_v58  ;;  %v1087_v53 = vunpack.c.l.bf16 %v1140_v38 }
  0xd0   :  { %v1208_v1 = vpop.f32.mrf.mxu0  ;;  %v299_v58 = vmul.f32 %v1083_v41, %v1051_v39  ;;  %v302_v59 = vmul.f32 %v1088_v45, %v1056_v44  ;;  %v300_v3 = vmul.f32 %v1084_v50, %v1052_v46 }
  0xd1   :  { %v308_v2 = vmul.f32 %v232_v61, %v232_v61  ;;  %v326_v7 = vadd.f32 %v310_v60, %v294_v54  ;;  %v253_v19 = vadd.f32 %v1208_v1, %v1543_v40  ;;  %v301_v4 = vmul.f32 %v1087_v53, %v1055_v52 }
  0xd2   :  { %v244_v8 = vpop.f32.mrf.mxu0 }
  0xd3   :  { %v245_v12 = vadd.f32 %v1543_v40, %v244_v8  ;;  %v324_v15 = vadd.f32 %v308_v2, %v292_v62  ;;  %v340_v26 = vpack.c.bf16 %v326_v7, %v325_v16  ;;  %v313_v34 = vmul.f32 %v253_v19, %v253_v19  ;;  %v1134_v62 = vld [vmem:[%s1924_s0 + $0x30] sm:$0xff]   ;;  %v1135_v8 = vld [vmem:[%s1924_s0 + $0x38] sm:$0xff]  }
  0xd4   :  { %v1209_v20 = vpop.f32.mrf.mxu0  ;;  %v1059_v10 = vunpack.c.l.bf16 %v1134_v62  ;;  %v1060_v16 = vunpack.c.h.bf16 %v1134_v62 }
  0xd5   :  { %v256_v21 = vadd.f32 %v1209_v20, %v1543_v40  ;;  %v339_v22 = vpack.c.bf16 %v324_v15, %v323_v14  ;;  %v311_v29 = vmul.f32 %v245_v12, %v245_v12  ;;  %v329_v51 = vadd.f32 %v313_v34, %v297_v33 }
  0xd6   :  { %v247_v25 = vpop.f32.mrf.mxu0  ;;  %v1064_v14 = vunpack.c.h.bf16 %v1135_v8  ;;  %v1096_v15 = vunpack.c.h.bf16 %v1142_v9  ;;  %v1092_v20 = vunpack.c.h.bf16 %v1141_v63  ;;  %v303_v28 = vmul.f32 %v1091_v11, %v1059_v10 }
  0xd7   :  { %v314_v30 = vmul.f32 %v256_v21, %v256_v21  ;;  %v248_v31 = vadd.f32 %v1543_v40, %v247_v25  ;;  %1234 = vmatprep.mubr.bf16.mxu1 %v339_v22  ;;  %v327_v47 = vadd.f32 %v311_v29, %v295_v23  ;;  %v1063_v22 = vunpack.c.l.bf16 %v1135_v8 }
  0xd8   :  { %v1212_v35 = vpop.f32.mrf.mxu0  ;;  %1235 = vmatmul.mubr.bf16.vlgmr.msra.gmra.mxu1 %v340_v26  ;;  %v1095_v23 = vunpack.c.l.bf16 %v1142_v9  ;;  %v306_v29 = vmul.f32 %v1096_v15, %v1064_v14 }
  0xd9   :  { %v312_v36 = vmul.f32 %v248_v31, %v248_v31  ;;  %v330_v42 = vadd.f32 %v314_v30, %v298_v24  ;;  %v269_v54 = vadd.f32 %v1212_v35, %v1543_v40  ;;  %v304_v35 = vmul.f32 %v1092_v20, %v1060_v16 }
  0xda   :  { %v260_v43 = vpop.f32.mrf.mxu0 }
  0xdb   :  { %v328_v48 = vadd.f32 %v312_v36, %v296_v32  ;;  %v261_v49 = vadd.f32 %v1543_v40, %v260_v43  ;;  %v342_v61 = vpack.c.bf16 %v330_v42, %v329_v51  ;;  %v317_v5 = vmul.f32 %v269_v54, %v269_v54 }
  0xdc   :  { %v1213_v55 = vpop.f32.mrf.mxu0  ;;  %v305_v36 = vmul.f32 %v1095_v23, %v1063_v22 }
  0xdd   :  { %v272_v56 = vadd.f32 %v1213_v55, %v1543_v40  ;;  %v341_v57 = vpack.c.bf16 %v328_v48, %v327_v47  ;;  %v315_v0 = vmul.f32 %v261_v49, %v261_v49  ;;  %v333_v21 = vadd.f32 %v317_v5, %v301_v4 }
  0xde   :  { %v263_v60 = vpop.f32.mrf.mxu0 }
  0xdf   :  { %v318_v1 = vmul.f32 %v272_v56, %v272_v56  ;;  %v264_v2 = vadd.f32 %v1543_v40, %v263_v60  ;;  %1238 = vmatprep.mubr.bf16.mxu1 %v341_v57  ;;  %v331_v17 = vadd.f32 %v315_v0, %v299_v58 }
  0xe0   :  { %v1216_v6 = vpop.f32.mrf.mxu0  ;;  %1239 = vmatmul.mubr.bf16.gmra.mxu1 %v342_v61 }
  0xe1   :  { %v316_v7 = vmul.f32 %v264_v2, %v264_v2  ;;  %v334_v12 = vadd.f32 %v318_v1, %v302_v59  ;;  %v285_v24 = vadd.f32 %v1216_v6, %v1543_v40 }
  0xe2   :  { %v276_v13 = vpop.f32.mrf.mxu0 }
  0xe3   :  { %v332_v18 = vadd.f32 %v316_v7, %v300_v3  ;;  %v277_v19 = vadd.f32 %v1543_v40, %v276_v13  ;;  %v344_v31 = vpack.c.bf16 %v334_v12, %v333_v21  ;;  %v321_v37 = vmul.f32 %v285_v24, %v285_v24 }
  0xe4   :  { %v1217_v25 = vpop.f32.mrf.mxu0 }
  0xe5   :  { %v288_v26 = vadd.f32 %v1217_v25, %v1543_v40  ;;  %v343_v27 = vpack.c.bf16 %v332_v18, %v331_v17  ;;  %v319_v32 = vmul.f32 %v277_v19, %v277_v19  ;;  %v337_v43 = vadd.f32 %v321_v37, %v305_v36 }
  0xe6   :  { %v279_v30 = vpop.f32.mrf.mxu0 }
  0xe7   :  { %v322_v33 = vmul.f32 %v288_v26, %v288_v26  ;;  %v280_v34 = vadd.f32 %v1543_v40, %v279_v30  ;;  %1242 = vmatprep.mubr.bf16.mxu1 %v343_v27  ;;  %v335_v41 = vadd.f32 %v319_v32, %v303_v28 }
  0xe8   :  { %1243 = vmatmul.mubr.bf16.gmra.mxu1 %v344_v31 }
  0xe9   :  { %v320_v38 = vmul.f32 %v280_v34, %v280_v34  ;;  %v338_v39 = vadd.f32 %v322_v33, %v306_v29  ;;  %v709_v29 = vld [vmem:[%s1927_s7] sm:$0x3] }
  0xea   :  { %1317 = vmatprep.subr.msk.bf16.mxu0 %vm734_vm3, %v709_v29  ;;  %v736_v30 = vsel %vm734_vm3, %v709_v29, 0 }
  0xeb   :  { %v336_v42 = vadd.f32 %v320_v38, %v304_v35  ;;  %v346_v45 = vpack.c.bf16 %v338_v39, %v337_v43  ;;  %1251 = vmatpush3.bf16.msra.mxu0 %v736_v30 }
  0xed   :  { %v345_v44 = vpack.c.bf16 %v336_v42, %v335_v41 }
  0xef   :  { %1246 = vmatprep.mubr.bf16.mxu1 %v345_v44 }
  0xf0   :  { %1247 = vmatmul.mubr.bf16.gmra.mxu1 %v346_v45 }
 0x198   :  { %v1236_v46 = vpop.f32.mrf.mxu1 }
 0x199   :  { %v1597_v47 = vmul.f32 0.17677669, %v1236_v46 }
 0x19a   :  { %v445_v48 = vpop.f32.mrf.mxu1 }
 0x19b   :  { %v1599_v40 = vmul.f32 0.17677669, %v445_v48  ;;  %v531_v49 = vsel %vm524_vm2, %v1597_v47, -inf }
 0x19c   :  { %532 = vmax.xlane.f32.xlu1 %v531_v49  ;;  %v1237_v50 = vpop.f32.mrf.mxu1 }
 0x19d   :  { %v1603_v51 = vmul.f32 0.17677669, %v1237_v50  ;;  %v525_v52 = vsel %vm524_vm2, %v1599_v40, -inf }
 0x19e   :  { %526 = vmax.xlane.f32.xlu0 %v525_v52  ;;  %v448_v53 = vpop.f32.mrf.mxu1 }
 0x19f   :  { %v1607_v54 = vmul.f32 0.17677669, %v448_v53  ;;  %v534_v55 = vsel %vm524_vm2, %v1603_v51, -inf }
 0x1a0   :  { %535 = vmax.xlane.f32.xlu1 %v534_v55  ;;  %v1240_v56 = vpop.f32.mrf.mxu1 }
 0x1a1   :  { %v528_v57 = vsel %vm524_vm2, %v1607_v54, -inf  ;;  %v1615_v61 = vmul.f32 0.17677669, %v1240_v56 }
 0x1a2   :  { %529 = vmax.xlane.f32.xlu0 %v528_v57  ;;  %v461_v58 = vpop.f32.mrf.mxu1 }
 0x1a3   :  { %v1613_v59 = vmul.f32 0.17677669, %v461_v58  ;;  %v543_v3 = vsel %vm524_vm2, %v1615_v61, -inf }
 0x1a4   :  { %v1241_v60 = vpop.f32.mrf.mxu1 }
 0x1a5   :  { %v537_v62 = vsel %vm524_vm2, %v1613_v59, -inf  ;;  %v1621_v2 = vmul.f32 0.17677669, %v1241_v60 }
 0x1a6   :  { %538 = vmax.xlane.f32.xlu0 %v537_v62  ;;  %v464_v63 = vpop.f32.mrf.mxu1 }
 0x1a7   :  { %v1619_v0 = vmul.f32 0.17677669, %v464_v63  ;;  %v546_v9 = vsel %vm524_vm2, %v1621_v2, -inf }
 0x1a8   :  { %v1244_v1 = vpop.f32.mrf.mxu1 }
 0x1a9   :  { %v540_v4 = vsel %vm524_vm2, %v1619_v0, -inf  ;;  %v1629_v8 = vmul.f32 0.17677669, %v1244_v1 }
 0x1aa   :  { %544 = vmax.xlane.f32.xlu0 %v543_v3  ;;  %541 = vmax.xlane.f32.xlu1 %v540_v4  ;;  %v477_v5 = vpop.f32.mrf.mxu1 }
 0x1ab   :  { %v1627_v6 = vmul.f32 0.17677669, %v477_v5  ;;  %v555_v15 = vsel %vm524_vm2, %v1629_v8, -inf }
 0x1ac   :  { %v1245_v7 = vpop.f32.mrf.mxu1 }
 0x1ad   :  { %v549_v10 = vsel %vm524_vm2, %v1627_v6, -inf  ;;  %v1637_v14 = vmul.f32 0.17677669, %v1245_v7 }
 0x1ae   :  { %547 = vmax.xlane.f32.xlu1 %v546_v9  ;;  %550 = vmax.xlane.f32.xlu0 %v549_v10  ;;  %v480_v11 = vpop.f32.mrf.mxu1 }
 0x1af   :  { %v1635_v12 = vmul.f32 0.17677669, %v480_v11  ;;  %v558_v21 = vsel %vm524_vm2, %v1637_v14, -inf }
 0x1b0   :  { %v1248_v13 = vpop.f32.mrf.mxu1 }
 0x1b1   :  { %v552_v16 = vsel %vm524_vm2, %v1635_v12, -inf  ;;  %v1645_v20 = vmul.f32 0.17677669, %v1248_v13 }
 0x1b2   :  { %556 = vmax.xlane.f32.xlu0 %v555_v15  ;;  %553 = vmax.xlane.f32.xlu1 %v552_v16  ;;  %v493_v17 = vpop.f32.mrf.mxu1 }
 0x1b3   :  { %v1643_v18 = vmul.f32 0.17677669, %v493_v17  ;;  %v567_v26 = vsel %vm524_vm2, %v1645_v20, -inf }
 0x1b4   :  { %v1249_v19 = vpop.f32.mrf.mxu1 }
 0x1b5   :  { %v561_v22 = vsel %vm524_vm2, %v1643_v18, -inf  ;;  %v1653_v25 = vmul.f32 0.17677669, %v1249_v19 }
 0x1b6   :  { %559 = vmax.xlane.f32.xlu1 %v558_v21  ;;  %562 = vmax.xlane.f32.xlu0 %v561_v22  ;;  %v496_v23 = vpop.f32.mrf.mxu1 }
 0x1b7   :  { %v1651_v24 = vmul.f32 0.17677669, %v496_v23  ;;  %v570_v28 = vsel %vm524_vm2, %v1653_v25, -inf }
 0x1b9   :  { %v564_v27 = vsel %vm524_vm2, %v1651_v24, -inf }
 0x1ba   :  { %568 = vmax.xlane.f32.xlu0 %v567_v26  ;;  %565 = vmax.xlane.f32.xlu1 %v564_v27 }
 0x1be   :  { %571 = vmax.xlane.f32.xlu1 %v570_v28 }
 0x225   :  { %v533_v31 = vpop.xlane.xlu1 %532 }
 0x226   :  { %v575_v32 = vsub.f32 %v1597_v47, %v533_v31 }
 0x227   :  { %v527_v33 = vpop.xlane.xlu0 %526 }
 0x228   :  { %v573_v34 = vsub.f32 %v1599_v40, %v527_v33  ;;  %v593_v36 = vmul.f32 1.442695, %v575_v32 }
 0x229   :  { %v536_v35 = vpop.xlane.xlu1 %535 }
 0x22a   :  { %v589_v37 = vmul.f32 1.442695, %v573_v34  ;;  %v576_v38 = vsub.f32 %v1603_v51, %v536_v35 }
 0x22b   :  { %v530_v39 = vpop.xlane.xlu0 %529 }
 0x22c   :  { %1326 = vpow2.f32 %v589_v37  ;;  %v574_v41 = vsub.f32 %v1607_v54, %v530_v39  ;;  %v595_v42 = vmul.f32 1.442695, %v576_v38 }
 0x22d   :  { %1328 = vpow2.f32 %v593_v36 }
 0x22e   :  { %v591_v43 = vmul.f32 1.442695, %v574_v41 }
 0x22f   :  { %v539_v44 = vpop.xlane.xlu0 %538 }
 0x230   :  { %1330 = vpow2.f32 %v591_v43  ;;  %v577_v45 = vsub.f32 %v1613_v59, %v539_v44 }
 0x231   :  { %1332 = vpow2.f32 %v595_v42 }
 0x232   :  { %v597_v46 = vmul.f32 1.442695, %v577_v45 }
 0x233   :  { %v545_v47 = vpop.xlane.xlu0 %544  ;;  %v542_v48 = vpop.xlane.xlu1 %541 }
 0x234   :  { %1334 = vpow2.f32 %v597_v46  ;;  %v579_v40 = vsub.f32 %v1615_v61, %v545_v47  ;;  %v578_v49 = vsub.f32 %v1619_v0, %v542_v48  ;;  %v873_v48 = vld [vmem:[%s1928_s8 + $0x70] sm:$0xff] }
 0x236   :  { %v601_v50 = vmul.f32 1.442695, %v579_v40  ;;  %v599_v51 = vmul.f32 1.442695, %v578_v49  ;;  %v874_v40 = vld [vmem:[%s1928_s8 + $0x78] sm:$0xff]  ;;  %v871_v49 = vld [vmem:[%s1928_s8 + $0x60] sm:$0xff] }
 0x237   :  { %v548_v52 = vpop.xlane.xlu1 %547  ;;  %v551_v53 = vpop.xlane.xlu0 %550 }
 0x238   :  { %1336 = vpow2.f32 %v601_v50  ;;  %v580_v54 = vsub.f32 %v1621_v2, %v548_v52  ;;  %v581_v55 = vsub.f32 %v1627_v6, %v551_v53  ;;  %v1753_v50 = vpack.c.bf16 %v874_v40, %v873_v48  ;;  %v869_v53 = vld [vmem:[%s1928_s8 + $0x50] sm:$0xff] }
 0x239   :  { %v1673_v56 = vpop.eup %1326  ;;  %1338 = vpow2.f32 %v599_v51  ;;  %v872_v51 = vld [vmem:[%s1928_s8 + $0x68] sm:$0xff] }
 0x23a   :  { %v603_v57 = vmul.f32 1.442695, %v580_v54  ;;  %v605_v58 = vmul.f32 1.442695, %v581_v55  ;;  %v621_v59 = vsel %vm524_vm2, %v1673_v56, 0.0  ;;  %v1677_v60 = vpop.eup %1328  ;;  %1268 = vmatprep.subr.bf16.mxu0 %v1753_v50  ;;  %v1759_v52 = vpack.c.bf16 %v872_v51, %v871_v49  ;;  %1300 = vmatprep.subr.bf16.mxu1 %v1753_v50  ;;  %v870_v54 = vld [vmem:[%s1928_s8 + $0x58] sm:$0xff] }
 0x23b   :  { %v557_v61 = vpop.xlane.xlu0 %556  ;;  %v554_v62 = vpop.xlane.xlu1 %553  ;;  %622 = vadd.xlane.f32.xlu0 %v621_v59  ;;  %v627_v4 = vsel %vm524_vm2, %v1677_v60, 0.0  ;;  %1308 = vmatpush3.bf16.msra.mxu1 %v1753_v50  ;;  %v1770_v55 = vpack.c.bf16 %v870_v54, %v869_v53 }
 0x23c   :  { %1340 = vpow2.f32 %v603_v57  ;;  %v583_v63 = vsub.f32 %v1629_v8, %v557_v61  ;;  %v582_v0 = vsub.f32 %v1635_v12, %v554_v62  ;;  %1301 = vmatprep.subr.bf16.mxu1 %v1759_v52  ;;  %v867_v57 = vld [vmem:[%s1928_s8 + $0x40] sm:$0xff]  ;;  %v865_v61 = vld [vmem:[%s1928_s8 + $0x30] sm:$0xff]  ;;  %v866_v62 = vld [vmem:[%s1928_s8 + $0x38] sm:$0xff] }
 0x23d   :  { %v1681_v1 = vpop.eup %1330  ;;  %1342 = vpow2.f32 %v605_v58  ;;  %v868_v58 = vld [vmem:[%s1928_s8 + $0x48] sm:$0xff] }
 0x23e   :  { %v609_v2 = vmul.f32 1.442695, %v583_v63  ;;  %v607_v3 = vmul.f32 1.442695, %v582_v0  ;;  %v624_v5 = vsel %vm524_vm2, %v1681_v1, 0.0  ;;  %v1687_v6 = vpop.eup %1332  ;;  %v1780_v59 = vpack.c.bf16 %v868_v58, %v867_v57 }
 0x23f   :  { %v560_v7 = vpop.xlane.xlu1 %559  ;;  %628 = vadd.xlane.f32.xlu0 %v627_v4  ;;  %v563_v9 = vpop.xlane.xlu0 %562  ;;  %625 = vadd.xlane.f32.xlu1 %v624_v5  ;;  %v630_v16 = vsel %vm524_vm2, %v1687_v6, 0.0  ;;  %v1790_v63 = vpack.c.bf16 %v866_v62, %v865_v61  ;;  %v859_v62 = vld [vmem:[%s1928_s8] sm:$0xff] }
 0x240   :  { %1344 = vpow2.f32 %v609_v2  ;;  %v584_v8 = vsub.f32 %v1637_v14, %v560_v7  ;;  %v585_v10 = vsub.f32 %v1643_v18, %v563_v9  ;;  %1309 = vmatpush3.bf16.msra.mxu1 %v1759_v52 }
 0x241   :  { %v1691_v11 = vpop.eup %1334  ;;  %1346 = vpow2.f32 %v607_v3  ;;  %1302 = vmatprep.subr.bf16.mxu1 %v1770_v55 }
 0x242   :  { %v611_v12 = vmul.f32 1.442695, %v584_v8  ;;  %v613_v13 = vmul.f32 1.442695, %v585_v10  ;;  %v633_v15 = vsel %vm524_vm2, %v1691_v11, 0.0 }
 0x243   :  { %634 = vadd.xlane.f32.xlu0 %v633_v15  ;;  %v569_v17 = vpop.xlane.xlu0 %568  ;;  %631 = vadd.xlane.f32.xlu1 %v630_v16  ;;  %v566_v19 = vpop.xlane.xlu1 %565 }
 0x244   :  { %1348 = vpow2.f32 %v611_v12  ;;  %v587_v14 = vsub.f32 %v1645_v20, %v569_v17  ;;  %v586_v18 = vsub.f32 %v1651_v24, %v566_v19  ;;  %1310 = vmatpush3.bf16.msra.mxu1 %v1770_v55 }
 0x245   :  { %v1699_v21 = vpop.eup %1336  ;;  %1350 = vpow2.f32 %v613_v13  ;;  %1303 = vmatprep.subr.bf16.mxu1 %v1780_v59 }
 0x246   :  { %v1701_v22 = vpop.eup %1338  ;;  %v617_v23 = vmul.f32 1.442695, %v587_v14  ;;  %v615_v26 = vmul.f32 1.442695, %v586_v18  ;;  %v639_v27 = vsel %vm524_vm2, %v1699_v21, 0.0 }
 0x247   :  { %640 = vadd.xlane.f32.xlu0 %v639_v27  ;;  %v636_v28 = vsel %vm524_vm2, %v1701_v22, 0.0  ;;  %v572_v29 = vpop.xlane.xlu1 %571 }
 0x248   :  { %1352 = vpow2.f32 %v617_v23  ;;  %637 = vadd.xlane.f32.xlu1 %v636_v28  ;;  %v588_v20 = vsub.f32 %v1653_v25, %v572_v29  ;;  %1311 = vmatpush3.bf16.msra.mxu1 %v1780_v59 }
 0x249   :  { %v1708_v24 = vpop.eup %1340  ;;  %1354 = vpow2.f32 %v615_v26  ;;  %1304 = vmatprep.subr.bf16.mxu1 %v1790_v63 }
 0x24a   :  { %v1710_v30 = vpop.eup %1342  ;;  %v619_v31 = vmul.f32 1.442695, %v588_v20  ;;  %v642_v32 = vsel %vm524_vm2, %v1708_v24, 0.0 }
 0x24b   :  { %v645_v33 = vsel %vm524_vm2, %v1710_v30, 0.0 }
 0x24c   :  { %1356 = vpow2.f32 %v619_v31  ;;  %646 = vadd.xlane.f32.xlu0 %v645_v33  ;;  %643 = vadd.xlane.f32.xlu1 %v642_v32 }
 0x24d   :  { %v1716_v34 = vpop.eup %1344  ;;  %1312 = vmatpush3.bf16.msra.mxu1 %v1790_v63 }
 0x24e   :  { %v1718_v35 = vpop.eup %1346  ;;  %v651_v25 = vsel %vm524_vm2, %v1716_v34, 0.0 }
 0x24f   :  { %v648_v36 = vsel %vm524_vm2, %v1718_v35, 0.0 }
 0x250   :  { %652 = vadd.xlane.f32.xlu0 %v651_v25  ;;  %649 = vadd.xlane.f32.xlu1 %v648_v36 }
 0x251   :  { %v1724_v37 = vpop.eup %1348 }
 0x252   :  { %v1726_v38 = vpop.eup %1350  ;;  %v654_v39 = vsel %vm524_vm2, %v1724_v37, 0.0 }
 0x253   :  { %v657_v41 = vsel %vm524_vm2, %v1726_v38, 0.0 }
 0x254   :  { %658 = vadd.xlane.f32.xlu0 %v657_v41  ;;  %655 = vadd.xlane.f32.xlu1 %v654_v39 }
 0x255   :  { %v1732_v42 = vpop.eup %1352 }
 0x256   :  { %v1734_v43 = vpop.eup %1354  ;;  %v663_v44 = vsel %vm524_vm2, %v1732_v42, 0.0 }
 0x257   :  { %v660_v45 = vsel %vm524_vm2, %v1734_v43, 0.0 }
 0x258   :  { %664 = vadd.xlane.f32.xlu0 %v663_v44  ;;  %661 = vadd.xlane.f32.xlu1 %v660_v45 }
 0x259   :  { %v1740_v46 = vpop.eup %1356 }
 0x25a   :  { %v666_v47 = vsel %vm524_vm2, %v1740_v46, 0.0 }
 0x25c   :  { %667 = vadd.xlane.f32.xlu1 %v666_v47 }
 0x2c4   :  { %v623_v0 = vpop.xlane.xlu0 %622 }
 0x2c5   :  { %1358 = vrcp.f32 %v623_v0 }
 0x2c8   :  { %v629_v2 = vpop.xlane.xlu0 %628  ;;  %v626_v3 = vpop.xlane.xlu1 %625 }
 0x2c9   :  { %1360 = vrcp.f32 %v626_v3  ;;  %v1098_v3 = vld [vmem:[%s1929_s2] sm:$0xff]  }
 0x2ca   :  { %1362 = vrcp.f32 %v629_v2 }
 0x2cc   :  { %v635_v4 = vpop.xlane.xlu0 %634  ;;  %v632_v5 = vpop.xlane.xlu1 %631 }
 0x2cd   :  { %1364 = vrcp.f32 %v632_v5 }
 0x2ce   :  { %1366 = vrcp.f32 %v635_v4  ;;  %v1143_v4 = vld [vmem:[%s1929_s2 + $0x8] sm:$0xff]  }
 0x2d0   :  { %v641_v7 = vpop.xlane.xlu0 %640 }
 0x2d1   :  { %v638_v9 = vpop.xlane.xlu1 %637 }
 0x2d2   :  { %1368 = vrcp.f32 %v638_v9  ;;  %v1359_v8 = vpop.eup %1358  ;;  %v1099_v9 = vunpack.c.l.bf16 %v1098_v3 }
 0x2d3   :  { %1370 = vrcp.f32 %v641_v7  ;;  %v685_v15 = vmul.f32 %v1359_v8, %v1673_v56  ;;  %v1104_v7 = vunpack.c.h.bf16 %v1143_v4  ;;  %v1100_v8 = vunpack.c.h.bf16 %v1098_v3 }
 0x2d5   :  { %v647_v10 = vpop.xlane.xlu0 %646  ;;  %v644_v12 = vpop.xlane.xlu1 %643 }
 0x2d6   :  { %v1361_v13 = vpop.eup %1360  ;;  %1372 = vrcp.f32 %v644_v12 }
 0x2d7   :  { %v686_v16 = vmul.f32 %v1361_v13, %v1681_v1  ;;  %v1363_v17 = vpop.eup %1362  ;;  %1374 = vrcp.f32 %v647_v10  ;;  %v1103_v10 = vunpack.c.l.bf16 %v1143_v4 }
 0x2d8   :  { %v687_v26 = vmul.f32 %v1363_v17, %v1677_v60 }
 0x2d9   :  { %v653_v19 = vpop.xlane.xlu0 %652  ;;  %v650_v14 = vpop.xlane.xlu1 %649  ;;  %v701_v18 = vpack.c.bf16 %v686_v16, %v685_v15 }
 0x2da   :  { %v1365_v23 = vpop.eup %1364  ;;  %1376 = vrcp.f32 %v650_v14 }
 0x2db   :  { %v688_v27 = vmul.f32 %v1365_v23, %v1687_v6  ;;  %1252 = vmatprep.mubr.msk.bf16.mxu0 %vm524_vm2, %v701_v18  ;;  %v1367_v28 = vpop.eup %1366  ;;  %1378 = vrcp.f32 %v653_v19  ;;  %v1144_v23 = vld [vmem:[%s1929_s2 + $0x10] sm:$0xff]  }
 0x2dc   :  { %v689_v1 = vmul.f32 %v1367_v28, %v1691_v11 }
 0x2dd   :  { %v659_v29 = vpop.xlane.xlu0 %658  ;;  %v656_v20 = vpop.xlane.xlu1 %655  ;;  %v702_v56 = vpack.c.bf16 %v688_v27, %v687_v26  ;;  %v1145_v27 = vld [vmem:[%s1929_s2 + $0x18] sm:$0xff]  }
 0x2de   :  { %1380 = vrcp.f32 %v656_v20  ;;  %v1107_v20 = vunpack.c.l.bf16 %v1144_v23 }
 0x2df   :  { %v1369_v31 = vpop.eup %1368  ;;  %1253 = vmatmul.mubr.msk.bf16.vlgmr.msra.gmra.mxu0 %vm524_vm2, %v702_v56  ;;  %1382 = vrcp.f32 %v659_v29  ;;  %v1112_v29 = vunpack.c.h.bf16 %v1145_v27  ;;  %v1108_v56 = vunpack.c.h.bf16 %v1144_v23 }
 0x2e0   :  { %v690_v32 = vmul.f32 %v1369_v31, %v1701_v22  ;;  %1269 = vmatpush3.bf16.msra.mxu0 %v1753_v50  ;;  %v1371_v6 = vpop.eup %1370  ;;  %v1111_v31 = vunpack.c.l.bf16 %v1145_v27 }
 0x2e1   :  { %v665_v33 = vpop.xlane.xlu0 %664  ;;  %v662_v60 = vpop.xlane.xlu1 %661  ;;  %1270 = vmatprep.subr.bf16.mxu0 %v1759_v52  ;;  %v691_v41 = vmul.f32 %v1371_v6, %v1699_v21 }
 0x2e2   :  { %v703_v25 = vpack.c.bf16 %v690_v32, %v689_v1  ;;  %1384 = vrcp.f32 %v662_v60 }
 0x2e3   :  { %v1373_v36 = vpop.eup %1372  ;;  %1386 = vrcp.f32 %v665_v33 }
 0x2e4   :  { %1256 = vmatprep.mubr.msk.bf16.mxu0 %vm524_vm2, %v703_v25  ;;  %v692_v11 = vmul.f32 %v1373_v36, %v1708_v24  ;;  %1271 = vmatpush3.bf16.msra.mxu0 %v1759_v52  ;;  %v1375_v22 = vpop.eup %1374 }
 0x2e5   :  { %v668_v39 = vpop.xlane.xlu1 %667  ;;  %1272 = vmatprep.subr.bf16.mxu0 %v1770_v55  ;;  %v693_v47 = vmul.f32 %v1375_v22, %v1710_v30 }
 0x2e6   :  { %1388 = vrcp.f32 %v668_v39  ;;  %v704_v44 = vpack.c.bf16 %v692_v11, %v691_v41  ;;  %v1146_v39 = vld [vmem:[%s1929_s2 + $0x20] sm:$0xff]   ;;  %v1147_v11 = vld [vmem:[%s1929_s2 + $0x28] sm:$0xff]  }
 0x2e7   :  { %v1377_v45 = vpop.eup %1376 }
 0x2e8   :  { %1257 = vmatmul.mubr.msk.bf16.gmra.mxu0 %vm524_vm2, %v704_v44  ;;  %v694_v48 = vmul.f32 %v1377_v45, %v1718_v35  ;;  %v1379_v40 = vpop.eup %1378  ;;  %v1120_v45 = vunpack.c.h.bf16 %v1147_v11 }
 0x2e9   :  { %1273 = vmatpush3.bf16.msra.mxu0 %v1770_v55  ;;  %v695_v49 = vmul.f32 %v1379_v40, %v1716_v34  ;;  %v1119_v40 = vunpack.c.l.bf16 %v1147_v11 }
 0x2ea   :  { %v705_v21 = vpack.c.bf16 %v694_v48, %v693_v47  ;;  %1274 = vmatprep.subr.bf16.mxu0 %v1780_v59  ;;  %v1115_v47 = vunpack.c.l.bf16 %v1146_v39  ;;  %v1116_v48 = vunpack.c.h.bf16 %v1146_v39 }
 0x2eb   :  { %v1381_v24 = vpop.eup %1380 }
 0x2ec   :  { %1260 = vmatprep.mubr.msk.bf16.mxu0 %vm524_vm2, %v705_v21  ;;  %v696_v50 = vmul.f32 %v1381_v24, %v1724_v37  ;;  %v1383_v51 = vpop.eup %1382 }
 0x2ed   :  { %1275 = vmatpush3.bf16.msra.mxu0 %v1780_v59  ;;  %v697_v53 = vmul.f32 %v1383_v51, %v1726_v38  ;;  %v863_v59 = vld [vmem:[%s1928_s8 + $0x20] sm:$0xff]  ;;  %v864_v38 = vld [vmem:[%s1928_s8 + $0x28] sm:$0xff] }
 0x2ee   :  { %v706_v52 = vpack.c.bf16 %v696_v50, %v695_v49  ;;  %1276 = vmatprep.subr.bf16.mxu0 %v1790_v63 }
 0x2ef   :  { %v1385_v30 = vpop.eup %1384 }
 0x2f0   :  { %v1387_v35 = vpop.eup %1386  ;;  %1261 = vmatmul.mubr.msk.bf16.gmra.mxu0 %vm524_vm2, %v706_v52  ;;  %v698_v54 = vmul.f32 %v1385_v30, %v1734_v43  ;;  %v877_v43 = vpack.c.bf16 %v864_v38, %v863_v59 }
 0x2f1   :  { %1277 = vmatpush3.bf16.msra.mxu0 %v1790_v63  ;;  %v699_v37 = vmul.f32 %v1387_v35, %v1732_v42  ;;  %v861_v42 = vld [vmem:[%s1928_s8 + $0x10] sm:$0xff]  ;;  %v860_v63 = vld [vmem:[%s1928_s8 + $0x8] sm:$0xff] }
 0x2f2   :  { %v707_v34 = vpack.c.bf16 %v698_v54, %v697_v53  ;;  %1278 = vmatprep.subr.bf16.mxu0 %v877_v43  ;;  %1305 = vmatprep.subr.bf16.mxu1 %v877_v43  ;;  %v875_v0 = vpack.c.bf16 %v860_v63, %v859_v62  ;;  %v1148_v35 = vld [vmem:[%s1929_s2 + $0x30] sm:$0xff]   ;;  %v1149_v54 = vld [vmem:[%s1929_s2 + $0x38] sm:$0xff]  }
 0x2f3   :  { %v1389_v55 = vpop.eup %1388  ;;  %1313 = vmatpush3.bf16.msra.mxu1 %v877_v43  ;;  %v1127_v59 = vunpack.c.l.bf16 %v1149_v54 }
 0x2f4   :  { %v700_v57 = vmul.f32 %v1389_v55, %v1740_v46  ;;  %1264 = vmatprep.mubr.msk.bf16.mxu0 %vm524_vm2, %v707_v34  ;;  %v862_v46 = vld [vmem:[%s1928_s8 + $0x18] sm:$0xff] }
 0x2f5   :  { %1279 = vmatpush3.bf16.msra.mxu0 %v877_v43  ;;  %v876_v61 = vpack.c.bf16 %v862_v46, %v861_v42 }
 0x2f6   :  { %v708_v58 = vpack.c.bf16 %v700_v57, %v699_v37  ;;  %v1128_v37 = vunpack.c.h.bf16 %v1149_v54  ;;  %v1123_v57 = vunpack.c.l.bf16 %v1148_v35 }
 0x2f7   :  { %1280 = vmatprep.subr.bf16.mxu0 %v876_v61  ;;  %1306 = vmatprep.subr.bf16.mxu1 %v876_v61 }
 0x2f8   :  { %1265 = vmatmul.mubr.msk.bf16.gmra.mxu0 %vm524_vm2, %v708_v58  ;;  %1314 = vmatpush3.bf16.msra.mxu1 %v876_v61  ;;  %v1124_v58 = vunpack.c.h.bf16 %v1148_v35 }
 0x2f9   :  { %1281 = vmatpush3.bf16.msra.mxu0 %v876_v61  ;;  %1307 = vmatprep.subr.bf16.mxu1 %v875_v0 }
 0x2fa   :  { %1282 = vmatprep.subr.bf16.mxu0 %v875_v0 }
 0x2fc   :  { %1315 = vmatpush3.bf16.msra.mxu1 %v875_v0 }
 0x2fd   :  { %1283 = vmatpush3.bf16.msra.mxu0 %v875_v0 }
 0x39f   :  { %v1254_v2 = vpop.f32.mrf.mxu0 }
 0x3a0   :  { %v837_v19 = vmul.f32 %v1254_v2, %v1103_v10  ;;  %v1032_v2 = vld [vmem:[%s1930_s9] ss:$0 sm:$0xff] }
 0x3a1   :  { %v772_v5 = vpop.f32.mrf.mxu0 }
 0x3a2   :  { %v835_v16 = vmul.f32 %v1099_v9, %v772_v5 }
 0x3a3   :  { %v1255_v12 = vpop.f32.mrf.mxu0 }
 0x3a4   :  { %v838_v13 = vmul.f32 %v1255_v12, %v1104_v7 }
 0x3a5   :  { %v775_v15 = vpop.f32.mrf.mxu0 }
 0x3a6   :  { %v836_v17 = vmul.f32 %v1100_v8, %v775_v15  ;;  %v852_v26 = vpack.c.bf16 %v838_v13, %v837_v19 }
 0x3a8   :  { %v851_v14 = vpack.c.bf16 %v836_v17, %v835_v16  ;;  %v1258_v18 = vpop.f32.mrf.mxu0 }
 0x3a9   :  { %v841_v25 = vmul.f32 %v1258_v18, %v1111_v31 }
 0x3aa   :  { %v788_v28 = vpop.f32.mrf.mxu0  ;;  %1284 = vmatprep.mubr.bf16.mxu0 %v851_v14 }
 0x3ab   :  { %1285 = vmatmul.mubr.bf16.vlgmr.msra.gmra.mxu0 %v852_v26  ;;  %v839_v60 = vmul.f32 %v1107_v20, %v788_v28 }
 0x3ac   :  { %v1259_v1 = vpop.f32.mrf.mxu0 }
 0x3ad   :  { %v842_v32 = vmul.f32 %v1259_v1, %v1112_v29 }
 0x3ae   :  { %v791_v33 = vpop.f32.mrf.mxu0 }
 0x3af   :  { %v840_v6 = vmul.f32 %v1108_v56, %v791_v33  ;;  %v854_v22 = vpack.c.bf16 %v842_v32, %v841_v25 }
 0x3b0   :  { %v1262_v36 = vpop.f32.mrf.mxu0 }
 0x3b1   :  { %v853_v41 = vpack.c.bf16 %v840_v6, %v839_v60  ;;  %v845_v52 = vmul.f32 %v1262_v36, %v1119_v40 }
 0x3b2   :  { %v804_v44 = vpop.f32.mrf.mxu0 }
 0x3b3   :  { %1288 = vmatprep.mubr.bf16.mxu1 %v853_v41  ;;  %v843_v50 = vmul.f32 %v1115_v47, %v804_v44 }
 0x3b4   :  { %v1263_v21 = vpop.f32.mrf.mxu0  ;;  %1289 = vmatmul.mubr.bf16.vlgmr.msra.gmra.mxu1 %v854_v22 }
 0x3b5   :  { %v846_v24 = vmul.f32 %v1263_v21, %v1120_v45 }
 0x3b6   :  { %v807_v49 = vpop.f32.mrf.mxu0 }
 0x3b7   :  { %v844_v51 = vmul.f32 %v1116_v48, %v807_v49  ;;  %v856_v55 = vpack.c.bf16 %v846_v24, %v845_v52 }
 0x3b8   :  { %v1266_v30 = vpop.f32.mrf.mxu0 }
 0x3b9   :  { %v855_v53 = vpack.c.bf16 %v844_v51, %v843_v50  ;;  %v849_v62 = vmul.f32 %v1266_v30, %v1127_v59 }
 0x3ba   :  { %v820_v34 = vpop.f32.mrf.mxu0 }
 0x3bb   :  { %1292 = vmatprep.mubr.bf16.mxu1 %v855_v53  ;;  %v847_v46 = vmul.f32 %v1123_v57, %v820_v34 }
 0x3bc   :  { %v1267_v38 = vpop.f32.mrf.mxu0  ;;  %1293 = vmatmul.mubr.bf16.gmra.mxu1 %v856_v55 }
 0x3bd   :  { %v850_v43 = vmul.f32 %v1267_v38, %v1128_v37 }
 0x3be   :  { %v823_v42 = vpop.f32.mrf.mxu0 }
 0x3bf   :  { %v848_v61 = vmul.f32 %v1124_v58, %v823_v42  ;;  %v858_v0 = vpack.c.bf16 %v850_v43, %v849_v62 }
 0x3c1   :  { %v857_v63 = vpack.c.bf16 %v848_v61, %v847_v46 }
 0x3c3   :  { %1296 = vmatprep.mubr.bf16.mxu1 %v857_v63 }
 0x3c4   :  { %1297 = vmatmul.mubr.bf16.gmra.mxu1 %v858_v0 }
 0x46b   :  { %v1286_v3 = vpop.f32.mrf.mxu0 }
 0x46c   :  { %v933_v4 = vadd.f32 %v1286_v3, %v1032_v2 }
 0x46d   :  { %v924_v5 = vpop.f32.mrf.mxu0 }
 0x46e   :  { %989 = vst [vmem:[%s1931_s10 + $0x10] sm:$0xff] %v933_v4  ;;  %v925_v7 = vadd.f32 %v1032_v2, %v924_v5 }
 0x46f   :  { %v1287_v9 = vpop.f32.mrf.mxu0 }
 0x470   :  { %987 = vst [vmem:[%s1931_s10] sm:$0xff] %v925_v7  ;;  %v936_v8 = vadd.f32 %v1287_v9, %v1032_v2 }
 0x471   :  { %v927_v10 = vpop.f32.mrf.mxu0 }
 0x472   :  { %990 = vst [vmem:[%s1931_s10 + $0x18] sm:$0xff] %v936_v8  ;;  %v928_v12 = vadd.f32 %v1032_v2, %v927_v10 }
 0x474   :  { %988 = vst [vmem:[%s1931_s10 + $0x8] sm:$0xff] %v928_v12  ;;  %v1290_v13 = vpop.f32.mrf.mxu1 }
 0x475   :  { %v949_v15 = vadd.f32 %v1290_v13, %v1032_v2 }
 0x476   :  { %v940_v16 = vpop.f32.mrf.mxu1 }
 0x477   :  { %993 = vst [vmem:[%s1931_s10 + $0x30] sm:$0xff] %v949_v15  ;;  %v941_v17 = vadd.f32 %v1032_v2, %v940_v16 }
 0x478   :  { %v1291_v19 = vpop.f32.mrf.mxu1 }
 0x479   :  { %991 = vst [vmem:[%s1931_s10 + $0x20] sm:$0xff] %v941_v17  ;;  %v952_v14 = vadd.f32 %v1291_v19, %v1032_v2 }
 0x47a   :  { %v943_v18 = vpop.f32.mrf.mxu1 }
 0x47b   :  { %994 = vst [vmem:[%s1931_s10 + $0x38] sm:$0xff] %v952_v14  ;;  %v944_v23 = vadd.f32 %v1032_v2, %v943_v18 }
 0x47c   :  { %v1294_v26 = vpop.f32.mrf.mxu1 }
 0x47d   :  { %992 = vst [vmem:[%s1931_s10 + $0x28] sm:$0xff] %v944_v23  ;;  %v965_v27 = vadd.f32 %v1294_v26, %v1032_v2 }
 0x47e   :  { %v956_v28 = vpop.f32.mrf.mxu1 }
 0x47f   :  { %997 = vst [vmem:[%s1931_s10 + $0x50] sm:$0xff] %v965_v27  ;;  %v957_v29 = vadd.f32 %v1032_v2, %v956_v28 }
 0x480   :  { %v1295_v20 = vpop.f32.mrf.mxu1 }
 0x481   :  { %995 = vst [vmem:[%s1931_s10 + $0x40] sm:$0xff] %v957_v29  ;;  %v968_v56 = vadd.f32 %v1295_v20, %v1032_v2 }
 0x482   :  { %v959_v31 = vpop.f32.mrf.mxu1 }
 0x483   :  { %998 = vst [vmem:[%s1931_s10 + $0x58] sm:$0xff] %v968_v56  ;;  %v960_v1 = vadd.f32 %v1032_v2, %v959_v31 }
 0x484   :  { %v1298_v32 = vpop.f32.mrf.mxu1 }
 0x485   :  { %996 = vst [vmem:[%s1931_s10 + $0x48] sm:$0xff] %v960_v1  ;;  %v981_v33 = vadd.f32 %v1298_v32, %v1032_v2 }
 0x486   :  { %v972_v60 = vpop.f32.mrf.mxu1 }
 0x487   :  { %1001 = vst [vmem:[%s1931_s10 + $0x70] sm:$0xff] %v981_v33  ;;  %v973_v6 = vadd.f32 %v1032_v2, %v972_v60 }
 0x488   :  { %v1299_v25 = vpop.f32.mrf.mxu1 }
 0x489   :  { %999 = vst [vmem:[%s1931_s10 + $0x60] sm:$0xff] %v973_v6  ;;  %v984_v36 = vadd.f32 %v1299_v25, %v1032_v2 }
 0x48a   :  { %v975_v39 = vpop.f32.mrf.mxu1 }
 0x48b   :  { %1002 = vst [vmem:[%s1931_s10 + $0x78] sm:$0xff] %v984_v36  ;;  %v976_v41 = vadd.f32 %v1032_v2, %v975_v39 }
 0x48d   :  { %1000 = vst [vmem:[%s1931_s10 + $0x68] sm:$0xff] %v976_v41 }

// kernel: _lambda_.13
= control target key start
LH: loop header
LB: loop body
LE: loop exit
PB: predicated region body
PF: predicated region fallthrough
CT: control target
= control target key end

     0   :  { %s1755_s0 = inlined_call_operand.vmem [shape: f32[128,128], index: 0, kind: input, shape index: {}]   ;;  %s1756_s3 = inlined_call_operand.vmem [shape: f32[128,128], index: 3, kind: input, shape index: {}]   ;;  %s1757_s5 = inlined_call_operand.vmem [shape: f32[128,128], index: 5, kind: input, shape index: {}]   ;;  %s1758_s1 = inlined_call_operand.vmem [shape: f32[1,128], index: 1, kind: input, shape index: {}]   ;;  %s1759_s2 = inlined_call_operand.vmem [shape: f32[1,128], index: 2, kind: input, shape index: {}]   ;;  %s1760_s4 = inlined_call_operand.vmem [shape: f32[1,128], index: 4, kind: input, shape index: {}]   ;;  %s1761_s6 = inlined_call_operand.vmem [shape: f32[1,128], index: 6, kind: input, shape index: {}]   ;;  %s1762_s7 = inlined_call_operand.vmem [shape: f32[1,128], index: 7, kind: input, shape index: {}]   ;;  %s1763_s8 = inlined_call_operand.vmem [shape: f32[1,128], index: 8, kind: input, shape index: {}]   ;;  %s1764_s9 = inlined_call_operand.vmem [shape: f32[128,128], index: 9, kind: output, shape index: {}]  }
   0x1   :  { %v1116_v0 = vld [vmem:[%s1755_s0 + $0x10] sm:$0xff]  ;;  %v1121_v1 = vld [vmem:[%s1755_s0] sm:$0xff]  ;;  %v1128_v2 = vld [vmem:[%s1755_s0 + $0x18] sm:$0xff] }
   0x2   :  { %53 = vadd.xlane.f32.xlu1 %v1116_v0  ;;  %49 = vadd.xlane.f32.xlu0 %v1121_v1  ;;  %v1133_v3 = vld [vmem:[%s1755_s0 + $0x8] sm:$0xff]  ;;  %v97_v5 = vmul.f32 %v1121_v1, %v1121_v1  ;;  %v100_v6 = vmul.f32 %v1128_v2, %v1128_v2  ;;  %v99_v7 = vmul.f32 %v1116_v0, %v1116_v0  ;;  %v1153_v9 = vld [vmem:[%s1755_s0 + $0x20] sm:$0xff]  ;;  %v1160_v10 = vld [vmem:[%s1755_s0 + $0x38] sm:$0xff] }
   0x3   :  { %v98_v4 = vmul.f32 %v1133_v3, %v1133_v3  ;;  %v1148_v8 = vld [vmem:[%s1755_s0 + $0x28] sm:$0xff]  ;;  %v1165_v11 = vld [vmem:[%s1755_s0 + $0x30] sm:$0xff]  ;;  %v342_v13 = vld [vmem:[%s1756_s3 + $0x78] sm:$0xff]  ;;  %v101_v16 = vmul.f32 %v1153_v9, %v1153_v9  ;;  %v104_v20 = vmul.f32 %v1160_v10, %v1160_v10 }
   0x4   :  { %v341_v12 = vld [vmem:[%s1756_s3 + $0x70] sm:$0xff]  ;;  %v102_v15 = vmul.f32 %v1148_v8, %v1148_v8  ;;  %v339_v17 = vld [vmem:[%s1756_s3 + $0x60] sm:$0xff]  ;;  %v340_v18 = vld [vmem:[%s1756_s3 + $0x68] sm:$0xff]  ;;  %v103_v21 = vmul.f32 %v1165_v11, %v1165_v11 }
   0x5   :  { %v350_v14 = vpack.c.bf16 %v342_v13, %v341_v12  ;;  %v349_v19 = vpack.c.bf16 %v340_v18, %v339_v17  ;;  %v337_v22 = vld [vmem:[%s1756_s3 + $0x50] sm:$0xff]  ;;  %v338_v23 = vld [vmem:[%s1756_s3 + $0x58] sm:$0xff]  ;;  %v1198_v25 = vld [vmem:[%s1755_s0 + $0x48] sm:$0xff] }
   0x6   :  { %55 = vadd.xlane.f32.xlu1 %v1128_v2  ;;  %51 = vadd.xlane.f32.xlu0 %v1133_v3  ;;  %v348_v24 = vpack.c.bf16 %v338_v23, %v337_v22  ;;  %v1203_v26 = vld [vmem:[%s1755_s0 + $0x40] sm:$0xff]  ;;  %v336_v28 = vld [vmem:[%s1756_s3 + $0x48] sm:$0xff]  ;;  %v1216_v30 = vld [vmem:[%s1755_s0 + $0x58] sm:$0xff]  ;;  %v106_v35 = vmul.f32 %v1198_v25, %v1198_v25 }
   0x7   :  { %935 = vmatprep.subr.bf16.mxu0 %v350_v14  ;;  %v335_v27 = vld [vmem:[%s1756_s3 + $0x40] sm:$0xff]  ;;  %v1221_v31 = vld [vmem:[%s1755_s0 + $0x50] sm:$0xff]  ;;  %v334_v33 = vld [vmem:[%s1756_s3 + $0x38] sm:$0xff]  ;;  %v105_v36 = vmul.f32 %v1203_v26, %v1203_v26  ;;  %v108_v40 = vmul.f32 %v1216_v30, %v1216_v30 }
   0x8   :  { %936 = vmatpush3.bf16.msra.mxu0 %v350_v14  ;;  %v347_v29 = vpack.c.bf16 %v336_v28, %v335_v27  ;;  %v333_v32 = vld [vmem:[%s1756_s3 + $0x30] sm:$0xff]  ;;  %v331_v37 = vld [vmem:[%s1756_s3 + $0x20] sm:$0xff]  ;;  %v332_v38 = vld [vmem:[%s1756_s3 + $0x28] sm:$0xff]  ;;  %v107_v41 = vmul.f32 %v1221_v31, %v1221_v31 }
   0x9   :  { %937 = vmatprep.subr.bf16.mxu0 %v349_v19  ;;  %v346_v34 = vpack.c.bf16 %v334_v33, %v333_v32  ;;  %v345_v39 = vpack.c.bf16 %v332_v38, %v331_v37  ;;  %v329_v42 = vld [vmem:[%s1756_s3 + $0x10] sm:$0xff]  ;;  %v330_v43 = vld [vmem:[%s1756_s3 + $0x18] sm:$0xff]  ;;  %v1254_v45 = vld [vmem:[%s1755_s0 + $0x68] sm:$0xff] }
   0xa   :  { %115 = vadd.xlane.f32.xlu1 %v98_v4  ;;  %113 = vadd.xlane.f32.xlu0 %v97_v5  ;;  %v344_v44 = vpack.c.bf16 %v330_v43, %v329_v42  ;;  %v1259_v46 = vld [vmem:[%s1755_s0 + $0x60] sm:$0xff]  ;;  %v328_v48 = vld [vmem:[%s1756_s3 + $0x8] sm:$0xff]  ;;  %v1272_v50 = vld [vmem:[%s1755_s0 + $0x78] sm:$0xff]  ;;  %v110_v52 = vmul.f32 %v1254_v45, %v1254_v45 }
   0xb   :  { %v327_v47 = vld [vmem:[%s1756_s3] sm:$0xff]  ;;  %v1277_v51 = vld [vmem:[%s1755_s0 + $0x70] sm:$0xff]  ;;  %v109_v53 = vmul.f32 %v1259_v46, %v1259_v46  ;;  %v112_v54 = vmul.f32 %v1272_v50, %v1272_v50  ;;  %v494_v57 = vld [vmem:[%s1757_s5 + $0x78] sm:$0xff] }
   0xc   :  { %938 = vmatpush3.bf16.msra.mxu0 %v349_v19  ;;  %v343_v49 = vpack.c.bf16 %v328_v48, %v327_v47  ;;  %v111_v55 = vmul.f32 %v1277_v51, %v1277_v51  ;;  %v493_v56 = vld [vmem:[%s1757_s5 + $0x70] sm:$0xff]  ;;  %v491_v58 = vld [vmem:[%s1757_s5 + $0x60] sm:$0xff]  ;;  %v492_v60 = vld [vmem:[%s1757_s5 + $0x68] sm:$0xff] }
   0xd   :  { %939 = vmatprep.subr.bf16.mxu0 %v348_v24  ;;  %v502_v59 = vpack.c.bf16 %v494_v57, %v493_v56  ;;  %v501_v61 = vpack.c.bf16 %v492_v60, %v491_v58  ;;  %v489_v62 = vld [vmem:[%s1757_s5 + $0x50] sm:$0xff]  ;;  %v490_v63 = vld [vmem:[%s1757_s5 + $0x58] sm:$0xff]  ;;  %v487_v5 = vld [vmem:[%s1757_s5 + $0x40] sm:$0xff] }
   0xe   :  { %119 = vadd.xlane.f32.xlu1 %v100_v6  ;;  %117 = vadd.xlane.f32.xlu0 %v99_v7  ;;  %v500_v4 = vpack.c.bf16 %v490_v63, %v489_v62  ;;  %v488_v6 = vld [vmem:[%s1757_s5 + $0x48] sm:$0xff]  ;;  %v485_v12 = vld [vmem:[%s1757_s5 + $0x30] sm:$0xff]  ;;  %v486_v13 = vld [vmem:[%s1757_s5 + $0x38] sm:$0xff] }
   0xf   :  { %967 = vmatprep.subr.bf16.mxu1 %v502_v59  ;;  %v499_v7 = vpack.c.bf16 %v488_v6, %v487_v5  ;;  %v498_v14 = vpack.c.bf16 %v486_v13, %v485_v12 }
  0x10   :  { %940 = vmatpush3.bf16.msra.mxu0 %v348_v24  ;;  %968 = vmatpush3.bf16.msra.mxu1 %v502_v59 }
  0x11   :  { %941 = vmatprep.subr.bf16.mxu0 %v347_v29  ;;  %969 = vmatprep.subr.bf16.mxu1 %v501_v61 }
  0x12   :  { %59 = vadd.xlane.f32.xlu1 %v1148_v8  ;;  %57 = vadd.xlane.f32.xlu0 %v1153_v9 }
  0x14   :  { %942 = vmatpush3.bf16.msra.mxu0 %v347_v29  ;;  %970 = vmatpush3.bf16.msra.mxu1 %v501_v61 }
  0x15   :  { %943 = vmatprep.subr.bf16.mxu0 %v346_v34  ;;  %971 = vmatprep.subr.bf16.mxu1 %v500_v4 }
  0x16   :  { %63 = vadd.xlane.f32.xlu1 %v1160_v10  ;;  %61 = vadd.xlane.f32.xlu0 %v1165_v11 }
  0x18   :  { %944 = vmatpush3.bf16.msra.mxu0 %v346_v34  ;;  %972 = vmatpush3.bf16.msra.mxu1 %v500_v4 }
  0x19   :  { %945 = vmatprep.subr.bf16.mxu0 %v345_v39  ;;  %973 = vmatprep.subr.bf16.mxu1 %v499_v7 }
  0x1a   :  { %123 = vadd.xlane.f32.xlu1 %v102_v15  ;;  %121 = vadd.xlane.f32.xlu0 %v101_v16 }
  0x1c   :  { %946 = vmatpush3.bf16.msra.mxu0 %v345_v39  ;;  %974 = vmatpush3.bf16.msra.mxu1 %v499_v7 }
  0x1d   :  { %947 = vmatprep.subr.bf16.mxu0 %v344_v44  ;;  %975 = vmatprep.subr.bf16.mxu1 %v498_v14 }
  0x1e   :  { %127 = vadd.xlane.f32.xlu1 %v104_v20  ;;  %125 = vadd.xlane.f32.xlu0 %v103_v21 }
  0x20   :  { %948 = vmatpush3.bf16.msra.mxu0 %v344_v44  ;;  %976 = vmatpush3.bf16.msra.mxu1 %v498_v14 }
  0x21   :  { %949 = vmatprep.subr.bf16.mxu0 %v343_v49 }
  0x22   :  { %67 = vadd.xlane.f32.xlu1 %v1198_v25  ;;  %65 = vadd.xlane.f32.xlu0 %v1203_v26 }
  0x24   :  { %950 = vmatpush3.bf16.msra.mxu0 %v343_v49 }
  0x26   :  { %71 = vadd.xlane.f32.xlu1 %v1216_v30  ;;  %69 = vadd.xlane.f32.xlu0 %v1221_v31 }
  0x2a   :  { %131 = vadd.xlane.f32.xlu1 %v106_v35  ;;  %129 = vadd.xlane.f32.xlu0 %v105_v36 }
  0x2e   :  { %135 = vadd.xlane.f32.xlu1 %v108_v40  ;;  %133 = vadd.xlane.f32.xlu0 %v107_v41 }
  0x32   :  { %75 = vadd.xlane.f32.xlu1 %v1254_v45  ;;  %73 = vadd.xlane.f32.xlu0 %v1259_v46 }
  0x36   :  { %79 = vadd.xlane.f32.xlu1 %v1272_v50  ;;  %77 = vadd.xlane.f32.xlu0 %v1277_v51 }
  0x3a   :  { %139 = vadd.xlane.f32.xlu1 %v110_v52  ;;  %137 = vadd.xlane.f32.xlu0 %v109_v53 }
  0x3e   :  { %143 = vadd.xlane.f32.xlu1 %v112_v54  ;;  %141 = vadd.xlane.f32.xlu0 %v111_v55 }
  0x8b   :  { %v54_v15 = vpop.xlane.xlu1 %53  ;;  %v50_v16 = vpop.xlane.xlu0 %49 }
  0x8c   :  { %v1319_v19 = vmul.f32 0.03125, %v50_v16  ;;  %v1323_v21 = vmul.f32 0.03125, %v54_v15 }
  0x8e   :  { %v161_v27 = vmul.f32 %v1319_v19, %v1319_v19  ;;  %v163_v35 = vmul.f32 %v1323_v21, %v1323_v21 }
  0x8f   :  { %v56_v17 = vpop.xlane.xlu1 %55  ;;  %v52_v18 = vpop.xlane.xlu0 %51 }
  0x90   :  { %v1321_v20 = vmul.f32 0.03125, %v52_v18  ;;  %v1325_v22 = vmul.f32 0.03125, %v56_v17 }
  0x92   :  { %v162_v28 = vmul.f32 %v1321_v20, %v1321_v20  ;;  %v164_v36 = vmul.f32 %v1325_v22, %v1325_v22 }
  0x93   :  { %v116_v23 = vpop.xlane.xlu1 %115  ;;  %v114_v24 = vpop.xlane.xlu0 %113 }
  0x94   :  { %v146_v29 = vmul.f32 0.03125, %v116_v23  ;;  %v145_v32 = vmul.f32 0.03125, %v114_v24 }
  0x96   :  { %v178_v33 = vsub.f32 %v146_v29, %v162_v28  ;;  %v177_v34 = vsub.f32 %v145_v32, %v161_v27  ;;  %v209_v32 = vsub.f32 %v1121_v1, %v1319_v19 }
  0x97   :  { %v120_v37 = vpop.xlane.xlu1 %119  ;;  %v118_v38 = vpop.xlane.xlu0 %117 }
  0x98   :  { %v194_v39 = vmax.f32 %v178_v33, 0.0  ;;  %v193_v40 = vmax.f32 %v177_v34, 0.0  ;;  %v148_v41 = vmul.f32 0.03125, %v120_v37  ;;  %v147_v42 = vmul.f32 0.03125, %v118_v38 }
  0x99   :  { %v210_v33 = vsub.f32 %v1133_v3, %v1321_v20  ;;  %v1363_v3 = vld [vmem:[%s1759_s2] ss:$0 sm:$0xff] }
  0x9a   :  { %v226_v43 = vadd.f32 1e-05, %v194_v39  ;;  %v225_v44 = vadd.f32 1e-05, %v193_v40  ;;  %v180_v47 = vsub.f32 %v148_v41, %v164_v36  ;;  %v179_v48 = vsub.f32 %v147_v42, %v163_v35  ;;  %v1358_v39 = vld [vmem:[%s1758_s1] ss:$0 sm:$0xff] }
  0x9b   :  { %v60_v49 = vpop.xlane.xlu1 %59  ;;  %v58_v52 = vpop.xlane.xlu0 %57 }
  0x9c   :  { %999 = vrsqrt.f32 %v226_v43  ;;  %v196_v53 = vmax.f32 %v180_v47, 0.0  ;;  %v195_v54 = vmax.f32 %v179_v48, 0.0  ;;  %v1335_v59 = vmul.f32 0.03125, %v60_v49 }
  0x9d   :  { %1001 = vrsqrt.f32 %v225_v44  ;;  %v1337_v60 = vmul.f32 0.03125, %v58_v52  ;;  %v211_v49 = vsub.f32 %v1116_v0, %v1323_v21 }
  0x9e   :  { %v228_v55 = vadd.f32 1e-05, %v196_v53  ;;  %v227_v56 = vadd.f32 1e-05, %v195_v54  ;;  %v166_v5 = vmul.f32 %v1335_v59, %v1335_v59  ;;  %v212_v54 = vsub.f32 %v1128_v2, %v1325_v22 }
  0x9f   :  { %v64_v57 = vpop.xlane.xlu1 %63  ;;  %v62_v58 = vpop.xlane.xlu0 %61  ;;  %v165_v6 = vmul.f32 %v1337_v60, %v1337_v60 }
  0xa0   :  { %1003 = vrsqrt.f32 %v228_v55  ;;  %v1339_v61 = vmul.f32 0.03125, %v64_v57  ;;  %v1341_v62 = vmul.f32 0.03125, %v62_v58 }
  0xa1   :  { %1005 = vrsqrt.f32 %v227_v56 }
  0xa2   :  { %v168_v15 = vmul.f32 %v1339_v61, %v1339_v61  ;;  %v167_v16 = vmul.f32 %v1341_v62, %v1341_v62 }
  0xa3   :  { %v124_v63 = vpop.xlane.xlu1 %123  ;;  %v122_v4 = vpop.xlane.xlu0 %121 }
  0xa4   :  { %v150_v7 = vmul.f32 0.03125, %v124_v63  ;;  %v149_v12 = vmul.f32 0.03125, %v122_v4 }
  0xa6   :  { %v182_v13 = vsub.f32 %v150_v7, %v166_v5  ;;  %v181_v14 = vsub.f32 %v149_v12, %v165_v6 }
  0xa7   :  { %v128_v17 = vpop.xlane.xlu1 %127  ;;  %v126_v18 = vpop.xlane.xlu0 %125 }
  0xa8   :  { %v198_v23 = vmax.f32 %v182_v13, 0.0  ;;  %v197_v24 = vmax.f32 %v181_v14, 0.0  ;;  %v152_v27 = vmul.f32 0.03125, %v128_v17  ;;  %v151_v28 = vmul.f32 0.03125, %v126_v18 }
  0xa9   :  { %v1000_v29 = vpop.eup %999 }
  0xaa   :  { %v1002_v34 = vpop.eup %1001  ;;  %v230_v35 = vadd.f32 1e-05, %v198_v23  ;;  %v229_v36 = vadd.f32 1e-05, %v197_v24  ;;  %v184_v37 = vsub.f32 %v152_v27, %v168_v15  ;;  %v183_v38 = vsub.f32 %v151_v28, %v167_v16 }
  0xab   :  { %v68_v40 = vpop.xlane.xlu1 %67  ;;  %v66_v41 = vpop.xlane.xlu0 %65  ;;  %v257_v42 = vmul.f32 %v1002_v34, %v209_v32  ;;  %v258_v43 = vmul.f32 %v1000_v29, %v210_v33 }
  0xac   :  { %1007 = vrsqrt.f32 %v230_v35  ;;  %v200_v44 = vmax.f32 %v184_v37, 0.0  ;;  %v199_v1 = vmax.f32 %v183_v38, 0.0  ;;  %v1373_v63 = vmul.f32 0.03125, %v68_v40 }
  0xad   :  { %v1004_v19 = vpop.eup %1003  ;;  %1009 = vrsqrt.f32 %v229_v36  ;;  %v280_v20 = vmul.f32 %v1358_v39, %v257_v42  ;;  %v281_v47 = vmul.f32 %v1358_v39, %v258_v43  ;;  %v1375_v4 = vmul.f32 0.03125, %v66_v41 }
  0xae   :  { %v1006_v48 = vpop.eup %1005  ;;  %v232_v52 = vadd.f32 1e-05, %v200_v44  ;;  %v231_v53 = vadd.f32 1e-05, %v199_v1  ;;  %v260_v0 = vmul.f32 %v1004_v19, %v212_v54  ;;  %v170_v14 = vmul.f32 %v1373_v63, %v1373_v63 }
  0xaf   :  { %v72_v55 = vpop.xlane.xlu1 %71  ;;  %v70_v56 = vpop.xlane.xlu0 %69  ;;  %v303_v57 = vadd.f32 %v1363_v3, %v280_v20  ;;  %v304_v58 = vadd.f32 %v1363_v3, %v281_v47  ;;  %v259_v5 = vmul.f32 %v1006_v48, %v211_v49  ;;  %v169_v15 = vmul.f32 %v1375_v4, %v1375_v4 }
  0xb0   :  { %1011 = vrsqrt.f32 %v232_v52  ;;  %v1377_v21 = vmul.f32 0.03125, %v72_v55  ;;  %v1379_v7 = vmul.f32 0.03125, %v70_v56  ;;  %v283_v13 = vmul.f32 %v1358_v39, %v260_v0 }
  0xb1   :  { %1013 = vrsqrt.f32 %v231_v53  ;;  %v319_v6 = vpack.c.bf16 %v304_v58, %v303_v57  ;;  %v282_v12 = vmul.f32 %v1358_v39, %v259_v5  ;;  %v214_v41 = vsub.f32 %v1148_v8, %v1335_v59 }
  0xb2   :  { %v306_v23 = vadd.f32 %v1363_v3, %v283_v13  ;;  %v172_v28 = vmul.f32 %v1377_v21, %v1377_v21  ;;  %v171_v29 = vmul.f32 %v1379_v7, %v1379_v7  ;;  %v213_v42 = vsub.f32 %v1153_v9, %v1337_v60 }
  0xb3   :  { %951 = vmatprep.mubr.bf16.mxu0 %v319_v6  ;;  %v132_v2 = vpop.xlane.xlu1 %131  ;;  %v130_v22 = vpop.xlane.xlu0 %129  ;;  %v305_v18 = vadd.f32 %v1363_v3, %v282_v12  ;;  %v215_v60 = vsub.f32 %v1165_v11, %v1341_v62  ;;  %v216_v58 = vsub.f32 %v1160_v10, %v1339_v61 }
  0xb4   :  { %v154_v16 = vmul.f32 0.03125, %v132_v2  ;;  %v153_v17 = vmul.f32 0.03125, %v130_v22 }
  0xb5   :  { %v320_v32 = vpack.c.bf16 %v306_v23, %v305_v18 }
  0xb6   :  { %v186_v24 = vsub.f32 %v154_v16, %v170_v14  ;;  %v185_v27 = vsub.f32 %v153_v17, %v169_v15 }
  0xb7   :  { %v136_v33 = vpop.xlane.xlu1 %135  ;;  %v134_v34 = vpop.xlane.xlu0 %133  ;;  %952 = vmatmul.mubr.bf16.vlgmr.msra.gmra.mxu0 %v320_v32 }
  0xb8   :  { %v202_v35 = vmax.f32 %v186_v24, 0.0  ;;  %v201_v36 = vmax.f32 %v185_v27, 0.0  ;;  %v156_v37 = vmul.f32 0.03125, %v136_v33  ;;  %v155_v38 = vmul.f32 0.03125, %v134_v34 }
  0xb9   :  { %v1008_v40 = vpop.eup %1007 }
  0xba   :  { %v1010_v43 = vpop.eup %1009  ;;  %v234_v44 = vadd.f32 1e-05, %v202_v35  ;;  %v233_v1 = vadd.f32 1e-05, %v201_v36  ;;  %v188_v19 = vsub.f32 %v156_v37, %v172_v28  ;;  %v187_v20 = vsub.f32 %v155_v38, %v171_v29 }
  0xbb   :  { %v76_v47 = vpop.xlane.xlu1 %75  ;;  %v74_v48 = vpop.xlane.xlu0 %73  ;;  %v261_v49 = vmul.f32 %v1010_v43, %v213_v42  ;;  %v262_v52 = vmul.f32 %v1008_v40, %v214_v41 }
  0xbc   :  { %1015 = vrsqrt.f32 %v234_v44  ;;  %v204_v53 = vmax.f32 %v188_v19, 0.0  ;;  %v203_v54 = vmax.f32 %v187_v20, 0.0  ;;  %v1405_v22 = vmul.f32 0.03125, %v76_v47 }
  0xbd   :  { %v1012_v55 = vpop.eup %1011  ;;  %1017 = vrsqrt.f32 %v233_v1  ;;  %v284_v8 = vmul.f32 %v1358_v39, %v261_v49  ;;  %v285_v59 = vmul.f32 %v1358_v39, %v262_v52  ;;  %v1407_v12 = vmul.f32 0.03125, %v74_v48 }
  0xbe   :  { %v1014_v9 = vpop.eup %1013  ;;  %v236_v56 = vadd.f32 1e-05, %v204_v53  ;;  %v235_v57 = vadd.f32 1e-05, %v203_v54  ;;  %v264_v11 = vmul.f32 %v1012_v55, %v216_v58  ;;  %v174_v18 = vmul.f32 %v1405_v22, %v1405_v22 }
  0xbf   :  { %v80_v5 = vpop.xlane.xlu1 %79  ;;  %v78_v6 = vpop.xlane.xlu0 %77  ;;  %v307_v0 = vadd.f32 %v1363_v3, %v284_v8  ;;  %v308_v2 = vadd.f32 %v1363_v3, %v285_v59  ;;  %v263_v13 = vmul.f32 %v1014_v9, %v215_v60  ;;  %v173_v23 = vmul.f32 %v1407_v12, %v1407_v12 }
  0xc0   :  { %1019 = vrsqrt.f32 %v236_v56  ;;  %v1409_v62 = vmul.f32 0.03125, %v80_v5  ;;  %v1411_v15 = vmul.f32 0.03125, %v78_v6  ;;  %v287_v17 = vmul.f32 %v1358_v39, %v264_v11 }
  0xc1   :  { %1021 = vrsqrt.f32 %v235_v57  ;;  %v321_v14 = vpack.c.bf16 %v308_v2, %v307_v0  ;;  %v286_v16 = vmul.f32 %v1358_v39, %v263_v13  ;;  %v218_v1 = vsub.f32 %v1198_v25, %v1373_v63 }
  0xc2   :  { %v310_v29 = vadd.f32 %v1363_v3, %v287_v17  ;;  %v176_v34 = vmul.f32 %v1409_v62, %v1409_v62  ;;  %v175_v35 = vmul.f32 %v1411_v15, %v1411_v15  ;;  %v217_v19 = vsub.f32 %v1203_v26, %v1375_v4 }
  0xc3   :  { %955 = vmatprep.mubr.bf16.mxu0 %v321_v14  ;;  %v140_v10 = vpop.xlane.xlu1 %139  ;;  %v138_v61 = vpop.xlane.xlu0 %137  ;;  %v309_v28 = vadd.f32 %v1363_v3, %v286_v16  ;;  %v220_v55 = vsub.f32 %v1216_v30, %v1377_v21  ;;  %v219_v25 = vsub.f32 %v1221_v31, %v1379_v7  ;;  %v222_v13 = vsub.f32 %v1254_v45, %v1405_v22 }
  0xc4   :  { %v158_v24 = vmul.f32 0.03125, %v140_v10  ;;  %v157_v27 = vmul.f32 0.03125, %v138_v61  ;;  %v221_v11 = vsub.f32 %v1259_v46, %v1407_v12  ;;  %v224_v17 = vsub.f32 %v1272_v50, %v1409_v62 }
  0xc5   :  { %v322_v36 = vpack.c.bf16 %v310_v29, %v309_v28 }
  0xc6   :  { %v190_v32 = vsub.f32 %v158_v24, %v174_v18  ;;  %v189_v33 = vsub.f32 %v157_v27, %v173_v23  ;;  %v223_v24 = vsub.f32 %v1277_v51, %v1411_v15  ;;  %v483_v15 = vld [vmem:[%s1757_s5 + $0x20] sm:$0xff] }
  0xc7   :  { %v144_v37 = vpop.xlane.xlu1 %143  ;;  %v142_v38 = vpop.xlane.xlu0 %141  ;;  %956 = vmatmul.mubr.bf16.gmra.mxu0 %v322_v36 }
  0xc8   :  { %v206_v40 = vmax.f32 %v190_v32, 0.0  ;;  %v205_v41 = vmax.f32 %v189_v33, 0.0  ;;  %v160_v42 = vmul.f32 0.03125, %v144_v37  ;;  %v159_v43 = vmul.f32 0.03125, %v142_v38  ;;  %v479_v37 = vld [vmem:[%s1757_s5] sm:$0xff]  ;;  %v480_v38 = vld [vmem:[%s1757_s5 + $0x8] sm:$0xff] }
  0xc9   :  { %v1016_v44 = vpop.eup %1015 }
  0xca   :  { %v1018_v20 = vpop.eup %1017  ;;  %v238_v47 = vadd.f32 1e-05, %v206_v40  ;;  %v237_v48 = vadd.f32 1e-05, %v205_v41  ;;  %v192_v49 = vsub.f32 %v160_v42, %v176_v34  ;;  %v191_v52 = vsub.f32 %v159_v43, %v175_v35  ;;  %v484_v34 = vld [vmem:[%s1757_s5 + $0x28] sm:$0xff] }
  0xcb   :  { %v265_v53 = vmul.f32 %v1018_v20, %v217_v19  ;;  %v266_v54 = vmul.f32 %v1016_v44, %v218_v1  ;;  %v497_v35 = vpack.c.bf16 %v484_v34, %v483_v15  ;;  %v495_v40 = vpack.c.bf16 %v480_v38, %v479_v37  ;;  %v899_v43 = vld [vmem:[%s1760_s4] ss:$0 sm:$0xff] }
  0xcc   :  { %1023 = vrsqrt.f32 %v238_v47  ;;  %v208_v8 = vmax.f32 %v192_v49, 0.0  ;;  %v207_v59 = vmax.f32 %v191_v52, 0.0 }
  0xcd   :  { %v1020_v9 = vpop.eup %1019  ;;  %1025 = vrsqrt.f32 %v237_v48  ;;  %v288_v26 = vmul.f32 %v1358_v39, %v265_v53  ;;  %v289_v63 = vmul.f32 %v1358_v39, %v266_v54  ;;  %977 = vmatprep.subr.bf16.mxu1 %v497_v35 }
  0xce   :  { %v1022_v4 = vpop.eup %1021  ;;  %v240_v60 = vadd.f32 1e-05, %v208_v8  ;;  %v239_v56 = vadd.f32 1e-05, %v207_v59  ;;  %v268_v57 = vmul.f32 %v1020_v9, %v220_v55  ;;  %978 = vmatpush3.bf16.msra.mxu1 %v497_v35  ;;  %v1481_v35 = vld [vmem:[%s1761_s6] ss:$0 sm:$0xff] }
  0xcf   :  { %v311_v58 = vadd.f32 %v1363_v3, %v288_v26  ;;  %v312_v30 = vadd.f32 %v1363_v3, %v289_v63  ;;  %v267_v21 = vmul.f32 %v1022_v4, %v219_v25 }
  0xd0   :  { %1027 = vrsqrt.f32 %v240_v60  ;;  %v291_v5 = vmul.f32 %v1358_v39, %v268_v57 }
  0xd1   :  { %1029 = vrsqrt.f32 %v239_v56  ;;  %v323_v6 = vpack.c.bf16 %v312_v30, %v311_v58  ;;  %v290_v31 = vmul.f32 %v1358_v39, %v267_v21 }
  0xd2   :  { %v314_v7 = vadd.f32 %v1363_v3, %v291_v5 }
  0xd3   :  { %959 = vmatprep.mubr.bf16.mxu0 %v323_v6  ;;  %v313_v0 = vadd.f32 %v1363_v3, %v290_v31 }
  0xd5   :  { %v324_v2 = vpack.c.bf16 %v314_v7, %v313_v0 }
  0xd7   :  { %960 = vmatmul.mubr.bf16.gmra.mxu0 %v324_v2 }
  0xd9   :  { %v1024_v14 = vpop.eup %1023 }
  0xda   :  { %v1026_v10 = vpop.eup %1025  ;;  %v270_v61 = vmul.f32 %v1024_v14, %v222_v13 }
  0xdb   :  { %v269_v16 = vmul.f32 %v1026_v10, %v221_v11 }
  0xdc   :  { %v293_v18 = vmul.f32 %v1358_v39, %v270_v61 }
  0xdd   :  { %v1028_v23 = vpop.eup %1027  ;;  %v292_v27 = vmul.f32 %v1358_v39, %v269_v16 }
  0xde   :  { %v1030_v28 = vpop.eup %1029  ;;  %v316_v45 = vadd.f32 %v1363_v3, %v293_v18  ;;  %v272_v22 = vmul.f32 %v1028_v23, %v224_v17 }
  0xdf   :  { %v315_v46 = vadd.f32 %v1363_v3, %v292_v27  ;;  %v271_v12 = vmul.f32 %v1030_v28, %v223_v24 }
  0xe0   :  { %v295_v29 = vmul.f32 %v1358_v39, %v272_v22 }
  0xe1   :  { %v325_v32 = vpack.c.bf16 %v316_v45, %v315_v46  ;;  %v294_v50 = vmul.f32 %v1358_v39, %v271_v12  ;;  %v481_v39 = vld [vmem:[%s1757_s5 + $0x10] sm:$0xff] }
  0xe2   :  { %v318_v62 = vadd.f32 %v1363_v3, %v295_v29 }
  0xe3   :  { %963 = vmatprep.mubr.bf16.mxu0 %v325_v32  ;;  %v317_v33 = vadd.f32 %v1363_v3, %v294_v50  ;;  %v482_v3 = vld [vmem:[%s1757_s5 + $0x18] sm:$0xff] }
  0xe4   :  { %v496_v36 = vpack.c.bf16 %v482_v3, %v481_v39 }
  0xe5   :  { %v326_v51 = vpack.c.bf16 %v318_v62, %v317_v33 }
  0xe6   :  { %979 = vmatprep.subr.bf16.mxu1 %v496_v36 }
  0xe7   :  { %964 = vmatmul.mubr.bf16.gmra.mxu0 %v326_v51  ;;  %980 = vmatpush3.bf16.msra.mxu1 %v496_v36 }
  0xe8   :  { %981 = vmatprep.subr.bf16.mxu1 %v495_v40 }
  0xeb   :  { %982 = vmatpush3.bf16.msra.mxu1 %v495_v40 }
 0x177   :  { %v953_v41 = vpop.f32.mrf.mxu0 }
 0x178   :  { %v401_v20 = vadd.f32 %v953_v41, %v899_v43 }
 0x179   :  { %v392_v42 = vpop.f32.mrf.mxu0 }
 0x17a   :  { %v393_v1 = vadd.f32 %v899_v43, %v392_v42  ;;  %v457_v54 = vmax.f32 %v401_v20, 0.0 }
 0x17b   :  { %v954_v44 = vpop.f32.mrf.mxu0 }
 0x17c   :  { %v404_v19 = vadd.f32 %v954_v44, %v899_v43  ;;  %v455_v52 = vmax.f32 %v393_v1, 0.0 }
 0x17d   :  { %v395_v47 = vpop.f32.mrf.mxu0 }
 0x17e   :  { %v396_v48 = vadd.f32 %v899_v43, %v395_v47  ;;  %v458_v49 = vmax.f32 %v404_v19, 0.0 }
 0x180   :  { %v456_v53 = vmax.f32 %v396_v48, 0.0  ;;  %v472_v8 = vpack.c.bf16 %v458_v49, %v457_v54 }
 0x182   :  { %v471_v55 = vpack.c.bf16 %v456_v53, %v455_v52 }
 0x184   :  { %983 = vmatprep.mubr.bf16.mxu1 %v471_v55 }
 0x185   :  { %984 = vmatmul.mubr.bf16.vlgmr.msra.gmra.mxu1 %v472_v8 }
 0x187   :  { %v957_v59 = vpop.f32.mrf.mxu0 }
 0x188   :  { %v417_v4 = vadd.f32 %v957_v59, %v899_v43 }
 0x189   :  { %v408_v9 = vpop.f32.mrf.mxu0 }
 0x18a   :  { %v409_v26 = vadd.f32 %v899_v43, %v408_v9  ;;  %v461_v21 = vmax.f32 %v417_v4, 0.0 }
 0x18b   :  { %v958_v25 = vpop.f32.mrf.mxu0 }
 0x18c   :  { %v420_v63 = vadd.f32 %v958_v25, %v899_v43  ;;  %v459_v58 = vmax.f32 %v409_v26, 0.0 }
 0x18d   :  { %v411_v60 = vpop.f32.mrf.mxu0 }
 0x18e   :  { %v412_v56 = vadd.f32 %v899_v43, %v411_v60  ;;  %v462_v57 = vmax.f32 %v420_v63, 0.0 }
 0x190   :  { %v460_v30 = vmax.f32 %v412_v56, 0.0  ;;  %v474_v6 = vpack.c.bf16 %v462_v57, %v461_v21 }
 0x192   :  { %v473_v5 = vpack.c.bf16 %v460_v30, %v459_v58 }
 0x194   :  { %987 = vmatprep.mubr.bf16.mxu1 %v473_v5 }
 0x195   :  { %988 = vmatmul.mubr.bf16.gmra.mxu1 %v474_v6 }
 0x197   :  { %v961_v31 = vpop.f32.mrf.mxu0 }
 0x198   :  { %v433_v14 = vadd.f32 %v961_v31, %v899_v43 }
 0x199   :  { %v424_v7 = vpop.f32.mrf.mxu0 }
 0x19a   :  { %v425_v2 = vadd.f32 %v899_v43, %v424_v7  ;;  %v465_v18 = vmax.f32 %v433_v14, 0.0 }
 0x19b   :  { %v962_v0 = vpop.f32.mrf.mxu0 }
 0x19c   :  { %v436_v13 = vadd.f32 %v962_v0, %v899_v43  ;;  %v463_v16 = vmax.f32 %v425_v2, 0.0 }
 0x19d   :  { %v427_v11 = vpop.f32.mrf.mxu0 }
 0x19e   :  { %v428_v10 = vadd.f32 %v899_v43, %v427_v11  ;;  %v466_v61 = vmax.f32 %v436_v13, 0.0 }
 0x1a0   :  { %v464_v17 = vmax.f32 %v428_v10, 0.0  ;;  %v476_v24 = vpack.c.bf16 %v466_v61, %v465_v18 }
 0x1a2   :  { %v475_v23 = vpack.c.bf16 %v464_v17, %v463_v16 }
 0x1a4   :  { %991 = vmatprep.mubr.bf16.mxu1 %v475_v23 }
 0x1a5   :  { %992 = vmatmul.mubr.bf16.gmra.mxu1 %v476_v24 }
 0x1a7   :  { %v965_v27 = vpop.f32.mrf.mxu0 }
 0x1a8   :  { %v449_v12 = vadd.f32 %v965_v27, %v899_v43 }
 0x1a9   :  { %v440_v28 = vpop.f32.mrf.mxu0 }
 0x1aa   :  { %v441_v22 = vadd.f32 %v899_v43, %v440_v28  ;;  %v469_v51 = vmax.f32 %v449_v12, 0.0 }
 0x1ab   :  { %v966_v45 = vpop.f32.mrf.mxu0 }
 0x1ac   :  { %v452_v46 = vadd.f32 %v966_v45, %v899_v43  ;;  %v467_v62 = vmax.f32 %v441_v22, 0.0 }
 0x1ad   :  { %v443_v29 = vpop.f32.mrf.mxu0 }
 0x1ae   :  { %v444_v32 = vadd.f32 %v899_v43, %v443_v29  ;;  %v470_v50 = vmax.f32 %v452_v46, 0.0 }
 0x1b0   :  { %v468_v33 = vmax.f32 %v444_v32, 0.0  ;;  %v478_v34 = vpack.c.bf16 %v470_v50, %v469_v51 }
 0x1b2   :  { %v477_v15 = vpack.c.bf16 %v468_v33, %v467_v62 }
 0x1b4   :  { %995 = vmatprep.mubr.bf16.mxu1 %v477_v15 }
 0x1b5   :  { %996 = vmatmul.mubr.bf16.gmra.mxu1 %v478_v34 }
 0x245   :  { %v985_v39 = vpop.f32.mrf.mxu1 }
 0x246   :  { %v1484_v3 = vadd.f32 %v985_v39, %v1481_v35 }
 0x247   :  { %v544_v36 = vpop.f32.mrf.mxu1 }
 0x248   :  { %611 = vadd.xlane.f32.xlu0 %v1484_v3  ;;  %v1488_v38 = vadd.f32 %v1481_v35, %v544_v36  ;;  %v657_v43 = vmul.f32 %v1484_v3, %v1484_v3 }
 0x249   :  { %v986_v37 = vpop.f32.mrf.mxu1 }
 0x24a   :  { %v1491_v40 = vadd.f32 %v986_v37, %v1481_v35  ;;  %v655_v1 = vmul.f32 %v1488_v38, %v1488_v38 }
 0x24b   :  { %v547_v41 = vpop.f32.mrf.mxu1 }
 0x24c   :  { %613 = vadd.xlane.f32.xlu1 %v1491_v40  ;;  %607 = vadd.xlane.f32.xlu0 %v1488_v38  ;;  %v1496_v42 = vadd.f32 %v1481_v35, %v547_v41  ;;  %v658_v44 = vmul.f32 %v1491_v40, %v1491_v40 }
 0x24e   :  { %v656_v47 = vmul.f32 %v1496_v42, %v1496_v42 }
 0x250   :  { %609 = vadd.xlane.f32.xlu1 %v1496_v42  ;;  %675 = vadd.xlane.f32.xlu0 %v657_v43 }
 0x254   :  { %677 = vadd.xlane.f32.xlu1 %v658_v44  ;;  %671 = vadd.xlane.f32.xlu0 %v655_v1 }
 0x255   :  { %v989_v19 = vpop.f32.mrf.mxu1 }
 0x256   :  { %v1506_v20 = vadd.f32 %v989_v19, %v1481_v35 }
 0x257   :  { %v560_v48 = vpop.f32.mrf.mxu1 }
 0x258   :  { %673 = vadd.xlane.f32.xlu1 %v656_v47  ;;  %619 = vadd.xlane.f32.xlu0 %v1506_v20  ;;  %v1512_v52 = vadd.f32 %v1481_v35, %v560_v48  ;;  %v661_v8 = vmul.f32 %v1506_v20, %v1506_v20 }
 0x259   :  { %v990_v49 = vpop.f32.mrf.mxu1 }
 0x25a   :  { %v1515_v53 = vadd.f32 %v990_v49, %v1481_v35  ;;  %v659_v9 = vmul.f32 %v1512_v52, %v1512_v52 }
 0x25b   :  { %v563_v54 = vpop.f32.mrf.mxu1 }
 0x25c   :  { %621 = vadd.xlane.f32.xlu1 %v1515_v53  ;;  %615 = vadd.xlane.f32.xlu0 %v1512_v52  ;;  %v1520_v55 = vadd.f32 %v1481_v35, %v563_v54  ;;  %v662_v59 = vmul.f32 %v1515_v53, %v1515_v53 }
 0x25e   :  { %v660_v4 = vmul.f32 %v1520_v55, %v1520_v55 }
 0x260   :  { %617 = vadd.xlane.f32.xlu1 %v1520_v55  ;;  %683 = vadd.xlane.f32.xlu0 %v661_v8 }
 0x264   :  { %685 = vadd.xlane.f32.xlu1 %v662_v59  ;;  %679 = vadd.xlane.f32.xlu0 %v659_v9 }
 0x265   :  { %v993_v25 = vpop.f32.mrf.mxu1 }
 0x266   :  { %v1530_v26 = vadd.f32 %v993_v25, %v1481_v35 }
 0x267   :  { %v576_v63 = vpop.f32.mrf.mxu1 }
 0x268   :  { %681 = vadd.xlane.f32.xlu1 %v660_v4  ;;  %627 = vadd.xlane.f32.xlu0 %v1530_v26  ;;  %v1539_v57 = vadd.f32 %v1481_v35, %v576_v63  ;;  %v665_v21 = vmul.f32 %v1530_v26, %v1530_v26 }
 0x269   :  { %v994_v60 = vpop.f32.mrf.mxu1 }
 0x26a   :  { %v1536_v56 = vadd.f32 %v994_v60, %v1481_v35  ;;  %v663_v6 = vmul.f32 %v1539_v57, %v1539_v57 }
 0x26b   :  { %v579_v58 = vpop.f32.mrf.mxu1 }
 0x26c   :  { %629 = vadd.xlane.f32.xlu1 %v1536_v56  ;;  %623 = vadd.xlane.f32.xlu0 %v1539_v57  ;;  %v1544_v30 = vadd.f32 %v1481_v35, %v579_v58  ;;  %v666_v5 = vmul.f32 %v1536_v56, %v1536_v56 }
 0x26e   :  { %v664_v2 = vmul.f32 %v1544_v30, %v1544_v30 }
 0x270   :  { %625 = vadd.xlane.f32.xlu1 %v1544_v30  ;;  %691 = vadd.xlane.f32.xlu0 %v665_v21 }
 0x274   :  { %693 = vadd.xlane.f32.xlu1 %v666_v5  ;;  %687 = vadd.xlane.f32.xlu0 %v663_v6 }
 0x275   :  { %v997_v31 = vpop.f32.mrf.mxu1 }
 0x276   :  { %v1554_v7 = vadd.f32 %v997_v31, %v1481_v35 }
 0x277   :  { %v592_v0 = vpop.f32.mrf.mxu1 }
 0x278   :  { %689 = vadd.xlane.f32.xlu1 %v664_v2  ;;  %635 = vadd.xlane.f32.xlu0 %v1554_v7  ;;  %v1563_v11 = vadd.f32 %v1481_v35, %v592_v0  ;;  %v669_v18 = vmul.f32 %v1554_v7, %v1554_v7 }
 0x279   :  { %v998_v13 = vpop.f32.mrf.mxu1 }
 0x27a   :  { %v1560_v14 = vadd.f32 %v998_v13, %v1481_v35  ;;  %v667_v16 = vmul.f32 %v1563_v11, %v1563_v11 }
 0x27b   :  { %v595_v10 = vpop.f32.mrf.mxu1 }
 0x27c   :  { %637 = vadd.xlane.f32.xlu1 %v1560_v14  ;;  %631 = vadd.xlane.f32.xlu0 %v1563_v11  ;;  %v1568_v61 = vadd.f32 %v1481_v35, %v595_v10  ;;  %v670_v23 = vmul.f32 %v1560_v14, %v1560_v14 }
 0x27e   :  { %v668_v17 = vmul.f32 %v1568_v61, %v1568_v61 }
 0x280   :  { %633 = vadd.xlane.f32.xlu1 %v1568_v61  ;;  %695 = vadd.xlane.f32.xlu0 %v667_v16 }
 0x284   :  { %697 = vadd.xlane.f32.xlu1 %v668_v17  ;;  %699 = vadd.xlane.f32.xlu0 %v669_v18 }
 0x288   :  { %701 = vadd.xlane.f32.xlu1 %v670_v23 }
 0x2d1   :  { %v612_v24 = vpop.xlane.xlu0 %611 }
 0x2d2   :  { %v641_v45 = vmul.f32 0.03125, %v612_v24 }
 0x2d4   :  { %v721_v29 = vmul.f32 %v641_v45, %v641_v45  ;;  %v769_v10 = vsub.f32 %v1484_v3, %v641_v45 }
 0x2d5   :  { %v614_v27 = vpop.xlane.xlu1 %613  ;;  %v608_v28 = vpop.xlane.xlu0 %607 }
 0x2d6   :  { %v1579_v22 = vmul.f32 0.03125, %v614_v27  ;;  %v1581_v32 = vmul.f32 0.03125, %v608_v28 }
 0x2d8   :  { %v722_v33 = vmul.f32 %v1579_v22, %v1579_v22  ;;  %v719_v35 = vmul.f32 %v1581_v32, %v1581_v32 }
 0x2d9   :  { %v610_v46 = vpop.xlane.xlu1 %609  ;;  %v676_v12 = vpop.xlane.xlu0 %675 }
 0x2da   :  { %v705_v50 = vmul.f32 0.03125, %v676_v12  ;;  %v1585_v51 = vmul.f32 0.03125, %v610_v46  ;;  %v1607_v12 = vld [vmem:[%s1762_s7] ss:$0 sm:$0xff] }
 0x2dc   :  { %v737_v62 = vsub.f32 %v705_v50, %v721_v29  ;;  %v720_v1 = vmul.f32 %v1585_v51, %v1585_v51 }
 0x2dd   :  { %v678_v15 = vpop.xlane.xlu1 %677  ;;  %v672_v34 = vpop.xlane.xlu0 %671 }
 0x2de   :  { %v753_v39 = vmax.f32 %v737_v62, 0.0  ;;  %v706_v36 = vmul.f32 0.03125, %v678_v15  ;;  %v703_v37 = vmul.f32 0.03125, %v672_v34  ;;  %v1616_v15 = vld [vmem:[%s1763_s8] ss:$0 sm:$0xff] }
 0x2e0   :  { %v785_v41 = vadd.f32 1e-05, %v753_v39  ;;  %v738_v43 = vsub.f32 %v706_v36, %v722_v33  ;;  %v735_v44 = vsub.f32 %v703_v37, %v719_v35  ;;  %v770_v33 = vsub.f32 %v1491_v40, %v1579_v22 }
 0x2e1   :  { %v674_v19 = vpop.xlane.xlu1 %673  ;;  %v620_v47 = vpop.xlane.xlu0 %619 }
 0x2e2   :  { %1031 = vrsqrt.f32 %v785_v41  ;;  %v754_v48 = vmax.f32 %v738_v43, 0.0  ;;  %v751_v49 = vmax.f32 %v735_v44, 0.0  ;;  %v704_v54 = vmul.f32 0.03125, %v674_v19 }
 0x2e3   :  { %v1591_v60 = vmul.f32 0.03125, %v620_v47  ;;  %v767_v43 = vsub.f32 %v1488_v38, %v1581_v32 }
 0x2e4   :  { %v786_v8 = vadd.f32 1e-05, %v754_v48  ;;  %v783_v59 = vadd.f32 1e-05, %v751_v49  ;;  %v736_v9 = vsub.f32 %v704_v54, %v720_v1 }
 0x2e5   :  { %v622_v25 = vpop.xlane.xlu1 %621  ;;  %v616_v63 = vpop.xlane.xlu0 %615  ;;  %v725_v31 = vmul.f32 %v1591_v60, %v1591_v60 }
 0x2e6   :  { %1033 = vrsqrt.f32 %v786_v8  ;;  %v752_v4 = vmax.f32 %v736_v9, 0.0  ;;  %v1593_v21 = vmul.f32 0.03125, %v622_v25  ;;  %v1597_v0 = vmul.f32 0.03125, %v616_v63 }
 0x2e7   :  { %1035 = vrsqrt.f32 %v783_v59  ;;  %v768_v9 = vsub.f32 %v1496_v42, %v1585_v51 }
 0x2e8   :  { %v784_v58 = vadd.f32 1e-05, %v752_v4  ;;  %v726_v16 = vmul.f32 %v1593_v21, %v1593_v21  ;;  %v723_v23 = vmul.f32 %v1597_v0, %v1597_v0 }
 0x2e9   :  { %v618_v5 = vpop.xlane.xlu1 %617  ;;  %v684_v6 = vpop.xlane.xlu0 %683 }
 0x2ea   :  { %1037 = vrsqrt.f32 %v784_v58  ;;  %v709_v2 = vmul.f32 0.03125, %v684_v6  ;;  %v1609_v29 = vmul.f32 0.03125, %v618_v5 }
 0x2ec   :  { %v741_v13 = vsub.f32 %v709_v2, %v725_v31  ;;  %v724_v44 = vmul.f32 %v1609_v29, %v1609_v29 }
 0x2ed   :  { %v686_v17 = vpop.xlane.xlu1 %685  ;;  %v680_v18 = vpop.xlane.xlu0 %679 }
 0x2ee   :  { %v757_v24 = vmax.f32 %v741_v13, 0.0  ;;  %v710_v27 = vmul.f32 0.03125, %v686_v17  ;;  %v707_v28 = vmul.f32 0.03125, %v680_v18 }
 0x2ef   :  { %v1032_v46 = vpop.eup %1031 }
 0x2f0   :  { %v817_v3 = vmul.f32 %v1032_v46, %v769_v10  ;;  %v789_v45 = vadd.f32 1e-05, %v757_v24  ;;  %v742_v50 = vsub.f32 %v710_v27, %v726_v16  ;;  %v739_v62 = vsub.f32 %v707_v28, %v723_v23 }
 0x2f1   :  { %v682_v34 = vpop.xlane.xlu1 %681  ;;  %v628_v35 = vpop.xlane.xlu0 %627  ;;  %v773_v24 = vsub.f32 %v1506_v20, %v1591_v60 }
 0x2f2   :  { %v840_v39 = vmul.f32 %v1607_v12, %v817_v3  ;;  %1039 = vrsqrt.f32 %v789_v45  ;;  %v758_v36 = vmax.f32 %v742_v50, 0.0  ;;  %v755_v37 = vmax.f32 %v739_v62, 0.0 }
 0x2f3   :  { %v1034_v41 = vpop.eup %1033  ;;  %v708_v40 = vmul.f32 0.03125, %v682_v34  ;;  %v1630_v32 = vmul.f32 0.03125, %v628_v35 }
 0x2f4   :  { %v1036_v22 = vpop.eup %1035  ;;  %v863_v1 = vadd.f32 %v1616_v15, %v840_v39  ;;  %v818_v19 = vmul.f32 %v1034_v41, %v770_v33  ;;  %v790_v47 = vadd.f32 1e-05, %v758_v36  ;;  %v787_v48 = vadd.f32 1e-05, %v755_v37 }
 0x2f5   :  { %v815_v49 = vmul.f32 %v1036_v22, %v767_v43  ;;  %v740_v54 = vsub.f32 %v708_v40, %v724_v44  ;;  %v630_v8 = vpop.xlane.xlu1 %629  ;;  %v624_v59 = vpop.xlane.xlu0 %623  ;;  %v729_v10 = vmul.f32 %v1630_v32, %v1630_v32  ;;  %v774_v36 = vsub.f32 %v1515_v53, %v1593_v21 }
 0x2f6   :  { %879 = vst [vmem:[%s1764_s9 + $0x10] sm:$0xff] %v863_v1  ;;  %v841_v38 = vmul.f32 %v1607_v12, %v818_v19  ;;  %1041 = vrsqrt.f32 %v790_v47  ;;  %v1635_v51 = vmul.f32 0.03125, %v630_v8  ;;  %v1643_v16 = vmul.f32 0.03125, %v624_v59 }
 0x2f7   :  { %v1038_v25 = vpop.eup %1037  ;;  %v838_v63 = vmul.f32 %v1607_v12, %v815_v49  ;;  %1043 = vrsqrt.f32 %v787_v48  ;;  %v756_v4 = vmax.f32 %v740_v54, 0.0  ;;  %v771_v1 = vsub.f32 %v1512_v52, %v1597_v0 }
 0x2f8   :  { %v864_v58 = vadd.f32 %v1616_v15, %v841_v38  ;;  %v816_v5 = vmul.f32 %v1038_v25, %v768_v9  ;;  %v730_v27 = vmul.f32 %v1635_v51, %v1635_v51  ;;  %v727_v3 = vmul.f32 %v1643_v16, %v1643_v16 }
 0x2f9   :  { %v861_v6 = vadd.f32 %v1616_v15, %v838_v63  ;;  %v788_v42 = vadd.f32 1e-05, %v756_v4  ;;  %v626_v31 = vpop.xlane.xlu1 %625  ;;  %v692_v2 = vpop.xlane.xlu0 %691  ;;  %v772_v25 = vsub.f32 %v1520_v55, %v1609_v29 }
 0x2fa   :  { %880 = vst [vmem:[%s1764_s9 + $0x18] sm:$0xff] %v864_v58  ;;  %v839_v13 = vmul.f32 %v1607_v12, %v816_v5  ;;  %v713_v17 = vmul.f32 0.03125, %v692_v2  ;;  %v1658_v34 = vmul.f32 0.03125, %v626_v31 }
 0x2fb   :  { %877 = vst [vmem:[%s1764_s9] sm:$0xff] %v861_v6  ;;  %1045 = vrsqrt.f32 %v788_v42 }
 0x2fc   :  { %v862_v18 = vadd.f32 %v1616_v15, %v839_v13  ;;  %v745_v23 = vsub.f32 %v713_v17, %v729_v10  ;;  %v728_v19 = vmul.f32 %v1658_v34, %v1658_v34 }
 0x2fd   :  { %v694_v28 = vpop.xlane.xlu1 %693  ;;  %v688_v46 = vpop.xlane.xlu0 %687 }
 0x2fe   :  { %878 = vst [vmem:[%s1764_s9 + $0x8] sm:$0xff] %v862_v18  ;;  %v761_v45 = vmax.f32 %v745_v23, 0.0  ;;  %v714_v50 = vmul.f32 0.03125, %v694_v28  ;;  %v711_v62 = vmul.f32 0.03125, %v688_v46 }
 0x2ff   :  { %v1040_v33 = vpop.eup %1039 }
 0x300   :  { %v821_v35 = vmul.f32 %v1040_v33, %v773_v24  ;;  %v793_v20 = vadd.f32 1e-05, %v761_v45  ;;  %v746_v60 = vsub.f32 %v714_v50, %v730_v27  ;;  %v743_v39 = vsub.f32 %v711_v62, %v727_v3 }
 0x301   :  { %v690_v37 = vpop.xlane.xlu1 %689  ;;  %v636_v41 = vpop.xlane.xlu0 %635  ;;  %v777_v27 = vsub.f32 %v1530_v26, %v1630_v32 }
 0x302   :  { %v844_v43 = vmul.f32 %v1607_v12, %v821_v35  ;;  %1047 = vrsqrt.f32 %v793_v20  ;;  %v762_v44 = vmax.f32 %v746_v60, 0.0  ;;  %v759_v40 = vmax.f32 %v743_v39, 0.0 }
 0x303   :  { %v1042_v22 = vpop.eup %1041  ;;  %v712_v47 = vmul.f32 0.03125, %v690_v37  ;;  %v1679_v2 = vmul.f32 0.03125, %v636_v41 }
 0x304   :  { %v1044_v48 = vpop.eup %1043  ;;  %v867_v49 = vadd.f32 %v1616_v15, %v844_v43  ;;  %v822_v54 = vmul.f32 %v1042_v22, %v774_v36  ;;  %v794_v53 = vadd.f32 1e-05, %v762_v44  ;;  %v791_v21 = vadd.f32 1e-05, %v759_v40 }
 0x305   :  { %v819_v8 = vmul.f32 %v1044_v48, %v771_v1  ;;  %v744_v59 = vsub.f32 %v712_v47, %v728_v19  ;;  %v638_v9 = vpop.xlane.xlu1 %637  ;;  %v632_v38 = vpop.xlane.xlu0 %631  ;;  %v733_v28 = vmul.f32 %v1679_v2, %v1679_v2  ;;  %v778_v36 = vsub.f32 %v1536_v56, %v1635_v51 }
 0x306   :  { %883 = vst [vmem:[%s1764_s9 + $0x30] sm:$0xff] %v867_v49  ;;  %v845_v52 = vmul.f32 %v1607_v12, %v822_v54  ;;  %1049 = vrsqrt.f32 %v794_v53  ;;  %v1672_v0 = vmul.f32 0.03125, %v632_v38  ;;  %v654_v20 = vmul.f32 0.03125, %v638_v9 }
 0x307   :  { %v842_v63 = vmul.f32 %v1607_v12, %v819_v8  ;;  %1051 = vrsqrt.f32 %v791_v21  ;;  %v760_v4 = vmax.f32 %v744_v59, 0.0  ;;  %v775_v22 = vsub.f32 %v1539_v57, %v1643_v16 }
 0x308   :  { %v1046_v58 = vpop.eup %1045  ;;  %v868_v5 = vadd.f32 %v1616_v15, %v845_v52  ;;  %v731_v55 = vmul.f32 %v1672_v0, %v1672_v0  ;;  %v734_v1 = vmul.f32 %v654_v20, %v654_v20  ;;  %v776_v57 = vsub.f32 %v1544_v30, %v1658_v34 }
 0x309   :  { %v865_v6 = vadd.f32 %v1616_v15, %v842_v63  ;;  %v820_v42 = vmul.f32 %v1046_v58, %v772_v25  ;;  %v792_v31 = vadd.f32 1e-05, %v760_v4  ;;  %v634_v13 = vpop.xlane.xlu1 %633  ;;  %v696_v10 = vpop.xlane.xlu0 %695  ;;  %v779_v63 = vsub.f32 %v1563_v11, %v1672_v0 }
 0x30a   :  { %884 = vst [vmem:[%s1764_s9 + $0x38] sm:$0xff] %v868_v5  ;;  %v1686_v29 = vmul.f32 0.03125, %v634_v13  ;;  %v715_v17 = vmul.f32 0.03125, %v696_v10 }
 0x30b   :  { %881 = vst [vmem:[%s1764_s9 + $0x20] sm:$0xff] %v865_v6  ;;  %v843_v18 = vmul.f32 %v1607_v12, %v820_v42  ;;  %1053 = vrsqrt.f32 %v792_v31  ;;  %v781_v31 = vsub.f32 %v1554_v7, %v1679_v2 }
 0x30c   :  { %v747_v23 = vsub.f32 %v715_v17, %v731_v55  ;;  %v732_v45 = vmul.f32 %v1686_v29, %v1686_v29  ;;  %v780_v5 = vsub.f32 %v1568_v61, %v1686_v29  ;;  %v782_v17 = vsub.f32 %v1560_v14, %v654_v20 }
 0x30d   :  { %v866_v24 = vadd.f32 %v1616_v15, %v843_v18  ;;  %v698_v46 = vpop.xlane.xlu1 %697  ;;  %v700_v3 = vpop.xlane.xlu0 %699 }
 0x30e   :  { %v763_v50 = vmax.f32 %v747_v23, 0.0  ;;  %v716_v62 = vmul.f32 0.03125, %v698_v46  ;;  %v717_v33 = vmul.f32 0.03125, %v700_v3 }
 0x30f   :  { %v1048_v35 = vpop.eup %1047  ;;  %882 = vst [vmem:[%s1764_s9 + $0x28] sm:$0xff] %v866_v24 }
 0x310   :  { %v825_v60 = vmul.f32 %v1048_v35, %v777_v27  ;;  %v795_v39 = vadd.f32 1e-05, %v763_v50  ;;  %v748_v26 = vsub.f32 %v716_v62, %v732_v45  ;;  %v749_v32 = vsub.f32 %v717_v33, %v733_v28 }
 0x311   :  { %v702_v37 = vpop.xlane.xlu1 %701 }
 0x312   :  { %v848_v41 = vmul.f32 %v1607_v12, %v825_v60  ;;  %1055 = vrsqrt.f32 %v795_v39  ;;  %v764_v43 = vmax.f32 %v748_v26, 0.0  ;;  %v765_v44 = vmax.f32 %v749_v32, 0.0 }
 0x313   :  { %v1050_v40 = vpop.eup %1049  ;;  %v718_v19 = vmul.f32 0.03125, %v702_v37 }
 0x314   :  { %v1052_v47 = vpop.eup %1051  ;;  %v871_v48 = vadd.f32 %v1616_v15, %v848_v41  ;;  %v826_v49 = vmul.f32 %v1050_v40, %v778_v36  ;;  %v796_v54 = vadd.f32 1e-05, %v764_v43  ;;  %v797_v53 = vadd.f32 1e-05, %v765_v44 }
 0x315   :  { %v823_v21 = vmul.f32 %v1052_v47, %v775_v22  ;;  %v750_v56 = vsub.f32 %v718_v19, %v734_v1 }
 0x316   :  { %887 = vst [vmem:[%s1764_s9 + $0x50] sm:$0xff] %v871_v48  ;;  %v849_v51 = vmul.f32 %v1607_v12, %v826_v49  ;;  %1057 = vrsqrt.f32 %v796_v54 }
 0x317   :  { %v846_v16 = vmul.f32 %v1607_v12, %v823_v21  ;;  %1059 = vrsqrt.f32 %v797_v53  ;;  %v766_v8 = vmax.f32 %v750_v56, 0.0 }
 0x318   :  { %v1054_v59 = vpop.eup %1053  ;;  %v872_v9 = vadd.f32 %v1616_v15, %v849_v51 }
 0x319   :  { %v869_v38 = vadd.f32 %v1616_v15, %v846_v16  ;;  %v824_v52 = vmul.f32 %v1054_v59, %v776_v57  ;;  %v798_v25 = vadd.f32 1e-05, %v766_v8 }
 0x31a   :  { %888 = vst [vmem:[%s1764_s9 + $0x58] sm:$0xff] %v872_v9 }
 0x31b   :  { %885 = vst [vmem:[%s1764_s9 + $0x40] sm:$0xff] %v869_v38  ;;  %v847_v30 = vmul.f32 %v1607_v12, %v824_v52  ;;  %1061 = vrsqrt.f32 %v798_v25 }
 0x31d   :  { %v870_v34 = vadd.f32 %v1616_v15, %v847_v30 }
 0x31f   :  { %v1056_v4 = vpop.eup %1055  ;;  %886 = vst [vmem:[%s1764_s9 + $0x48] sm:$0xff] %v870_v34 }
 0x320   :  { %v827_v58 = vmul.f32 %v1056_v4, %v779_v63 }
 0x322   :  { %v850_v6 = vmul.f32 %v1607_v12, %v827_v58 }
 0x323   :  { %v1058_v42 = vpop.eup %1057 }
 0x324   :  { %v1060_v13 = vpop.eup %1059  ;;  %v873_v10 = vadd.f32 %v1616_v15, %v850_v6  ;;  %v828_v55 = vmul.f32 %v1058_v42, %v780_v5 }
 0x325   :  { %v829_v11 = vmul.f32 %v1060_v13, %v781_v31 }
 0x326   :  { %889 = vst [vmem:[%s1764_s9 + $0x60] sm:$0xff] %v873_v10  ;;  %v851_v0 = vmul.f32 %v1607_v12, %v828_v55 }
 0x327   :  { %v852_v61 = vmul.f32 %v1607_v12, %v829_v11 }
 0x328   :  { %v1062_v29 = vpop.eup %1061  ;;  %v874_v18 = vadd.f32 %v1616_v15, %v851_v0 }
 0x329   :  { %v875_v7 = vadd.f32 %v1616_v15, %v852_v61  ;;  %v830_v2 = vmul.f32 %v1062_v29, %v782_v17 }
 0x32a   :  { %890 = vst [vmem:[%s1764_s9 + $0x68] sm:$0xff] %v874_v18 }
 0x32b   :  { %891 = vst [vmem:[%s1764_s9 + $0x70] sm:$0xff] %v875_v7  ;;  %v853_v23 = vmul.f32 %v1607_v12, %v830_v2 }
 0x32d   :  { %v876_v14 = vadd.f32 %v1616_v15, %v853_v23 }
 0x32f   :  { %892 = vst [vmem:[%s1764_s9 + $0x78] sm:$0xff] %v876_v14 }

// kernel: _lambda_.9
= control target key start
LH: loop header
LB: loop body
LE: loop exit
PB: predicated region body
PF: predicated region fallthrough
CT: control target
= control target key end

     0   :  { %s2701_s0 = inlined_call_operand.vmem [shape: f32[128,128], index: 0, kind: input, shape index: {}]   ;;  %s2702_s1 = inlined_call_operand.vmem [shape: f32[1,128], index: 1, kind: input, shape index: {}]   ;;  %s2703_s2 = inlined_call_operand.vmem [shape: f32[1,128], index: 2, kind: input, shape index: {}]   ;;  %s2704_s3 = inlined_call_operand.vmem [shape: f32[128,128], index: 3, kind: input, shape index: {}]   ;;  %s2705_s4 = inlined_call_operand.vmem [shape: f32[1,128], index: 4, kind: input, shape index: {}]   ;;  %s2706_s5 = inlined_call_operand.vmem [shape: f32[128,128], index: 5, kind: input, shape index: {}]   ;;  %s2707_s6 = inlined_call_operand.vmem [shape: f32[1,128], index: 6, kind: input, shape index: {}]   ;;  %s2708_s7 = inlined_call_operand.vmem [shape: f32[1,128], index: 7, kind: input, shape index: {}]   ;;  %s2709_s8 = inlined_call_operand.vmem [shape: f32[1,128], index: 8, kind: input, shape index: {}]   ;;  %s2710_s9 = inlined_call_operand.vmem [shape: f32[128,384], index: 9, kind: input, shape index: {}]   ;;  %s2711_s10 = inlined_call_operand.vmem [shape: f32[1,384], index: 10, kind: input, shape index: {}]   ;;  %s2712_s11 = inlined_call_operand.hbm [shape: f32[128,128], index: 11, kind: output, shape index: {0}]   ;;  %s2713_s12 = inlined_call_operand.vmem [shape: bf16[128,384], index: 12, kind: output, shape index: {1}]  }
   0x1   :  { %v1797_v0 = vld [vmem:[%s2701_s0 + $0x10] sm:$0xff]  ;;  %v1802_v1 = vld [vmem:[%s2701_s0] sm:$0xff]  ;;  %v1809_v2 = vld [vmem:[%s2701_s0 + $0x18] sm:$0xff] }
   0x2   :  { %62 = vadd.xlane.f32.xlu1 %v1797_v0  ;;  %58 = vadd.xlane.f32.xlu0 %v1802_v1  ;;  %v1814_v3 = vld [vmem:[%s2701_s0 + $0x8] sm:$0xff]  ;;  %v106_v5 = vmul.f32 %v1802_v1, %v1802_v1 }
   0x3   :  { %v107_v4 = vmul.f32 %v1814_v3, %v1814_v3 }
   0x6   :  { %64 = vadd.xlane.f32.xlu1 %v1809_v2  ;;  %60 = vadd.xlane.f32.xlu0 %v1814_v3 }
   0x7   :  { %18 = vsyncpa [#allocation3], 0  ;;  %v109_v6 = vmul.f32 %v1809_v2, %v1809_v2  ;;  %v108_v7 = vmul.f32 %v1797_v0, %v1797_v0  ;;  %v1829_v8 = vld [vmem:[%s2701_s0 + $0x28] sm:$0xff]  ;;  %v1834_v9 = vld [vmem:[%s2701_s0 + $0x20] sm:$0xff] }
   0x8   :  { %v1841_v10 = vld [vmem:[%s2701_s0 + $0x38] sm:$0xff]  ;;  %v1846_v11 = vld [vmem:[%s2701_s0 + $0x30] sm:$0xff]  ;;  %v111_v15 = vmul.f32 %v1829_v8, %v1829_v8  ;;  %v110_v16 = vmul.f32 %v1834_v9, %v1834_v9  ;;  %v348_v17 = vld [vmem:[%s2704_s3 + $0x60] sm:$0xff] }
   0x9   :  { %v350_v12 = vld [vmem:[%s2704_s3 + $0x70] sm:$0xff]  ;;  %v351_v13 = vld [vmem:[%s2704_s3 + $0x78] sm:$0xff]  ;;  %v349_v18 = vld [vmem:[%s2704_s3 + $0x68] sm:$0xff]  ;;  %v113_v20 = vmul.f32 %v1841_v10, %v1841_v10  ;;  %v112_v21 = vmul.f32 %v1846_v11, %v1846_v11 }
   0xa   :  { %124 = vadd.xlane.f32.xlu1 %v107_v4  ;;  %122 = vadd.xlane.f32.xlu0 %v106_v5  ;;  %v359_v14 = vpack.c.bf16 %v351_v13, %v350_v12  ;;  %v358_v19 = vpack.c.bf16 %v349_v18, %v348_v17  ;;  %v346_v22 = vld [vmem:[%s2704_s3 + $0x50] sm:$0xff]  ;;  %v347_v23 = vld [vmem:[%s2704_s3 + $0x58] sm:$0xff]  ;;  %v1879_v25 = vld [vmem:[%s2701_s0 + $0x48] sm:$0xff] }
   0xb   :  { %v357_v24 = vpack.c.bf16 %v347_v23, %v346_v22  ;;  %v1884_v26 = vld [vmem:[%s2701_s0 + $0x40] sm:$0xff]  ;;  %v345_v28 = vld [vmem:[%s2704_s3 + $0x48] sm:$0xff]  ;;  %v1897_v30 = vld [vmem:[%s2701_s0 + $0x58] sm:$0xff]  ;;  %v115_v35 = vmul.f32 %v1879_v25, %v1879_v25 }
   0xc   :  { %1539 = vmatprep.subr.bf16.mxu0 %v359_v14  ;;  %v344_v27 = vld [vmem:[%s2704_s3 + $0x40] sm:$0xff]  ;;  %v1902_v31 = vld [vmem:[%s2701_s0 + $0x50] sm:$0xff]  ;;  %v343_v33 = vld [vmem:[%s2704_s3 + $0x38] sm:$0xff]  ;;  %v114_v36 = vmul.f32 %v1884_v26, %v1884_v26  ;;  %v117_v40 = vmul.f32 %v1897_v30, %v1897_v30 }
   0xd   :  { %1540 = vmatpush3.bf16.msra.mxu0 %v359_v14  ;;  %v356_v29 = vpack.c.bf16 %v345_v28, %v344_v27  ;;  %v342_v32 = vld [vmem:[%s2704_s3 + $0x30] sm:$0xff]  ;;  %v340_v37 = vld [vmem:[%s2704_s3 + $0x20] sm:$0xff]  ;;  %v341_v38 = vld [vmem:[%s2704_s3 + $0x28] sm:$0xff]  ;;  %v116_v41 = vmul.f32 %v1902_v31, %v1902_v31 }
   0xe   :  { %128 = vadd.xlane.f32.xlu1 %v109_v6  ;;  %126 = vadd.xlane.f32.xlu0 %v108_v7  ;;  %v355_v34 = vpack.c.bf16 %v343_v33, %v342_v32  ;;  %v354_v39 = vpack.c.bf16 %v341_v38, %v340_v37  ;;  %v338_v42 = vld [vmem:[%s2704_s3 + $0x10] sm:$0xff]  ;;  %v339_v43 = vld [vmem:[%s2704_s3 + $0x18] sm:$0xff]  ;;  %v1935_v45 = vld [vmem:[%s2701_s0 + $0x68] sm:$0xff] }
   0xf   :  { %1541 = vmatprep.subr.bf16.mxu0 %v358_v19  ;;  %v353_v44 = vpack.c.bf16 %v339_v43, %v338_v42  ;;  %v1940_v46 = vld [vmem:[%s2701_s0 + $0x60] sm:$0xff]  ;;  %v337_v48 = vld [vmem:[%s2704_s3 + $0x8] sm:$0xff]  ;;  %v1953_v50 = vld [vmem:[%s2701_s0 + $0x78] sm:$0xff]  ;;  %v119_v52 = vmul.f32 %v1935_v45, %v1935_v45 }
  0x10   :  { %v336_v47 = vld [vmem:[%s2704_s3] sm:$0xff]  ;;  %v1958_v51 = vld [vmem:[%s2701_s0 + $0x70] sm:$0xff]  ;;  %v118_v53 = vmul.f32 %v1940_v46, %v1940_v46  ;;  %v121_v54 = vmul.f32 %v1953_v50, %v1953_v50  ;;  %v503_v57 = vld [vmem:[%s2706_s5 + $0x78] sm:$0xff] }
  0x11   :  { %1542 = vmatpush3.bf16.msra.mxu0 %v358_v19  ;;  %v352_v49 = vpack.c.bf16 %v337_v48, %v336_v47  ;;  %v120_v55 = vmul.f32 %v1958_v51, %v1958_v51  ;;  %v502_v56 = vld [vmem:[%s2706_s5 + $0x70] sm:$0xff]  ;;  %v500_v58 = vld [vmem:[%s2706_s5 + $0x60] sm:$0xff]  ;;  %v501_v60 = vld [vmem:[%s2706_s5 + $0x68] sm:$0xff] }
  0x12   :  { %68 = vadd.xlane.f32.xlu1 %v1829_v8  ;;  %66 = vadd.xlane.f32.xlu0 %v1834_v9  ;;  %v511_v59 = vpack.c.bf16 %v503_v57, %v502_v56  ;;  %v510_v61 = vpack.c.bf16 %v501_v60, %v500_v58  ;;  %v498_v62 = vld [vmem:[%s2706_s5 + $0x50] sm:$0xff]  ;;  %v499_v63 = vld [vmem:[%s2706_s5 + $0x58] sm:$0xff]  ;;  %v496_v5 = vld [vmem:[%s2706_s5 + $0x40] sm:$0xff] }
  0x13   :  { %1543 = vmatprep.subr.bf16.mxu0 %v357_v24  ;;  %v509_v4 = vpack.c.bf16 %v499_v63, %v498_v62  ;;  %v497_v6 = vld [vmem:[%s2706_s5 + $0x48] sm:$0xff]  ;;  %v494_v12 = vld [vmem:[%s2706_s5 + $0x30] sm:$0xff]  ;;  %v495_v13 = vld [vmem:[%s2706_s5 + $0x38] sm:$0xff] }
  0x14   :  { %1571 = vmatprep.subr.bf16.mxu1 %v511_v59  ;;  %v508_v7 = vpack.c.bf16 %v497_v6, %v496_v5  ;;  %v507_v14 = vpack.c.bf16 %v495_v13, %v494_v12 }
  0x15   :  { %1544 = vmatpush3.bf16.msra.mxu0 %v357_v24  ;;  %1572 = vmatpush3.bf16.msra.mxu1 %v511_v59 }
  0x16   :  { %72 = vadd.xlane.f32.xlu1 %v1841_v10  ;;  %70 = vadd.xlane.f32.xlu0 %v1846_v11 }
  0x17   :  { %1545 = vmatprep.subr.bf16.mxu0 %v356_v29  ;;  %1573 = vmatprep.subr.bf16.mxu1 %v510_v61 }
  0x19   :  { %1546 = vmatpush3.bf16.msra.mxu0 %v356_v29  ;;  %1574 = vmatpush3.bf16.msra.mxu1 %v510_v61 }
  0x1a   :  { %132 = vadd.xlane.f32.xlu1 %v111_v15  ;;  %130 = vadd.xlane.f32.xlu0 %v110_v16 }
  0x1b   :  { %1547 = vmatprep.subr.bf16.mxu0 %v355_v34  ;;  %1575 = vmatprep.subr.bf16.mxu1 %v509_v4 }
  0x1d   :  { %1548 = vmatpush3.bf16.msra.mxu0 %v355_v34  ;;  %1576 = vmatpush3.bf16.msra.mxu1 %v509_v4 }
  0x1e   :  { %136 = vadd.xlane.f32.xlu1 %v113_v20  ;;  %134 = vadd.xlane.f32.xlu0 %v112_v21 }
  0x1f   :  { %1549 = vmatprep.subr.bf16.mxu0 %v354_v39  ;;  %1577 = vmatprep.subr.bf16.mxu1 %v508_v7 }
  0x21   :  { %1550 = vmatpush3.bf16.msra.mxu0 %v354_v39  ;;  %1578 = vmatpush3.bf16.msra.mxu1 %v508_v7 }
  0x22   :  { %76 = vadd.xlane.f32.xlu1 %v1879_v25  ;;  %74 = vadd.xlane.f32.xlu0 %v1884_v26 }
  0x23   :  { %1551 = vmatprep.subr.bf16.mxu0 %v353_v44  ;;  %1579 = vmatprep.subr.bf16.mxu1 %v507_v14 }
  0x25   :  { %1552 = vmatpush3.bf16.msra.mxu0 %v353_v44  ;;  %1580 = vmatpush3.bf16.msra.mxu1 %v507_v14 }
  0x26   :  { %80 = vadd.xlane.f32.xlu1 %v1897_v30  ;;  %78 = vadd.xlane.f32.xlu0 %v1902_v31 }
  0x27   :  { %1553 = vmatprep.subr.bf16.mxu0 %v352_v49 }
  0x29   :  { %1554 = vmatpush3.bf16.msra.mxu0 %v352_v49 }
  0x2a   :  { %140 = vadd.xlane.f32.xlu1 %v115_v35  ;;  %138 = vadd.xlane.f32.xlu0 %v114_v36 }
  0x2e   :  { %144 = vadd.xlane.f32.xlu1 %v117_v40  ;;  %142 = vadd.xlane.f32.xlu0 %v116_v41 }
  0x32   :  { %84 = vadd.xlane.f32.xlu1 %v1935_v45  ;;  %82 = vadd.xlane.f32.xlu0 %v1940_v46 }
  0x36   :  { %88 = vadd.xlane.f32.xlu1 %v1953_v50  ;;  %86 = vadd.xlane.f32.xlu0 %v1958_v51 }
  0x3a   :  { %148 = vadd.xlane.f32.xlu1 %v119_v52  ;;  %146 = vadd.xlane.f32.xlu0 %v118_v53 }
  0x3e   :  { %152 = vadd.xlane.f32.xlu1 %v121_v54  ;;  %150 = vadd.xlane.f32.xlu0 %v120_v55 }
  0x8b   :  { %v63_v15 = vpop.xlane.xlu1 %62  ;;  %v59_v16 = vpop.xlane.xlu0 %58 }
  0x8c   :  { %v2000_v19 = vmul.f32 0.03125, %v59_v16  ;;  %v2004_v21 = vmul.f32 0.03125, %v63_v15 }
  0x8e   :  { %v170_v27 = vmul.f32 %v2000_v19, %v2000_v19  ;;  %v172_v35 = vmul.f32 %v2004_v21, %v2004_v21 }
  0x8f   :  { %v65_v17 = vpop.xlane.xlu1 %64  ;;  %v61_v18 = vpop.xlane.xlu0 %60 }
  0x90   :  { %v2002_v20 = vmul.f32 0.03125, %v61_v18  ;;  %v2006_v22 = vmul.f32 0.03125, %v65_v17 }
  0x92   :  { %v171_v28 = vmul.f32 %v2002_v20, %v2002_v20  ;;  %v173_v36 = vmul.f32 %v2006_v22, %v2006_v22 }
  0x93   :  { %v125_v23 = vpop.xlane.xlu1 %124  ;;  %v123_v24 = vpop.xlane.xlu0 %122 }
  0x94   :  { %v155_v29 = vmul.f32 0.03125, %v125_v23  ;;  %v154_v32 = vmul.f32 0.03125, %v123_v24 }
  0x96   :  { %v187_v33 = vsub.f32 %v155_v29, %v171_v28  ;;  %v186_v34 = vsub.f32 %v154_v32, %v170_v27  ;;  %v218_v32 = vsub.f32 %v1802_v1, %v2000_v19 }
  0x97   :  { %v129_v37 = vpop.xlane.xlu1 %128  ;;  %v127_v38 = vpop.xlane.xlu0 %126 }
  0x98   :  { %v203_v39 = vmax.f32 %v187_v33, 0.0  ;;  %v202_v40 = vmax.f32 %v186_v34, 0.0  ;;  %v157_v41 = vmul.f32 0.03125, %v129_v37  ;;  %v156_v42 = vmul.f32 0.03125, %v127_v38 }
  0x99   :  { %v219_v33 = vsub.f32 %v1814_v3, %v2002_v20  ;;  %v2044_v3 = vld [vmem:[%s2703_s2] ss:$0 sm:$0xff] }
  0x9a   :  { %v235_v43 = vadd.f32 1e-05, %v203_v39  ;;  %v234_v44 = vadd.f32 1e-05, %v202_v40  ;;  %v189_v47 = vsub.f32 %v157_v41, %v173_v36  ;;  %v188_v48 = vsub.f32 %v156_v42, %v172_v35  ;;  %v2039_v39 = vld [vmem:[%s2702_s1] ss:$0 sm:$0xff] }
  0x9b   :  { %v69_v49 = vpop.xlane.xlu1 %68  ;;  %v67_v52 = vpop.xlane.xlu0 %66 }
  0x9c   :  { %1639 = vrsqrt.f32 %v235_v43  ;;  %v205_v53 = vmax.f32 %v189_v47, 0.0  ;;  %v204_v54 = vmax.f32 %v188_v48, 0.0  ;;  %v2016_v59 = vmul.f32 0.03125, %v69_v49 }
  0x9d   :  { %1641 = vrsqrt.f32 %v234_v44  ;;  %v2018_v60 = vmul.f32 0.03125, %v67_v52  ;;  %v220_v49 = vsub.f32 %v1797_v0, %v2004_v21 }
  0x9e   :  { %v237_v55 = vadd.f32 1e-05, %v205_v53  ;;  %v236_v56 = vadd.f32 1e-05, %v204_v54  ;;  %v175_v5 = vmul.f32 %v2016_v59, %v2016_v59  ;;  %v221_v54 = vsub.f32 %v1809_v2, %v2006_v22 }
  0x9f   :  { %v73_v57 = vpop.xlane.xlu1 %72  ;;  %v71_v58 = vpop.xlane.xlu0 %70  ;;  %v174_v6 = vmul.f32 %v2018_v60, %v2018_v60 }
  0xa0   :  { %1643 = vrsqrt.f32 %v237_v55  ;;  %v2020_v61 = vmul.f32 0.03125, %v73_v57  ;;  %v2022_v62 = vmul.f32 0.03125, %v71_v58 }
  0xa1   :  { %1645 = vrsqrt.f32 %v236_v56 }
  0xa2   :  { %v177_v15 = vmul.f32 %v2020_v61, %v2020_v61  ;;  %v176_v16 = vmul.f32 %v2022_v62, %v2022_v62 }
  0xa3   :  { %v133_v63 = vpop.xlane.xlu1 %132  ;;  %v131_v4 = vpop.xlane.xlu0 %130 }
  0xa4   :  { %v159_v7 = vmul.f32 0.03125, %v133_v63  ;;  %v158_v12 = vmul.f32 0.03125, %v131_v4 }
  0xa6   :  { %v191_v13 = vsub.f32 %v159_v7, %v175_v5  ;;  %v190_v14 = vsub.f32 %v158_v12, %v174_v6 }
  0xa7   :  { %v137_v17 = vpop.xlane.xlu1 %136  ;;  %v135_v18 = vpop.xlane.xlu0 %134 }
  0xa8   :  { %v207_v23 = vmax.f32 %v191_v13, 0.0  ;;  %v206_v24 = vmax.f32 %v190_v14, 0.0  ;;  %v161_v27 = vmul.f32 0.03125, %v137_v17  ;;  %v160_v28 = vmul.f32 0.03125, %v135_v18 }
  0xa9   :  { %v1640_v29 = vpop.eup %1639 }
  0xaa   :  { %v1642_v34 = vpop.eup %1641  ;;  %v239_v35 = vadd.f32 1e-05, %v207_v23  ;;  %v238_v36 = vadd.f32 1e-05, %v206_v24  ;;  %v193_v37 = vsub.f32 %v161_v27, %v177_v15  ;;  %v192_v38 = vsub.f32 %v160_v28, %v176_v16 }
  0xab   :  { %v77_v40 = vpop.xlane.xlu1 %76  ;;  %v75_v41 = vpop.xlane.xlu0 %74  ;;  %v266_v42 = vmul.f32 %v1642_v34, %v218_v32  ;;  %v267_v43 = vmul.f32 %v1640_v29, %v219_v33 }
  0xac   :  { %1647 = vrsqrt.f32 %v239_v35  ;;  %v209_v44 = vmax.f32 %v193_v37, 0.0  ;;  %v208_v1 = vmax.f32 %v192_v38, 0.0  ;;  %v2054_v63 = vmul.f32 0.03125, %v77_v40 }
  0xad   :  { %v1644_v19 = vpop.eup %1643  ;;  %1649 = vrsqrt.f32 %v238_v36  ;;  %v289_v20 = vmul.f32 %v2039_v39, %v266_v42  ;;  %v290_v47 = vmul.f32 %v2039_v39, %v267_v43  ;;  %v2056_v4 = vmul.f32 0.03125, %v75_v41 }
  0xae   :  { %v1646_v48 = vpop.eup %1645  ;;  %v241_v52 = vadd.f32 1e-05, %v209_v44  ;;  %v240_v53 = vadd.f32 1e-05, %v208_v1  ;;  %v269_v0 = vmul.f32 %v1644_v19, %v221_v54  ;;  %v179_v14 = vmul.f32 %v2054_v63, %v2054_v63 }
  0xaf   :  { %v81_v55 = vpop.xlane.xlu1 %80  ;;  %v79_v56 = vpop.xlane.xlu0 %78  ;;  %v312_v57 = vadd.f32 %v2044_v3, %v289_v20  ;;  %v313_v58 = vadd.f32 %v2044_v3, %v290_v47  ;;  %v268_v5 = vmul.f32 %v1646_v48, %v220_v49  ;;  %v178_v15 = vmul.f32 %v2056_v4, %v2056_v4 }
  0xb0   :  { %1651 = vrsqrt.f32 %v241_v52  ;;  %v2058_v21 = vmul.f32 0.03125, %v81_v55  ;;  %v2060_v7 = vmul.f32 0.03125, %v79_v56  ;;  %v292_v13 = vmul.f32 %v2039_v39, %v269_v0 }
  0xb1   :  { %1653 = vrsqrt.f32 %v240_v53  ;;  %v328_v6 = vpack.c.bf16 %v313_v58, %v312_v57  ;;  %v291_v12 = vmul.f32 %v2039_v39, %v268_v5  ;;  %v223_v41 = vsub.f32 %v1829_v8, %v2016_v59 }
  0xb2   :  { %v315_v23 = vadd.f32 %v2044_v3, %v292_v13  ;;  %v181_v28 = vmul.f32 %v2058_v21, %v2058_v21  ;;  %v180_v29 = vmul.f32 %v2060_v7, %v2060_v7  ;;  %v222_v42 = vsub.f32 %v1834_v9, %v2018_v60 }
  0xb3   :  { %1555 = vmatprep.mubr.bf16.mxu0 %v328_v6  ;;  %v141_v2 = vpop.xlane.xlu1 %140  ;;  %v139_v22 = vpop.xlane.xlu0 %138  ;;  %v314_v18 = vadd.f32 %v2044_v3, %v291_v12  ;;  %v224_v60 = vsub.f32 %v1846_v11, %v2022_v62  ;;  %v225_v58 = vsub.f32 %v1841_v10, %v2020_v61 }
  0xb4   :  { %v163_v16 = vmul.f32 0.03125, %v141_v2  ;;  %v162_v17 = vmul.f32 0.03125, %v139_v22 }
  0xb5   :  { %v329_v32 = vpack.c.bf16 %v315_v23, %v314_v18 }
  0xb6   :  { %v195_v24 = vsub.f32 %v163_v16, %v179_v14  ;;  %v194_v27 = vsub.f32 %v162_v17, %v178_v15 }
  0xb7   :  { %v145_v33 = vpop.xlane.xlu1 %144  ;;  %v143_v34 = vpop.xlane.xlu0 %142  ;;  %1556 = vmatmul.mubr.bf16.vlgmr.msra.gmra.mxu0 %v329_v32 }
  0xb8   :  { %v211_v35 = vmax.f32 %v195_v24, 0.0  ;;  %v210_v36 = vmax.f32 %v194_v27, 0.0  ;;  %v165_v37 = vmul.f32 0.03125, %v145_v33  ;;  %v164_v38 = vmul.f32 0.03125, %v143_v34 }
  0xb9   :  { %v1648_v40 = vpop.eup %1647 }
  0xba   :  { %v1650_v43 = vpop.eup %1649  ;;  %v243_v44 = vadd.f32 1e-05, %v211_v35  ;;  %v242_v1 = vadd.f32 1e-05, %v210_v36  ;;  %v197_v19 = vsub.f32 %v165_v37, %v181_v28  ;;  %v196_v20 = vsub.f32 %v164_v38, %v180_v29 }
  0xbb   :  { %v85_v47 = vpop.xlane.xlu1 %84  ;;  %v83_v48 = vpop.xlane.xlu0 %82  ;;  %v270_v49 = vmul.f32 %v1650_v43, %v222_v42  ;;  %v271_v52 = vmul.f32 %v1648_v40, %v223_v41 }
  0xbc   :  { %1655 = vrsqrt.f32 %v243_v44  ;;  %v213_v53 = vmax.f32 %v197_v19, 0.0  ;;  %v212_v54 = vmax.f32 %v196_v20, 0.0  ;;  %v2086_v22 = vmul.f32 0.03125, %v85_v47 }
  0xbd   :  { %v1652_v55 = vpop.eup %1651  ;;  %1657 = vrsqrt.f32 %v242_v1  ;;  %v293_v8 = vmul.f32 %v2039_v39, %v270_v49  ;;  %v294_v59 = vmul.f32 %v2039_v39, %v271_v52  ;;  %v2088_v12 = vmul.f32 0.03125, %v83_v48 }
  0xbe   :  { %v1654_v9 = vpop.eup %1653  ;;  %v245_v56 = vadd.f32 1e-05, %v213_v53  ;;  %v244_v57 = vadd.f32 1e-05, %v212_v54  ;;  %v273_v11 = vmul.f32 %v1652_v55, %v225_v58  ;;  %v183_v18 = vmul.f32 %v2086_v22, %v2086_v22 }
  0xbf   :  { %v89_v5 = vpop.xlane.xlu1 %88  ;;  %v87_v6 = vpop.xlane.xlu0 %86  ;;  %v316_v0 = vadd.f32 %v2044_v3, %v293_v8  ;;  %v317_v2 = vadd.f32 %v2044_v3, %v294_v59  ;;  %v272_v13 = vmul.f32 %v1654_v9, %v224_v60  ;;  %v182_v23 = vmul.f32 %v2088_v12, %v2088_v12 }
  0xc0   :  { %1659 = vrsqrt.f32 %v245_v56  ;;  %v2090_v62 = vmul.f32 0.03125, %v89_v5  ;;  %v2092_v15 = vmul.f32 0.03125, %v87_v6  ;;  %v296_v17 = vmul.f32 %v2039_v39, %v273_v11 }
  0xc1   :  { %1661 = vrsqrt.f32 %v244_v57  ;;  %v330_v14 = vpack.c.bf16 %v317_v2, %v316_v0  ;;  %v295_v16 = vmul.f32 %v2039_v39, %v272_v13  ;;  %v227_v1 = vsub.f32 %v1879_v25, %v2054_v63 }
  0xc2   :  { %v319_v29 = vadd.f32 %v2044_v3, %v296_v17  ;;  %v185_v34 = vmul.f32 %v2090_v62, %v2090_v62  ;;  %v184_v35 = vmul.f32 %v2092_v15, %v2092_v15  ;;  %v226_v19 = vsub.f32 %v1884_v26, %v2056_v4 }
  0xc3   :  { %1559 = vmatprep.mubr.bf16.mxu0 %v330_v14  ;;  %v149_v10 = vpop.xlane.xlu1 %148  ;;  %v147_v61 = vpop.xlane.xlu0 %146  ;;  %v318_v28 = vadd.f32 %v2044_v3, %v295_v16  ;;  %v229_v55 = vsub.f32 %v1897_v30, %v2058_v21  ;;  %v228_v25 = vsub.f32 %v1902_v31, %v2060_v7  ;;  %v231_v13 = vsub.f32 %v1935_v45, %v2086_v22 }
  0xc4   :  { %v167_v24 = vmul.f32 0.03125, %v149_v10  ;;  %v166_v27 = vmul.f32 0.03125, %v147_v61  ;;  %v230_v11 = vsub.f32 %v1940_v46, %v2088_v12  ;;  %v233_v17 = vsub.f32 %v1953_v50, %v2090_v62 }
  0xc5   :  { %v331_v36 = vpack.c.bf16 %v319_v29, %v318_v28 }
  0xc6   :  { %v199_v32 = vsub.f32 %v167_v24, %v183_v18  ;;  %v198_v33 = vsub.f32 %v166_v27, %v182_v23  ;;  %v232_v24 = vsub.f32 %v1958_v51, %v2092_v15  ;;  %v492_v15 = vld [vmem:[%s2706_s5 + $0x20] sm:$0xff] }
  0xc7   :  { %v153_v37 = vpop.xlane.xlu1 %152  ;;  %v151_v38 = vpop.xlane.xlu0 %150  ;;  %1560 = vmatmul.mubr.bf16.gmra.mxu0 %v331_v36 }
  0xc8   :  { %v215_v40 = vmax.f32 %v199_v32, 0.0  ;;  %v214_v41 = vmax.f32 %v198_v33, 0.0  ;;  %v169_v42 = vmul.f32 0.03125, %v153_v37  ;;  %v168_v43 = vmul.f32 0.03125, %v151_v38  ;;  %v488_v37 = vld [vmem:[%s2706_s5] sm:$0xff]  ;;  %v489_v38 = vld [vmem:[%s2706_s5 + $0x8] sm:$0xff] }
  0xc9   :  { %v1656_v44 = vpop.eup %1655 }
  0xca   :  { %v1658_v20 = vpop.eup %1657  ;;  %v247_v47 = vadd.f32 1e-05, %v215_v40  ;;  %v246_v48 = vadd.f32 1e-05, %v214_v41  ;;  %v201_v49 = vsub.f32 %v169_v42, %v185_v34  ;;  %v200_v52 = vsub.f32 %v168_v43, %v184_v35  ;;  %v493_v34 = vld [vmem:[%s2706_s5 + $0x28] sm:$0xff] }
  0xcb   :  { %v274_v53 = vmul.f32 %v1658_v20, %v226_v19  ;;  %v275_v54 = vmul.f32 %v1656_v44, %v227_v1  ;;  %v506_v35 = vpack.c.bf16 %v493_v34, %v492_v15  ;;  %v504_v40 = vpack.c.bf16 %v489_v38, %v488_v37  ;;  %v1423_v43 = vld [vmem:[%s2705_s4] ss:$0 sm:$0xff] }
  0xcc   :  { %1663 = vrsqrt.f32 %v247_v47  ;;  %v217_v8 = vmax.f32 %v201_v49, 0.0  ;;  %v216_v59 = vmax.f32 %v200_v52, 0.0 }
  0xcd   :  { %v1660_v9 = vpop.eup %1659  ;;  %1665 = vrsqrt.f32 %v246_v48  ;;  %v297_v26 = vmul.f32 %v2039_v39, %v274_v53  ;;  %v298_v63 = vmul.f32 %v2039_v39, %v275_v54  ;;  %1581 = vmatprep.subr.bf16.mxu1 %v506_v35 }
  0xce   :  { %v1662_v4 = vpop.eup %1661  ;;  %v249_v60 = vadd.f32 1e-05, %v217_v8  ;;  %v248_v56 = vadd.f32 1e-05, %v216_v59  ;;  %v277_v57 = vmul.f32 %v1660_v9, %v229_v55  ;;  %1582 = vmatpush3.bf16.msra.mxu1 %v506_v35 }
  0xcf   :  { %v320_v58 = vadd.f32 %v2044_v3, %v297_v26  ;;  %v321_v30 = vadd.f32 %v2044_v3, %v298_v63  ;;  %v276_v21 = vmul.f32 %v1662_v4, %v228_v25 }
  0xd0   :  { %1667 = vrsqrt.f32 %v249_v60  ;;  %v300_v5 = vmul.f32 %v2039_v39, %v277_v57 }
  0xd1   :  { %1669 = vrsqrt.f32 %v248_v56  ;;  %v332_v6 = vpack.c.bf16 %v321_v30, %v320_v58  ;;  %v299_v31 = vmul.f32 %v2039_v39, %v276_v21 }
  0xd2   :  { %v323_v7 = vadd.f32 %v2044_v3, %v300_v5 }
  0xd3   :  { %1563 = vmatprep.mubr.bf16.mxu0 %v332_v6  ;;  %v322_v0 = vadd.f32 %v2044_v3, %v299_v31 }
  0xd5   :  { %v333_v2 = vpack.c.bf16 %v323_v7, %v322_v0 }
  0xd7   :  { %1564 = vmatmul.mubr.bf16.gmra.mxu0 %v333_v2 }
  0xd9   :  { %v1664_v14 = vpop.eup %1663 }
  0xda   :  { %v1666_v10 = vpop.eup %1665  ;;  %v279_v61 = vmul.f32 %v1664_v14, %v231_v13 }
  0xdb   :  { %v278_v16 = vmul.f32 %v1666_v10, %v230_v11 }
  0xdc   :  { %v302_v18 = vmul.f32 %v2039_v39, %v279_v61 }
  0xdd   :  { %v1668_v23 = vpop.eup %1667  ;;  %v301_v27 = vmul.f32 %v2039_v39, %v278_v16 }
  0xde   :  { %v1670_v28 = vpop.eup %1669  ;;  %v325_v45 = vadd.f32 %v2044_v3, %v302_v18  ;;  %v281_v22 = vmul.f32 %v1668_v23, %v233_v17 }
  0xdf   :  { %v324_v46 = vadd.f32 %v2044_v3, %v301_v27  ;;  %v280_v12 = vmul.f32 %v1670_v28, %v232_v24 }
  0xe0   :  { %v304_v29 = vmul.f32 %v2039_v39, %v281_v22 }
  0xe1   :  { %v334_v32 = vpack.c.bf16 %v325_v45, %v324_v46  ;;  %v303_v50 = vmul.f32 %v2039_v39, %v280_v12  ;;  %v490_v39 = vld [vmem:[%s2706_s5 + $0x10] sm:$0xff] }
  0xe2   :  { %v327_v62 = vadd.f32 %v2044_v3, %v304_v29 }
  0xe3   :  { %1567 = vmatprep.mubr.bf16.mxu0 %v334_v32  ;;  %v326_v33 = vadd.f32 %v2044_v3, %v303_v50  ;;  %v491_v3 = vld [vmem:[%s2706_s5 + $0x18] sm:$0xff] }
  0xe4   :  { %v505_v36 = vpack.c.bf16 %v491_v3, %v490_v39  ;;  %v2162_v39 = vld [vmem:[%s2707_s6] ss:$0 sm:$0xff] }
  0xe5   :  { %v335_v51 = vpack.c.bf16 %v327_v62, %v326_v33 }
  0xe6   :  { %1583 = vmatprep.subr.bf16.mxu1 %v505_v36 }
  0xe7   :  { %1568 = vmatmul.mubr.bf16.gmra.mxu0 %v335_v51  ;;  %1584 = vmatpush3.bf16.msra.mxu1 %v505_v36 }
  0xe8   :  { %1585 = vmatprep.subr.bf16.mxu1 %v504_v40 }
  0xeb   :  { %1586 = vmatpush3.bf16.msra.mxu1 %v504_v40 }
 0x177   :  { %v1557_v41 = vpop.f32.mrf.mxu0 }
 0x178   :  { %v410_v20 = vadd.f32 %v1557_v41, %v1423_v43 }
 0x179   :  { %v401_v42 = vpop.f32.mrf.mxu0 }
 0x17a   :  { %v402_v1 = vadd.f32 %v1423_v43, %v401_v42  ;;  %v466_v54 = vmax.f32 %v410_v20, 0.0 }
 0x17b   :  { %v1558_v44 = vpop.f32.mrf.mxu0 }
 0x17c   :  { %v413_v19 = vadd.f32 %v1558_v44, %v1423_v43  ;;  %v464_v52 = vmax.f32 %v402_v1, 0.0 }
 0x17d   :  { %v404_v47 = vpop.f32.mrf.mxu0 }
 0x17e   :  { %v405_v48 = vadd.f32 %v1423_v43, %v404_v47  ;;  %v467_v49 = vmax.f32 %v413_v19, 0.0  ;;  %v953_v47 = vld [vmem:[%s2710_s9 + $0x158] sm:$0xff] }
 0x180   :  { %v465_v53 = vmax.f32 %v405_v48, 0.0  ;;  %v481_v8 = vpack.c.bf16 %v467_v49, %v466_v54  ;;  %v956_v48 = vld [vmem:[%s2710_s9 + $0x170] sm:$0xff] }
 0x181   :  { %v952_v54 = vld [vmem:[%s2710_s9 + $0x150] sm:$0xff] }
 0x182   :  { %v480_v55 = vpack.c.bf16 %v465_v53, %v464_v52  ;;  %v980_v53 = vpack.c.bf16 %v956_v48, %v953_v47 }
 0x184   :  { %1587 = vmatprep.mubr.bf16.mxu1 %v480_v55  ;;  %v955_v55 = vld [vmem:[%s2710_s9 + $0x168] sm:$0xff]  ;;  %999 = vmatprep.subr.bf16.mxu0 %v980_v53  ;;  %v925_v53 = vld [vmem:[%s2710_s9 + $0x78] sm:$0xff] }
 0x185   :  { %1588 = vmatmul.mubr.bf16.vlgmr.msra.gmra.mxu1 %v481_v8 }
 0x187   :  { %v1561_v59 = vpop.f32.mrf.mxu0 }
 0x188   :  { %v426_v4 = vadd.f32 %v1561_v59, %v1423_v43  ;;  %v979_v59 = vpack.c.bf16 %v955_v55, %v952_v54  ;;  %v939_v54 = vld [vmem:[%s2710_s9 + $0xe8] sm:$0xff] }
 0x189   :  { %v417_v9 = vpop.f32.mrf.mxu0 }
 0x18a   :  { %v418_v26 = vadd.f32 %v1423_v43, %v417_v9  ;;  %v470_v21 = vmax.f32 %v426_v4, 0.0  ;;  %1000 = vmatpush1.bf16.msra.mxu0 %v979_v59  ;;  %v917_v59 = vld [vmem:[%s2710_s9 + $0x38] sm:$0xff] }
 0x18b   :  { %v1562_v25 = vpop.f32.mrf.mxu0 }
 0x18c   :  { %v429_v63 = vadd.f32 %v1562_v25, %v1423_v43  ;;  %v468_v58 = vmax.f32 %v418_v26, 0.0  ;;  %v947_v25 = vld [vmem:[%s2710_s9 + $0x128] sm:$0xff]  ;;  %v950_v26 = vld [vmem:[%s2710_s9 + $0x140] sm:$0xff] }
 0x18d   :  { %v420_v60 = vpop.f32.mrf.mxu0 }
 0x18e   :  { %v421_v56 = vadd.f32 %v1423_v43, %v420_v60  ;;  %v471_v57 = vmax.f32 %v429_v63, 0.0  ;;  %v977_v60 = vpack.c.bf16 %v950_v26, %v947_v25  ;;  %v930_v25 = vld [vmem:[%s2710_s9 + $0xa0] sm:$0xff] }
 0x190   :  { %v469_v30 = vmax.f32 %v421_v56, 0.0  ;;  %v483_v6 = vpack.c.bf16 %v471_v57, %v470_v21  ;;  %v946_v56 = vld [vmem:[%s2710_s9 + $0x120] sm:$0xff]  ;;  %v949_v57 = vld [vmem:[%s2710_s9 + $0x138] sm:$0xff]  ;;  %1001 = vmatprep.subr.bf16.mxu0 %v977_v60  ;;  %v944_v21 = vld [vmem:[%s2710_s9 + $0x110] sm:$0xff] }
 0x192   :  { %v482_v5 = vpack.c.bf16 %v469_v30, %v468_v58  ;;  %v976_v58 = vpack.c.bf16 %v949_v57, %v946_v56  ;;  %v941_v30 = vld [vmem:[%s2710_s9 + $0xf8] sm:$0xff]  ;;  %v916_v56 = vld [vmem:[%s2710_s9 + $0x30] sm:$0xff]  ;;  %v919_v57 = vld [vmem:[%s2710_s9 + $0x48] sm:$0xff] }
 0x194   :  { %1591 = vmatprep.mubr.bf16.mxu1 %v482_v5  ;;  %v954_v5 = vld [vmem:[%s2710_s9 + $0x160] sm:$0xff]  ;;  %1002 = vmatpush1.bf16.msra.mxu0 %v976_v58  ;;  %v933_v58 = vld [vmem:[%s2710_s9 + $0xb8] sm:$0xff] }
 0x195   :  { %1592 = vmatmul.mubr.bf16.gmra.mxu1 %v483_v6 }
 0x197   :  { %v1565_v31 = vpop.f32.mrf.mxu0 }
 0x198   :  { %v442_v14 = vadd.f32 %v1565_v31, %v1423_v43 }
 0x199   :  { %v433_v7 = vpop.f32.mrf.mxu0 }
 0x19a   :  { %v434_v2 = vadd.f32 %v1423_v43, %v433_v7  ;;  %v474_v18 = vmax.f32 %v442_v14, 0.0  ;;  %v974_v7 = vpack.c.bf16 %v944_v21, %v941_v30  ;;  %v961_v30 = vpack.c.bf16 %v919_v57, %v916_v56 }
 0x19b   :  { %v1566_v0 = vpop.f32.mrf.mxu0  ;;  %v969_v21 = vpack.c.bf16 %v933_v58, %v930_v25 }
 0x19c   :  { %v445_v13 = vadd.f32 %v1566_v0, %v1423_v43  ;;  %v472_v16 = vmax.f32 %v434_v2, 0.0  ;;  %v940_v0 = vld [vmem:[%s2710_s9 + $0xf0] sm:$0xff]  ;;  %v943_v2 = vld [vmem:[%s2710_s9 + $0x108] sm:$0xff]  ;;  %1003 = vmatprep.subr.bf16.mxu0 %v974_v7  ;;  %v914_v7 = vld [vmem:[%s2710_s9 + $0x20] sm:$0xff] }
 0x19d   :  { %v436_v11 = vpop.f32.mrf.mxu0  ;;  %v973_v14 = vpack.c.bf16 %v943_v2, %v940_v0  ;;  %v924_v0 = vld [vmem:[%s2710_s9 + $0x70] sm:$0xff] }
 0x19e   :  { %v437_v10 = vadd.f32 %v1423_v43, %v436_v11  ;;  %v475_v61 = vmax.f32 %v445_v13, 0.0  ;;  %v957_v13 = vld [vmem:[%s2710_s9 + $0x178] sm:$0xff] }
 0x19f   :  { %v981_v11 = vpack.c.bf16 %v957_v13, %v954_v5  ;;  %1004 = vmatpush1.bf16.msra.mxu0 %v973_v14 }
 0x1a0   :  { %v473_v17 = vmax.f32 %v437_v10, 0.0  ;;  %v485_v24 = vpack.c.bf16 %v475_v61, %v474_v18  ;;  %v935_v61 = vld [vmem:[%s2710_s9 + $0xc8] sm:$0xff] }
 0x1a1   :  { %1603 = vmatprep.subr.bf16.mxu1 %v981_v11 }
 0x1a2   :  { %v484_v23 = vpack.c.bf16 %v473_v17, %v472_v16  ;;  %v938_v16 = vld [vmem:[%s2710_s9 + $0xe0] sm:$0xff]  ;;  %v948_v17 = vld [vmem:[%s2710_s9 + $0x130] sm:$0xff]  ;;  %1604 = vmatpush3.bf16.msra.mxu1 %v981_v11 }
 0x1a3   :  { %v910_v11 = vld [vmem:[%s2710_s9] sm:$0xff] }
 0x1a4   :  { %1595 = vmatprep.mubr.bf16.mxu1 %v484_v23 }
 0x1a5   :  { %1596 = vmatmul.mubr.bf16.gmra.mxu1 %v485_v24  ;;  %v971_v24 = vpack.c.bf16 %v938_v16, %v935_v61  ;;  %v927_v61 = vld [vmem:[%s2710_s9 + $0x88] sm:$0xff] }
 0x1a7   :  { %v1569_v27 = vpop.f32.mrf.mxu0  ;;  %1005 = vmatprep.subr.bf16.mxu0 %v971_v24 }
 0x1a8   :  { %v458_v12 = vadd.f32 %v1569_v27, %v1423_v43  ;;  %v934_v27 = vld [vmem:[%s2710_s9 + $0xc0] sm:$0xff] }
 0x1a9   :  { %v449_v28 = vpop.f32.mrf.mxu0 }
 0x1aa   :  { %v450_v22 = vadd.f32 %v1423_v43, %v449_v28  ;;  %v478_v51 = vmax.f32 %v458_v12, 0.0  ;;  %v937_v28 = vld [vmem:[%s2710_s9 + $0xd8] sm:$0xff] }
 0x1ab   :  { %v1570_v45 = vpop.f32.mrf.mxu0 }
 0x1ac   :  { %v461_v46 = vadd.f32 %v1570_v45, %v1423_v43  ;;  %v476_v62 = vmax.f32 %v450_v22, 0.0  ;;  %v951_v45 = vld [vmem:[%s2710_s9 + $0x148] sm:$0xff] }
 0x1ad   :  { %v452_v29 = vpop.f32.mrf.mxu0  ;;  %v978_v12 = vpack.c.bf16 %v951_v45, %v948_v17  ;;  %v918_v45 = vld [vmem:[%s2710_s9 + $0x40] sm:$0xff] }
 0x1ae   :  { %v453_v32 = vadd.f32 %v1423_v43, %v452_v29  ;;  %v479_v50 = vmax.f32 %v461_v46, 0.0  ;;  %v970_v46 = vpack.c.bf16 %v937_v28, %v934_v27 }
 0x1af   :  { %1605 = vmatprep.subr.bf16.mxu1 %v978_v12 }
 0x1b0   :  { %v477_v33 = vmax.f32 %v453_v32, 0.0  ;;  %v487_v34 = vpack.c.bf16 %v479_v50, %v478_v51  ;;  %v929_v50 = vld [vmem:[%s2710_s9 + $0x98] sm:$0xff]  ;;  %1006 = vmatpush1.bf16.msra.mxu0 %v970_v46  ;;  %1606 = vmatpush3.bf16.msra.mxu1 %v978_v12  ;;  %v1725_v12 = vmov 0  }
 0x1b1   :  { %1031 = vmatprep.mubr.bf16.mxu0 %v1725_v12 }
 0x1b2   :  { %v486_v15 = vpack.c.bf16 %v477_v33, %v476_v62  ;;  %v932_v62 = vld [vmem:[%s2710_s9 + $0xb0] sm:$0xff]  ;;  %v942_v33 = vld [vmem:[%s2710_s9 + $0x100] sm:$0xff] }
 0x1b4   :  { %1599 = vmatprep.mubr.bf16.mxu1 %v486_v15  ;;  %v968_v15 = vpack.c.bf16 %v932_v62, %v929_v50 }
 0x1b5   :  { %1600 = vmatmul.mubr.bf16.gmra.mxu1 %v487_v34  ;;  %v928_v34 = vld [vmem:[%s2710_s9 + $0x90] sm:$0xff] }
 0x1b6   :  { %1007 = vmatprep.subr.bf16.mxu0 %v968_v15 }
 0x245   :  { %v1589_v35 = vpop.f32.mrf.mxu1 }
 0x246   :  { %v2175_v42 = vadd.f32 %v1589_v35, %v2162_v39  ;;  %v931_v35 = vld [vmem:[%s2710_s9 + $0xa8] sm:$0xff] }
 0x247   :  { %v553_v3 = vpop.f32.mrf.mxu1 }
 0x248   :  { %v2165_v36 = vadd.f32 %v2162_v39, %v553_v3  ;;  %v666_v1 = vmul.f32 %v2175_v42, %v2175_v42  ;;  %v945_v3 = vld [vmem:[%s2710_s9 + $0x118] sm:$0xff] }
 0x249   :  { %v1590_v37 = vpop.f32.mrf.mxu1 }
 0x24a   :  { %616 = vadd.xlane.f32.xlu0 %v2165_v36  ;;  %v664_v41 = vmul.f32 %v2165_v36, %v2165_v36  ;;  %v2181_v44 = vadd.f32 %v1590_v37, %v2162_v39 }
 0x24b   :  { %v556_v38 = vpop.f32.mrf.mxu1 }
 0x24c   :  { %v2169_v40 = vadd.f32 %v2162_v39, %v556_v38  ;;  %v667_v52 = vmul.f32 %v2181_v44, %v2181_v44  ;;  %v967_v38 = vpack.c.bf16 %v931_v35, %v928_v34 }
 0x24e   :  { %618 = vadd.xlane.f32.xlu1 %v2169_v40  ;;  %680 = vadd.xlane.f32.xlu0 %v664_v41  ;;  %v665_v43 = vmul.f32 %v2169_v40, %v2169_v40  ;;  %v975_v41 = vpack.c.bf16 %v945_v3, %v942_v33  ;;  %v912_v33 = vld [vmem:[%s2710_s9 + $0x10] sm:$0xff] }
 0x24f   :  { %1008 = vmatpush1.bf16.msra.mxu0 %v967_v38 }
 0x250   :  { %1607 = vmatprep.subr.bf16.mxu1 %v975_v41 }
 0x251   :  { %1608 = vmatpush3.bf16.msra.mxu1 %v975_v41 }
 0x252   :  { %682 = vadd.xlane.f32.xlu1 %v665_v43  ;;  %620 = vadd.xlane.f32.xlu0 %v2175_v42 }
 0x255   :  { %v1593_v19 = vpop.f32.mrf.mxu1 }
 0x256   :  { %622 = vadd.xlane.f32.xlu1 %v2181_v44  ;;  %684 = vadd.xlane.f32.xlu0 %v666_v1  ;;  %v2232_v6 = vadd.f32 %v1593_v19, %v2162_v39  ;;  %v923_v1 = vld [vmem:[%s2710_s9 + $0x68] sm:$0xff]  ;;  %v926_v19 = vld [vmem:[%s2710_s9 + $0x80] sm:$0xff] }
 0x257   :  { %v569_v20 = vpop.f32.mrf.mxu1  ;;  %v965_v48 = vpack.c.bf16 %v926_v19, %v923_v1 }
 0x258   :  { %v2193_v49 = vadd.f32 %v2162_v39, %v569_v20  ;;  %v670_v23 = vmul.f32 %v2232_v6, %v2232_v6  ;;  %v936_v20 = vld [vmem:[%s2710_s9 + $0xd0] sm:$0xff] }
 0x259   :  { %v1594_v8 = vpop.f32.mrf.mxu1  ;;  %1009 = vmatprep.subr.bf16.mxu0 %v965_v48 }
 0x25a   :  { %686 = vadd.xlane.f32.xlu1 %v667_v52  ;;  %624 = vadd.xlane.f32.xlu0 %v2193_v49  ;;  %v668_v4 = vmul.f32 %v2193_v49, %v2193_v49  ;;  %v2256_v18 = vadd.f32 %v1594_v8, %v2162_v39  ;;  %v922_v52 = vld [vmem:[%s2710_s9 + $0x60] sm:$0xff]  ;;  %v972_v8 = vpack.c.bf16 %v939_v54, %v936_v20 }
 0x25b   :  { %v572_v9 = vpop.f32.mrf.mxu1  ;;  %v964_v55 = vpack.c.bf16 %v925_v53, %v922_v52 }
 0x25c   :  { %v2211_v63 = vadd.f32 %v2162_v39, %v572_v9  ;;  %v671_v51 = vmul.f32 %v2256_v18, %v2256_v18  ;;  %1609 = vmatprep.subr.bf16.mxu1 %v972_v8  ;;  %v920_v9 = vld [vmem:[%s2710_s9 + $0x50] sm:$0xff] }
 0x25d   :  { %1010 = vmatpush1.bf16.msra.mxu0 %v964_v55  ;;  %1610 = vmatpush3.bf16.msra.mxu1 %v972_v8  ;;  %v962_v60 = vpack.c.bf16 %v920_v9, %v917_v59 }
 0x25e   :  { %626 = vadd.xlane.f32.xlu1 %v2211_v63  ;;  %688 = vadd.xlane.f32.xlu0 %v668_v4  ;;  %v669_v31 = vmul.f32 %v2211_v63, %v2211_v63 }
 0x25f   :  { %1011 = vmatprep.subr.bf16.mxu0 %v962_v60  ;;  %1611 = vmatprep.subr.bf16.mxu1 %v969_v21 }
 0x261   :  { %1012 = vmatpush1.bf16.msra.mxu0 %v961_v30  ;;  %1612 = vmatpush3.bf16.msra.mxu1 %v969_v21 }
 0x262   :  { %690 = vadd.xlane.f32.xlu1 %v669_v31  ;;  %628 = vadd.xlane.f32.xlu0 %v2232_v6  ;;  %v911_v31 = vld [vmem:[%s2710_s9 + $0x8] sm:$0xff] }
 0x263   :  { %v959_v14 = vpack.c.bf16 %v914_v7, %v911_v31 }
 0x265   :  { %v1597_v10 = vpop.f32.mrf.mxu1  ;;  %1013 = vmatprep.subr.bf16.mxu0 %v959_v14 }
 0x266   :  { %630 = vadd.xlane.f32.xlu1 %v2256_v18  ;;  %692 = vadd.xlane.f32.xlu0 %v670_v23  ;;  %v2328_v26 = vadd.f32 %v1597_v10, %v2162_v39  ;;  %v913_v10 = vld [vmem:[%s2710_s9 + $0x18] sm:$0xff]  ;;  %v966_v23 = vpack.c.bf16 %v927_v61, %v924_v0 }
 0x267   :  { %v585_v22 = vpop.f32.mrf.mxu1  ;;  %v958_v17 = vpack.c.bf16 %v913_v10, %v910_v11 }
 0x268   :  { %v2271_v29 = vadd.f32 %v2162_v39, %v585_v22  ;;  %v674_v13 = vmul.f32 %v2328_v26, %v2328_v26  ;;  %1613 = vmatprep.subr.bf16.mxu1 %v966_v23  ;;  %v921_v22 = vld [vmem:[%s2710_s9 + $0x58] sm:$0xff] }
 0x269   :  { %v1598_v32 = vpop.f32.mrf.mxu1  ;;  %1014 = vmatpush1.bf16.msra.mxu0 %v958_v17  ;;  %1614 = vmatpush3.bf16.msra.mxu1 %v966_v23 }
 0x26a   :  { %694 = vadd.xlane.f32.xlu1 %v671_v51  ;;  %632 = vadd.xlane.f32.xlu0 %v2271_v29  ;;  %v672_v47 = vmul.f32 %v2271_v29, %v2271_v29  ;;  %v2352_v2 = vadd.f32 %v1598_v32, %v2162_v39  ;;  %v963_v32 = vpack.c.bf16 %v921_v22, %v918_v45  ;;  %v915_v51 = vld [vmem:[%s2710_s9 + $0x28] sm:$0xff] }
 0x26b   :  { %v588_v37 = vpop.f32.mrf.mxu1  ;;  %v960_v15 = vpack.c.bf16 %v915_v51, %v912_v33 }
 0x26c   :  { %v2295_v43 = vadd.f32 %v2162_v39, %v588_v37  ;;  %v675_v28 = vmul.f32 %v2352_v2, %v2352_v2  ;;  %1615 = vmatprep.subr.bf16.mxu1 %v963_v32 }
 0x26d   :  { %1616 = vmatpush3.bf16.msra.mxu1 %v963_v32 }
 0x26e   :  { %634 = vadd.xlane.f32.xlu1 %v2295_v43  ;;  %696 = vadd.xlane.f32.xlu0 %v672_v47  ;;  %v673_v4 = vmul.f32 %v2295_v43, %v2295_v43 }
 0x26f   :  { %1617 = vmatprep.subr.bf16.mxu1 %v960_v15 }
 0x271   :  { %1618 = vmatpush3.bf16.msra.mxu1 %v960_v15 }
 0x272   :  { %698 = vadd.xlane.f32.xlu1 %v673_v4  ;;  %636 = vadd.xlane.f32.xlu0 %v2328_v26 }
 0x275   :  { %v1601_v5 = vpop.f32.mrf.mxu1 }
 0x276   :  { %638 = vadd.xlane.f32.xlu1 %v2352_v2  ;;  %700 = vadd.xlane.f32.xlu0 %v674_v13  ;;  %v2392_v34 = vadd.f32 %v1601_v5, %v2162_v39 }
 0x277   :  { %v601_v16 = vpop.f32.mrf.mxu1 }
 0x278   :  { %v2367_v24 = vadd.f32 %v2162_v39, %v601_v16  ;;  %v678_v37 = vmul.f32 %v2392_v34, %v2392_v34 }
 0x279   :  { %v1602_v27 = vpop.f32.mrf.mxu1 }
 0x27a   :  { %702 = vadd.xlane.f32.xlu1 %v675_v28  ;;  %640 = vadd.xlane.f32.xlu0 %v2367_v24  ;;  %v676_v62 = vmul.f32 %v2367_v24, %v2367_v24  ;;  %v2398_v3 = vadd.f32 %v1602_v27, %v2162_v39 }
 0x27b   :  { %v604_v46 = vpop.f32.mrf.mxu1 }
 0x27c   :  { %v2380_v50 = vadd.f32 %v2162_v39, %v604_v46  ;;  %v679_v38 = vmul.f32 %v2398_v3, %v2398_v3 }
 0x27e   :  { %642 = vadd.xlane.f32.xlu1 %v2380_v50  ;;  %704 = vadd.xlane.f32.xlu0 %v676_v62  ;;  %v677_v35 = vmul.f32 %v2380_v50, %v2380_v50 }
 0x282   :  { %706 = vadd.xlane.f32.xlu1 %v677_v35  ;;  %644 = vadd.xlane.f32.xlu0 %v2392_v34 }
 0x286   :  { %646 = vadd.xlane.f32.xlu1 %v2398_v3  ;;  %708 = vadd.xlane.f32.xlu0 %v678_v37 }
 0x28a   :  { %710 = vadd.xlane.f32.xlu1 %v679_v38 }
 0x2d3   :  { %v617_v41 = vpop.xlane.xlu0 %616 }
 0x2d4   :  { %v648_v1 = vmul.f32 0.03125, %v617_v41 }
 0x2d6   :  { %v728_v47 = vmul.f32 %v648_v1, %v648_v1  ;;  %v776_v41 = vsub.f32 %v2165_v36, %v648_v1  ;;  %v2440_v36 = vld [vmem:[%s2709_s8] ss:$0 sm:$0xff] }
 0x2d7   :  { %v619_v19 = vpop.xlane.xlu1 %618  ;;  %v681_v20 = vpop.xlane.xlu0 %680 }
 0x2d8   :  { %v2405_v48 = vmul.f32 0.03125, %v619_v19  ;;  %v712_v52 = vmul.f32 0.03125, %v681_v20 }
 0x2da   :  { %v744_v39 = vsub.f32 %v712_v52, %v728_v47  ;;  %v729_v55 = vmul.f32 %v2405_v48, %v2405_v48  ;;  %v2431_v47 = vld [vmem:[%s2708_s7] ss:$0 sm:$0xff]  ;;  %s1726_s7 = smov [#allocation2]  }
 0x2db   :  { %v683_v53 = vpop.xlane.xlu1 %682  ;;  %v621_v54 = vpop.xlane.xlu0 %620  ;;  %s1406_s8 = sshll.u32 %s1726_s7, 4  ;;  %s1407_s8 = int_to_ptr.vmem [resolvable:$true] %s1406_s8 }
 0x2dc   :  { %v760_v8 = vmax.f32 %v744_v39, 0.0  ;;  %v713_v59 = vmul.f32 0.03125, %v683_v53  ;;  %v2409_v9 = vmul.f32 0.03125, %v621_v54  ;;  %s1703_s5 = scalar_lea.vmem %s1407_s8, 2048  ;;  %p1708_p1 = scmp.lt.s32.totalorder %s1407_s8, %s1407_s8 }
 0x2dd   :  { %p1704_p0 = scmp.ne.s32.totalorder %s1407_s8, %s1703_s5  ;;  %p1709_p2 = scmp.lt.s32.totalorder %s1703_s5, %s1703_s5 }
 0x2de   :  { %v792_v25 = vadd.f32 1e-05, %v760_v8  ;;  %v745_v4 = vsub.f32 %v713_v59, %v729_v55  ;;  %v730_v60 = vmul.f32 %v2409_v9, %v2409_v9 }
 0x2df   :  { %v623_v56 = vpop.xlane.xlu1 %622  ;;  %v685_v57 = vpop.xlane.xlu0 %684  ;;  %p1710_p3 = por %p1709_p2, %p1708_p1 }
 0x2e0   :  { %1671 = vrsqrt.f32 %v792_v25  ;;  %v761_v58 = vmax.f32 %v745_v4, 0.0  ;;  %v2413_v30 = vmul.f32 0.03125, %v623_v56  ;;  %v714_v21 = vmul.f32 0.03125, %v685_v57 }
 0x2e1   :  { %v777_v25 = vsub.f32 %v2169_v40, %v2405_v48  ;;  %v778_v40 = vsub.f32 %v2175_v42, %v2409_v9  ;;  %p1711_p4 = pnand %p1710_p3, %p1704_p0 }
 0x2e2   :  { %v793_v5 = vadd.f32 1e-05, %v761_v58  ;;  %v746_v31 = vsub.f32 %v714_v21, %v730_v60  ;;  %v731_v7 = vmul.f32 %v2413_v30, %v2413_v30  ;;  %v779_v42 = vsub.f32 %v2181_v44, %v2413_v30 }
 0x2e3   :  { %v687_v0 = vpop.xlane.xlu1 %686  ;;  %v625_v13 = vpop.xlane.xlu0 %624 }
 0x2e4   :  { %1673 = vrsqrt.f32 %v793_v5  ;;  %v762_v14 = vmax.f32 %v746_v31, 0.0  ;;  %v715_v11 = vmul.f32 0.03125, %v687_v0  ;;  %v2417_v10 = vmul.f32 0.03125, %v625_v13 }
 0x2e6   :  { %v794_v61 = vadd.f32 1e-05, %v762_v14  ;;  %v747_v16 = vsub.f32 %v715_v11, %v731_v7  ;;  %v732_v17 = vmul.f32 %v2417_v10, %v2417_v10 }
 0x2e7   :  { %v627_v23 = vpop.xlane.xlu1 %626  ;;  %v689_v27 = vpop.xlane.xlu0 %688 }
 0x2e8   :  { %1675 = vrsqrt.f32 %v794_v61  ;;  %v763_v28 = vmax.f32 %v747_v16, 0.0  ;;  %v2421_v45 = vmul.f32 0.03125, %v627_v23  ;;  %v716_v22 = vmul.f32 0.03125, %v689_v27 }
 0x2ea   :  { %v795_v46 = vadd.f32 1e-05, %v763_v28  ;;  %v748_v32 = vsub.f32 %v716_v22, %v732_v17  ;;  %v733_v62 = vmul.f32 %v2421_v45, %v2421_v45 }
 0x2eb   :  { %v691_v33 = vpop.xlane.xlu1 %690  ;;  %v629_v51 = vpop.xlane.xlu0 %628 }
 0x2ec   :  { %1677 = vrsqrt.f32 %v795_v46  ;;  %v764_v15 = vmax.f32 %v748_v32, 0.0  ;;  %v717_v35 = vmul.f32 0.03125, %v691_v33  ;;  %v2425_v37 = vmul.f32 0.03125, %v629_v51 }
 0x2ed   :  { %v1672_v38 = vpop.eup %1671 }
 0x2ee   :  { %v796_v19 = vadd.f32 1e-05, %v764_v15  ;;  %v749_v20 = vsub.f32 %v717_v35, %v733_v62  ;;  %v734_v52 = vmul.f32 %v2425_v37, %v2425_v37  ;;  %v824_v54 = vmul.f32 %v1672_v38, %v776_v41 }
 0x2ef   :  { %v631_v39 = vpop.xlane.xlu1 %630  ;;  %v693_v53 = vpop.xlane.xlu0 %692 }
 0x2f0   :  { %1679 = vrsqrt.f32 %v796_v19  ;;  %v765_v55 = vmax.f32 %v749_v20, 0.0  ;;  %v2435_v8 = vmul.f32 0.03125, %v631_v39  ;;  %v718_v59 = vmul.f32 0.03125, %v693_v53 }
 0x2f1   :  { %v1674_v1 = vpop.eup %1673  ;;  %v847_v4 = vmul.f32 %v2431_v47, %v824_v54  ;;  %v780_v53 = vsub.f32 %v2193_v49, %v2417_v10  ;;  %v781_v49 = vsub.f32 %v2211_v63, %v2421_v45 }
 0x2f2   :  { %v797_v60 = vadd.f32 1e-05, %v765_v55  ;;  %v750_v56 = vsub.f32 %v718_v59, %v734_v52  ;;  %v735_v57 = vmul.f32 %v2435_v8, %v2435_v8  ;;  %v825_v5 = vmul.f32 %v1674_v1, %v777_v25 }
 0x2f3   :  { %v695_v58 = vpop.xlane.xlu1 %694  ;;  %v633_v21 = vpop.xlane.xlu0 %632  ;;  %v870_v31 = vadd.f32 %v2440_v36, %v847_v4 }
 0x2f4   :  { %1681 = vrsqrt.f32 %v797_v60  ;;  %v766_v7 = vmax.f32 %v750_v56, 0.0  ;;  %v719_v0 = vmul.f32 0.03125, %v695_v58  ;;  %v2448_v13 = vmul.f32 0.03125, %v633_v21 }
 0x2f5   :  { %v1676_v14 = vpop.eup %1675  ;;  %v848_v48 = vmul.f32 %v2431_v47, %v825_v5  ;;  %886 = vst [vmem:[#allocation2] sm:$0xff] %v870_v31 }
 0x2f6   :  { %v798_v11 = vadd.f32 1e-05, %v766_v7  ;;  %v751_v61 = vsub.f32 %v719_v0, %v735_v57  ;;  %v736_v16 = vmul.f32 %v2448_v13, %v2448_v13  ;;  %v826_v28 = vmul.f32 %v1676_v14, %v778_v40 }
 0x2f7   :  { %v635_v17 = vpop.xlane.xlu1 %634  ;;  %v697_v23 = vpop.xlane.xlu0 %696  ;;  %v871_v27 = vadd.f32 %v2440_v36, %v848_v48 }
 0x2f8   :  { %1683 = vrsqrt.f32 %v798_v11  ;;  %v767_v22 = vmax.f32 %v751_v61, 0.0  ;;  %v2456_v46 = vmul.f32 0.03125, %v635_v17  ;;  %v720_v32 = vmul.f32 0.03125, %v697_v23 }
 0x2f9   :  { %v1678_v62 = vpop.eup %1677  ;;  %887 = vst [vmem:[#allocation2 + $0x8] sm:$0xff] %v871_v27  ;;  %v902_v9 = vpack.c.bf16 %v871_v27, %v870_v31  ;;  %v849_v33 = vmul.f32 %v2431_v47, %v826_v28  ;;  %v782_v23 = vsub.f32 %v2232_v6, %v2425_v37  ;;  %v783_v6 = vsub.f32 %v2256_v18, %v2435_v8 }
 0x2fa   :  { %v799_v51 = vadd.f32 1e-05, %v767_v22  ;;  %v752_v15 = vsub.f32 %v720_v32, %v736_v16  ;;  %v737_v35 = vmul.f32 %v2456_v46, %v2456_v46  ;;  %v827_v19 = vmul.f32 %v1678_v62, %v779_v42 }
 0x2fb   :  { %1032 = vmatmul.mubr.bf16.vlgmr.msra.gmra.mxu0 %v902_v9  ;;  %1619 = vmatprep.mubr.bf16.mxu1 %v902_v9  ;;  %v699_v38 = vpop.xlane.xlu1 %698  ;;  %v637_v41 = vpop.xlane.xlu0 %636  ;;  %v872_v20 = vadd.f32 %v2440_v36, %v849_v33 }
 0x2fc   :  { %1685 = vrsqrt.f32 %v799_v51  ;;  %v768_v52 = vmax.f32 %v752_v15, 0.0  ;;  %v721_v39 = vmul.f32 0.03125, %v699_v38  ;;  %v2464_v44 = vmul.f32 0.03125, %v637_v41  ;;  %1041 = vmatprep.mubr.bf16.mxu0 %v1725_v12 }
 0x2fd   :  { %v1680_v30 = vpop.eup %1679  ;;  %v850_v54 = vmul.f32 %v2431_v47, %v827_v19  ;;  %888 = vst [vmem:[#allocation2 + $0x10] sm:$0xff] %v872_v20 }
 0x2fe   :  { %v800_v55 = vadd.f32 1e-05, %v768_v52  ;;  %v753_v59 = vsub.f32 %v721_v39, %v737_v35  ;;  %v738_v1 = vmul.f32 %v2464_v44, %v2464_v44  ;;  %v828_v56 = vmul.f32 %v1680_v30, %v780_v53 }
 0x2ff   :  { %v639_v25 = vpop.xlane.xlu1 %638  ;;  %v701_v4 = vpop.xlane.xlu0 %700  ;;  %v873_v60 = vadd.f32 %v2440_v36, %v850_v54 }
 0x300   :  { %1687 = vrsqrt.f32 %v800_v55  ;;  %v769_v57 = vmax.f32 %v753_v59, 0.0  ;;  %v2473_v58 = vmul.f32 0.03125, %v639_v25  ;;  %v722_v21 = vmul.f32 0.03125, %v701_v4 }
 0x301   :  { %v1682_v5 = vpop.eup %1681  ;;  %889 = vst [vmem:[#allocation2 + $0x18] sm:$0xff] %v873_v60  ;;  %v903_v10 = vpack.c.bf16 %v873_v60, %v872_v20  ;;  %v851_v31 = vmul.f32 %v2431_v47, %v828_v56 }
 0x302   :  { %v801_v7 = vadd.f32 1e-05, %v769_v57  ;;  %v754_v0 = vsub.f32 %v722_v21, %v738_v1  ;;  %v739_v14 = vmul.f32 %v2473_v58, %v2473_v58  ;;  %v829_v11 = vmul.f32 %v1682_v5, %v781_v49 }
 0x303   :  { %1042 = vmatmul.mubr.bf16.gmra.mxu0 %v903_v10  ;;  %1620 = vmatmul.mubr.bf16.vlgmr.msra.gmra.mxu1 %v903_v10  ;;  %v703_v40 = vpop.xlane.xlu1 %702  ;;  %v641_v48 = vpop.xlane.xlu0 %640  ;;  %v874_v61 = vadd.f32 %v2440_v36, %v851_v31  ;;  %v784_v1 = vsub.f32 %v2271_v29, %v2448_v13  ;;  %v785_v29 = vsub.f32 %v2295_v43, %v2456_v46 }
 0x304   :  { %1689 = vrsqrt.f32 %v801_v7  ;;  %v770_v16 = vmax.f32 %v754_v0, 0.0  ;;  %v723_v17 = vmul.f32 0.03125, %v703_v40  ;;  %v2481_v63 = vmul.f32 0.03125, %v641_v48  ;;  %1051 = vmatprep.mubr.bf16.mxu0 %v1725_v12 }
 0x305   :  { %v1684_v45 = vpop.eup %1683  ;;  %v852_v27 = vmul.f32 %v2431_v47, %v829_v11  ;;  %890 = vst [vmem:[#allocation2 + $0x20] sm:$0xff] %v874_v61  ;;  %v786_v11 = vsub.f32 %v2328_v26, %v2464_v44 }
 0x306   :  { %v802_v28 = vadd.f32 1e-05, %v770_v16  ;;  %v755_v22 = vsub.f32 %v723_v17, %v739_v14  ;;  %v740_v32 = vmul.f32 %v2481_v63, %v2481_v63  ;;  %v830_v33 = vmul.f32 %v1684_v45, %v782_v23 }
 0x307   :  { %v643_v62 = vpop.xlane.xlu1 %642  ;;  %v705_v42 = vpop.xlane.xlu0 %704  ;;  %v875_v9 = vadd.f32 %v2440_v36, %v852_v27 }
 0x308   :  { %1691 = vrsqrt.f32 %v802_v28  ;;  %v771_v51 = vmax.f32 %v755_v22, 0.0  ;;  %v2490_v15 = vmul.f32 0.03125, %v643_v62  ;;  %v724_v35 = vmul.f32 0.03125, %v705_v42 }
 0x309   :  { %v1686_v38 = vpop.eup %1685  ;;  %891 = vst [vmem:[#allocation2 + $0x28] sm:$0xff] %v875_v9  ;;  %v904_v37 = vpack.c.bf16 %v875_v9, %v874_v61  ;;  %v853_v41 = vmul.f32 %v2431_v47, %v830_v33 }
 0x30a   :  { %v803_v19 = vadd.f32 1e-05, %v771_v51  ;;  %v756_v20 = vsub.f32 %v724_v35, %v740_v32  ;;  %v741_v52 = vmul.f32 %v2490_v15, %v2490_v15  ;;  %v831_v53 = vmul.f32 %v1686_v38, %v783_v6 }
 0x30b   :  { %1052 = vmatmul.mubr.bf16.gmra.mxu0 %v904_v37  ;;  %1623 = vmatprep.mubr.bf16.mxu1 %v904_v37  ;;  %v707_v39 = vpop.xlane.xlu1 %706  ;;  %v645_v30 = vpop.xlane.xlu0 %644  ;;  %v876_v54 = vadd.f32 %v2440_v36, %v853_v41  ;;  %v787_v32 = vsub.f32 %v2352_v2, %v2473_v58  ;;  %v788_v6 = vsub.f32 %v2367_v24, %v2481_v63 }
 0x30c   :  { %1693 = vrsqrt.f32 %v803_v19  ;;  %v772_v55 = vmax.f32 %v756_v20, 0.0  ;;  %v725_v59 = vmul.f32 0.03125, %v707_v39  ;;  %v2498_v18 = vmul.f32 0.03125, %v645_v30  ;;  %1061 = vmatprep.mubr.bf16.mxu0 %v1725_v12 }
 0x30d   :  { %v1688_v8 = vpop.eup %1687  ;;  %v854_v25 = vmul.f32 %v2431_v47, %v831_v53  ;;  %892 = vst [vmem:[#allocation2 + $0x30] sm:$0xff] %v876_v54  ;;  %v789_v19 = vsub.f32 %v2380_v50, %v2490_v15 }
 0x30e   :  { %v804_v4 = vadd.f32 1e-05, %v772_v55  ;;  %v757_v60 = vsub.f32 %v725_v59, %v741_v52  ;;  %v742_v56 = vmul.f32 %v2498_v18, %v2498_v18  ;;  %v832_v49 = vmul.f32 %v1688_v8, %v784_v1 }
 0x30f   :  { %v647_v57 = vpop.xlane.xlu1 %646  ;;  %v709_v21 = vpop.xlane.xlu0 %708  ;;  %v877_v5 = vadd.f32 %v2440_v36, %v854_v25  ;;  %v790_v30 = vsub.f32 %v2392_v34, %v2498_v18 }
 0x310   :  { %1695 = vrsqrt.f32 %v804_v4  ;;  %v773_v10 = vmax.f32 %v757_v60, 0.0  ;;  %v2507_v31 = vmul.f32 0.03125, %v647_v57  ;;  %v726_v7 = vmul.f32 0.03125, %v709_v21 }
 0x311   :  { %v1690_v0 = vpop.eup %1689  ;;  %893 = vst [vmem:[#allocation2 + $0x38] sm:$0xff] %v877_v5  ;;  %v905_v13 = vpack.c.bf16 %v877_v5, %v876_v54  ;;  %v855_v14 = vmul.f32 %v2431_v47, %v832_v49 }
 0x312   :  { %v805_v40 = vadd.f32 1e-05, %v773_v10  ;;  %v758_v48 = vsub.f32 %v726_v7, %v742_v56  ;;  %v833_v16 = vmul.f32 %v1690_v0, %v785_v29  ;;  %v743_v45 = vmul.f32 %v2507_v31, %v2507_v31 }
 0x313   :  { %1062 = vmatmul.mubr.bf16.gmra.mxu0 %v905_v13  ;;  %1624 = vmatmul.mubr.bf16.gmra.mxu1 %v905_v13  ;;  %v711_v61 = vpop.xlane.xlu1 %710  ;;  %v878_v17 = vadd.f32 %v2440_v36, %v855_v14  ;;  %v791_v55 = vsub.f32 %v2398_v3, %v2507_v31 }
 0x314   :  { %1697 = vrsqrt.f32 %v805_v40  ;;  %v774_v43 = vmax.f32 %v758_v48, 0.0  ;;  %v727_v46 = vmul.f32 0.03125, %v711_v61  ;;  %1071 = vmatprep.mubr.bf16.mxu0 %v1725_v12  ;;  %v856_v27 = vmul.f32 %v2431_v47, %v833_v16 }
 0x315   :  { %v1692_v23 = vpop.eup %1691  ;;  %894 = vst [vmem:[#allocation2 + $0x40] sm:$0xff] %v878_v17 }
 0x316   :  { %v806_v28 = vadd.f32 1e-05, %v774_v43  ;;  %v759_v26 = vsub.f32 %v727_v46, %v743_v45  ;;  %v834_v44 = vmul.f32 %v1692_v23, %v786_v11  ;;  %v879_v22 = vadd.f32 %v2440_v36, %v856_v27 }
 0x318   :  { %1699 = vrsqrt.f32 %v806_v28  ;;  %v775_v62 = vmax.f32 %v759_v26, 0.0  ;;  %v857_v42 = vmul.f32 %v2431_v47, %v834_v44  ;;  %895 = vst [vmem:[#allocation2 + $0x48] sm:$0xff] %v879_v22  ;;  %v906_v33 = vpack.c.bf16 %v879_v22, %v878_v17 }
 0x319   :  { %v1694_v9 = vpop.eup %1693 }
 0x31a   :  { %v807_v51 = vadd.f32 1e-05, %v775_v62  ;;  %v835_v35 = vmul.f32 %v1694_v9, %v787_v32  ;;  %v880_v38 = vadd.f32 %v2440_v36, %v857_v42  ;;  %1627 = vmatprep.mubr.bf16.mxu1 %v906_v33 }
 0x31b   :  { %1072 = vmatmul.mubr.bf16.gmra.mxu0 %v906_v33 }
 0x31c   :  { %1701 = vrsqrt.f32 %v807_v51  ;;  %1081 = vmatprep.mubr.bf16.mxu0 %v1725_v12  ;;  %v858_v2 = vmul.f32 %v2431_v47, %v835_v35  ;;  %896 = vst [vmem:[#allocation2 + $0x50] sm:$0xff] %v880_v38 }
 0x31d   :  { %v1696_v58 = vpop.eup %1695 }
 0x31e   :  { %v881_v37 = vadd.f32 %v2440_v36, %v858_v2  ;;  %v836_v41 = vmul.f32 %v1696_v58, %v788_v6 }
 0x320   :  { %897 = vst [vmem:[#allocation2 + $0x58] sm:$0xff] %v881_v37  ;;  %v907_v20 = vpack.c.bf16 %v881_v37, %v880_v38  ;;  %v859_v52 = vmul.f32 %v2431_v47, %v836_v41 }
 0x321   :  { %v1698_v39 = vpop.eup %1697 }
 0x322   :  { %1628 = vmatmul.mubr.bf16.gmra.mxu1 %v907_v20  ;;  %v837_v24 = vmul.f32 %v1698_v39, %v789_v19  ;;  %v882_v63 = vadd.f32 %v2440_v36, %v859_v52 }
 0x323   :  { %1082 = vmatmul.mubr.bf16.gmra.mxu0 %v907_v20 }
 0x324   :  { %1091 = vmatprep.mubr.bf16.mxu0 %v1725_v12  ;;  %v860_v53 = vmul.f32 %v2431_v47, %v837_v24  ;;  %898 = vst [vmem:[#allocation2 + $0x60] sm:$0xff] %v882_v63 }
 0x325   :  { %v1700_v54 = vpop.eup %1699 }
 0x326   :  { %v883_v50 = vadd.f32 %v2440_v36, %v860_v53  ;;  %v838_v15 = vmul.f32 %v1700_v54, %v790_v30 }
 0x328   :  { %899 = vst [vmem:[#allocation2 + $0x68] sm:$0xff] %v883_v50  ;;  %v908_v59 = vpack.c.bf16 %v883_v50, %v882_v63  ;;  %v861_v8 = vmul.f32 %v2431_v47, %v838_v15 }
 0x329   :  { %v1702_v1 = vpop.eup %1701 }
 0x32a   :  { %1631 = vmatprep.mubr.bf16.mxu1 %v908_v59  ;;  %v839_v25 = vmul.f32 %v1702_v1, %v791_v55  ;;  %v884_v34 = vadd.f32 %v2440_v36, %v861_v8 }
 0x32b   :  { %1092 = vmatmul.mubr.bf16.gmra.mxu0 %v908_v59 }
 0x32c   :  { %1101 = vmatprep.mubr.bf16.mxu0 %v1725_v12  ;;  %v862_v18 = vmul.f32 %v2431_v47, %v839_v25  ;;  %900 = vst [vmem:[#allocation2 + $0x70] sm:$0xff] %v884_v34 }
 0x32e   :  { %v885_v4 = vadd.f32 %v2440_v36, %v862_v18 }
 0x330   :  { %901 = vst [vmem:[#allocation2 + $0x78] sm:$0xff] %v885_v4  ;;  %v909_v60 = vpack.c.bf16 %v885_v4, %v884_v34 }
 0x332   :  { %1632 = vmatmul.mubr.bf16.gmra.mxu1 %v909_v60 }
 0x333   :  { %1102 = vmatmul.mubr.bf16.gmra.mxu0 %v909_v60 }
 0x334   :  { %1714 = shalt.err (!%p1711_p4)
}
 0x335   :  { %s1727_s6 = smov 128   ;;  %s1728_s27 = smov 8   ;;  %v984_v12 = vlaneseq  ;;  %v982_v56 = vld [vmem:[%s2711_s10] sm:$0x7] }
 0x336   :  { %1412 = dma.vmem_to_hbm [thread:$0]  %s1407_s8, 2048, %s2712_s11, [#allocation3], %s1727_s6, %s1727_s6, %s1728_s27  }
 0x337   :  { %v985_v3 = vshrl.u32 %v984_v12, 7 }
 0x339   :  { %v986_v47 = vsub.s32 0, %v985_v3  ;;  %v990_v36 = vsub.s32 1, %v985_v3  ;;  %v994_v49 = vsub.s32 2, %v985_v3 }
 0x33b   :  { %v2551_v57 = vrot.slane %v982_v56, %v986_v47  ;;  %v2553_v21 = vrot.slane %v982_v56, %v990_v36  ;;  %v2557_v13 = vrot.slane %v982_v56, %v994_v49 }
 0x3bb   :  { %v1033_v5 = vpop.f32.mrf.mxu0 }
 0x3bc   :  { %v1034_v31 = vadd.f32 %v1033_v5, %v2551_v57 }
 0x3bd   :  { %v1035_v10 = vpop.f32.mrf.mxu0 }
 0x3be   :  { %v1036_v7 = vadd.f32 %v1035_v10, %v2553_v21 }
 0x3bf   :  { %v1037_v0 = vpop.f32.mrf.mxu0 }
 0x3c0   :  { %v1459_v29 = vpack.c.bf16 %v1036_v7, %v1034_v31  ;;  %v1038_v40 = vadd.f32 %v1037_v0, %v2551_v57 }
 0x3c1   :  { %v1039_v14 = vpop.f32.mrf.mxu0 }
 0x3c2   :  { %1369 = vst [vmem:[%s2713_s12] sm:$0xff] %v1459_v29  ;;  %v1040_v48 = vadd.f32 %v1039_v14, %v2553_v21 }
 0x3c3   :  { %v1043_v11 = vpop.f32.mrf.mxu0  ;;  %v1621_v61 = vpop.f32.mrf.mxu1 }
 0x3c4   :  { %v1461_v16 = vpack.c.bf16 %v1040_v48, %v1038_v40  ;;  %v1155_v17 = vadd.f32 %v1621_v61, %v2557_v13  ;;  %v1044_v46 = vadd.f32 %v1043_v11, %v2551_v57 }
 0x3c5   :  { %v1045_v45 = vpop.f32.mrf.mxu0  ;;  %v1146_v43 = vpop.f32.mrf.mxu1 }
 0x3c6   :  { %1371 = vst [vmem:[%s2713_s12 + $0xc] sm:$0xff] %v1461_v16  ;;  %v1464_v23 = vpack.c.bf16 %v1155_v17, %v1155_v17  ;;  %v1046_v27 = vadd.f32 %v1045_v45, %v2553_v21  ;;  %v1147_v28 = vadd.f32 %v1146_v43, %v2557_v13 }
 0x3c7   :  { %v1047_v26 = vpop.f32.mrf.mxu0  ;;  %v1622_v44 = vpop.f32.mrf.mxu1 }
 0x3c8   :  { %1374 = vst [vmem:[%s2713_s12 + $0x20] sm:$0xf] %v1464_v23  ;;  %v1463_v22 = vpack.c.bf16 %v1046_v27, %v1044_v46  ;;  %v1460_v32 = vpack.c.bf16 %v1147_v28, %v1147_v28  ;;  %v1158_v62 = vadd.f32 %v1622_v44, %v2557_v13  ;;  %v1048_v33 = vadd.f32 %v1047_v26, %v2551_v57 }
 0x3c9   :  { %v1049_v42 = vpop.f32.mrf.mxu0  ;;  %v1149_v9 = vpop.f32.mrf.mxu1 }
 0x3ca   :  { %1373 = vst [vmem:[%s2713_s12 + $0x18] sm:$0xff] %v1463_v22  ;;  %1370 = vst [vmem:[%s2713_s12 + $0x8] sm:$0xf] %v1460_v32  ;;  %v1466_v51 = vpack.c.bf16 %v1158_v62, %v1158_v62  ;;  %v1050_v35 = vadd.f32 %v1049_v42, %v2553_v21  ;;  %v1150_v38 = vadd.f32 %v1149_v9, %v2557_v13 }
 0x3cb   :  { %v1053_v6 = vpop.f32.mrf.mxu0 }
 0x3cc   :  { %1376 = vst [vmem:[%s2713_s12 + $0x2c] sm:$0xf] %v1466_v51  ;;  %v1465_v2 = vpack.c.bf16 %v1050_v35, %v1048_v33  ;;  %v1462_v58 = vpack.c.bf16 %v1150_v38, %v1150_v38  ;;  %v1054_v41 = vadd.f32 %v1053_v6, %v2551_v57 }
 0x3cd   :  { %v1055_v37 = vpop.f32.mrf.mxu0 }
 0x3ce   :  { %1375 = vst [vmem:[%s2713_s12 + $0x24] sm:$0xff] %v1465_v2  ;;  %1372 = vst [vmem:[%s2713_s12 + $0x14] sm:$0xf] %v1462_v58  ;;  %v1056_v19 = vadd.f32 %v1055_v37, %v2553_v21 }
 0x3cf   :  { %v1057_v20 = vpop.f32.mrf.mxu0 }
 0x3d0   :  { %v1467_v52 = vpack.c.bf16 %v1056_v19, %v1054_v41  ;;  %v1058_v24 = vadd.f32 %v1057_v20, %v2551_v57 }
 0x3d1   :  { %v1059_v39 = vpop.f32.mrf.mxu0 }
 0x3d2   :  { %1377 = vst [vmem:[%s2713_s12 + $0x30] sm:$0xff] %v1467_v52  ;;  %v1060_v63 = vadd.f32 %v1059_v39, %v2553_v21 }
 0x3d3   :  { %v1063_v30 = vpop.f32.mrf.mxu0  ;;  %v1625_v53 = vpop.f32.mrf.mxu1 }
 0x3d4   :  { %v1469_v54 = vpack.c.bf16 %v1060_v63, %v1058_v24  ;;  %v1171_v50 = vadd.f32 %v1625_v53, %v2557_v13  ;;  %v1064_v59 = vadd.f32 %v1063_v30, %v2551_v57 }
 0x3d5   :  { %v1065_v15 = vpop.f32.mrf.mxu0  ;;  %v1162_v55 = vpop.f32.mrf.mxu1 }
 0x3d6   :  { %1379 = vst [vmem:[%s2713_s12 + $0x3c] sm:$0xff] %v1469_v54  ;;  %v1472_v8 = vpack.c.bf16 %v1171_v50, %v1171_v50  ;;  %v1066_v1 = vadd.f32 %v1065_v15, %v2553_v21  ;;  %v1163_v25 = vadd.f32 %v1162_v55, %v2557_v13 }
 0x3d7   :  { %v1067_v34 = vpop.f32.mrf.mxu0  ;;  %v1626_v18 = vpop.f32.mrf.mxu1 }
 0x3d8   :  { %1382 = vst [vmem:[%s2713_s12 + $0x50] sm:$0xf] %v1472_v8  ;;  %v1471_v4 = vpack.c.bf16 %v1066_v1, %v1064_v59  ;;  %v1468_v60 = vpack.c.bf16 %v1163_v25, %v1163_v25  ;;  %v1174_v12 = vadd.f32 %v1626_v18, %v2557_v13  ;;  %v1068_v36 = vadd.f32 %v1067_v34, %v2551_v57 }
 0x3d9   :  { %v1069_v3 = vpop.f32.mrf.mxu0  ;;  %v1165_v47 = vpop.f32.mrf.mxu1 }
 0x3da   :  { %1381 = vst [vmem:[%s2713_s12 + $0x48] sm:$0xff] %v1471_v4  ;;  %1378 = vst [vmem:[%s2713_s12 + $0x38] sm:$0xf] %v1468_v60  ;;  %v1474_v56 = vpack.c.bf16 %v1174_v12, %v1174_v12  ;;  %v1070_v5 = vadd.f32 %v1069_v3, %v2553_v21  ;;  %v1166_v49 = vadd.f32 %v1165_v47, %v2557_v13 }
 0x3db   :  { %v1073_v10 = vpop.f32.mrf.mxu0 }
 0x3dc   :  { %1384 = vst [vmem:[%s2713_s12 + $0x5c] sm:$0xf] %v1474_v56  ;;  %v1473_v31 = vpack.c.bf16 %v1070_v5, %v1068_v36  ;;  %v1470_v7 = vpack.c.bf16 %v1166_v49, %v1166_v49  ;;  %v1074_v29 = vadd.f32 %v1073_v10, %v2551_v57 }
 0x3dd   :  { %v1075_v0 = vpop.f32.mrf.mxu0 }
 0x3de   :  { %1383 = vst [vmem:[%s2713_s12 + $0x54] sm:$0xff] %v1473_v31  ;;  %1380 = vst [vmem:[%s2713_s12 + $0x44] sm:$0xf] %v1470_v7  ;;  %v1076_v14 = vadd.f32 %v1075_v0, %v2553_v21 }
 0x3df   :  { %v1077_v40 = vpop.f32.mrf.mxu0 }
 0x3e0   :  { %v1475_v48 = vpack.c.bf16 %v1076_v14, %v1074_v29  ;;  %v1078_v61 = vadd.f32 %v1077_v40, %v2551_v57 }
 0x3e1   :  { %v1079_v11 = vpop.f32.mrf.mxu0 }
 0x3e2   :  { %1385 = vst [vmem:[%s2713_s12 + $0x60] sm:$0xff] %v1475_v48  ;;  %v1080_v16 = vadd.f32 %v1079_v11, %v2553_v21  ;;  %v1629_v17 = vpop.f32.mrf.mxu1 }
 0x3e3   :  { %v1083_v45 = vpop.f32.mrf.mxu0  ;;  %v1187_v43 = vadd.f32 %v1629_v17, %v2557_v13 }
 0x3e4   :  { %v1477_v46 = vpack.c.bf16 %v1080_v16, %v1078_v61  ;;  %v1178_v23 = vpop.f32.mrf.mxu1  ;;  %v1084_v44 = vadd.f32 %v1083_v45, %v2551_v57 }
 0x3e5   :  { %v1480_v27 = vpack.c.bf16 %v1187_v43, %v1187_v43  ;;  %v1085_v28 = vpop.f32.mrf.mxu0  ;;  %v1179_v26 = vadd.f32 %v1178_v23, %v2557_v13 }
 0x3e6   :  { %1387 = vst [vmem:[%s2713_s12 + $0x6c] sm:$0xff] %v1477_v46  ;;  %v1086_v22 = vadd.f32 %v1085_v28, %v2553_v21  ;;  %v1630_v32 = vpop.f32.mrf.mxu1 }
 0x3e7   :  { %1390 = vst [vmem:[%s2713_s12 + $0x80] sm:$0xf] %v1480_v27  ;;  %v1476_v62 = vpack.c.bf16 %v1179_v26, %v1179_v26  ;;  %v1087_v42 = vpop.f32.mrf.mxu0  ;;  %v1190_v9 = vadd.f32 %v1630_v32, %v2557_v13 }
 0x3e8   :  { %v1479_v33 = vpack.c.bf16 %v1086_v22, %v1084_v44  ;;  %v1181_v51 = vpop.f32.mrf.mxu1  ;;  %v1088_v2 = vadd.f32 %v1087_v42, %v2551_v57 }
 0x3e9   :  { %1386 = vst [vmem:[%s2713_s12 + $0x68] sm:$0xf] %v1476_v62  ;;  %v1482_v35 = vpack.c.bf16 %v1190_v9, %v1190_v9  ;;  %v1089_v38 = vpop.f32.mrf.mxu0  ;;  %v1182_v6 = vadd.f32 %v1181_v51, %v2557_v13 }
 0x3ea   :  { %1389 = vst [vmem:[%s2713_s12 + $0x78] sm:$0xff] %v1479_v33  ;;  %v1090_v58 = vadd.f32 %v1089_v38, %v2553_v21 }
 0x3eb   :  { %1392 = vst [vmem:[%s2713_s12 + $0x8c] sm:$0xf] %v1482_v35  ;;  %v1478_v37 = vpack.c.bf16 %v1182_v6, %v1182_v6  ;;  %v1093_v41 = vpop.f32.mrf.mxu0 }
 0x3ec   :  { %v1481_v19 = vpack.c.bf16 %v1090_v58, %v1088_v2  ;;  %v1094_v52 = vadd.f32 %v1093_v41, %v2551_v57 }
 0x3ed   :  { %1388 = vst [vmem:[%s2713_s12 + $0x74] sm:$0xf] %v1478_v37  ;;  %v1095_v20 = vpop.f32.mrf.mxu0 }
 0x3ee   :  { %1391 = vst [vmem:[%s2713_s12 + $0x84] sm:$0xff] %v1481_v19  ;;  %v1096_v39 = vadd.f32 %v1095_v20, %v2553_v21 }
 0x3ef   :  { %v1097_v24 = vpop.f32.mrf.mxu0 }
 0x3f0   :  { %v1483_v63 = vpack.c.bf16 %v1096_v39, %v1094_v52  ;;  %v1098_v53 = vadd.f32 %v1097_v24, %v2551_v57 }
 0x3f1   :  { %v1099_v30 = vpop.f32.mrf.mxu0 }
 0x3f2   :  { %1393 = vst [vmem:[%s2713_s12 + $0x90] sm:$0xff] %v1483_v63  ;;  %v1100_v54 = vadd.f32 %v1099_v30, %v2553_v21  ;;  %v1633_v50 = vpop.f32.mrf.mxu1 }
 0x3f3   :  { %v1103_v15 = vpop.f32.mrf.mxu0  ;;  %v1203_v55 = vadd.f32 %v1633_v50, %v2557_v13 }
 0x3f4   :  { %v1485_v59 = vpack.c.bf16 %v1100_v54, %v1098_v53  ;;  %v1194_v8 = vpop.f32.mrf.mxu1  ;;  %v1104_v18 = vadd.f32 %v1103_v15, %v2551_v57 }
 0x3f5   :  { %v1488_v1 = vpack.c.bf16 %v1203_v55, %v1203_v55  ;;  %v1105_v25 = vpop.f32.mrf.mxu0  ;;  %v1195_v34 = vadd.f32 %v1194_v8, %v2557_v13 }
 0x3f6   :  { %1395 = vst [vmem:[%s2713_s12 + $0x9c] sm:$0xff] %v1485_v59  ;;  %v1106_v4 = vadd.f32 %v1105_v25, %v2553_v21  ;;  %v1634_v60 = vpop.f32.mrf.mxu1 }
 0x3f7   :  { %1398 = vst [vmem:[%s2713_s12 + $0xb0] sm:$0xf] %v1488_v1  ;;  %v1484_v12 = vpack.c.bf16 %v1195_v34, %v1195_v34  ;;  %v1107_v3 = vpop.f32.mrf.mxu0  ;;  %v1206_v47 = vadd.f32 %v1634_v60, %v2557_v13 }
 0x3f8   :  { %v1487_v36 = vpack.c.bf16 %v1106_v4, %v1104_v18  ;;  %v1197_v56 = vpop.f32.mrf.mxu1  ;;  %v1108_v31 = vadd.f32 %v1107_v3, %v2551_v57 }
 0x3f9   :  { %1394 = vst [vmem:[%s2713_s12 + $0x98] sm:$0xf] %v1484_v12  ;;  %v1490_v5 = vpack.c.bf16 %v1206_v47, %v1206_v47  ;;  %v1109_v49 = vpop.f32.mrf.mxu0  ;;  %v1198_v10 = vadd.f32 %v1197_v56, %v2557_v13 }
 0x3fa   :  { %1397 = vst [vmem:[%s2713_s12 + $0xa8] sm:$0xff] %v1487_v36  ;;  %v1110_v7 = vadd.f32 %v1109_v49, %v2553_v21 }
 0x3fb   :  { %1400 = vst [vmem:[%s2713_s12 + $0xbc] sm:$0xf] %v1490_v5  ;;  %v1486_v0 = vpack.c.bf16 %v1198_v10, %v1198_v10 }
 0x3fc   :  { %v1489_v29 = vpack.c.bf16 %v1110_v7, %v1108_v31 }
 0x3fd   :  { %1396 = vst [vmem:[%s2713_s12 + $0xa4] sm:$0xf] %v1486_v0 }
 0x3fe   :  { %1399 = vst [vmem:[%s2713_s12 + $0xb4] sm:$0xff] %v1489_v29 }
 0x3ff   :  { %1723 = dma.done.wait [#allocation3], 2048  }
 0x400   :  { %1724 = vsyncadd [#allocation3], 4294965248 }
 0x401   :  { %1420 = vsyncpa [#allocation3], 1 }

</bundles_post_ra>
